<compile_context>
chip_gen: v5e
topology: v5e:2x2
jax: 0.10.0
libtpu: 0.0.40
codegen_flags: <defaults>
</compile_context>

<pallas_src>
import functools
import math

import jax
import jax.numpy as jnp
from jax.experimental import pallas as pl
from jax.experimental.pallas import tpu as pltpu


MXU_DTYPE = jnp.bfloat16  # set to jnp.float32 for full-precision matmuls


def _col_tile(n, target=512):
    """Pixel-axis tile: 512 (multiple of 128) or the full axis if it is small."""
    return n if n <= target else target


# ---------------------------------------------------------------------------
# Kernel 1: conv1 = 1x1 conv with bias, NCHW-native:  y[:, n] = W @ x[:, n] + b
# ---------------------------------------------------------------------------
def _conv1_kernel(x_ref, w_ref, b_ref, o_ref):
    y = jnp.dot(w_ref[...], x_ref[...].astype(w_ref.dtype),
                preferred_element_type=jnp.float32)          # (C, tn) f32 acc
    o_ref[...] = (y + b_ref[...]).astype(o_ref.dtype)


def conv1x1_bias(x_bcn, w_oi, bias, *, out_dtype, tn):
    B, C, N = x_bcn.shape
    nt = pl.cdiv(N, tn)
    return pl.pallas_call(
        _conv1_kernel,
        out_shape=jax.ShapeDtypeStruct((B, C, N), out_dtype),
        grid_spec=pltpu.PrefetchScalarGridSpec(
            num_scalar_prefetch=0,
            grid=(B, nt),
            in_specs=[
                pl.BlockSpec((None, C, tn), lambda b, j: (b, 0, j)),
                pl.BlockSpec((C, C), lambda b, j: (0, 0)),
                pl.BlockSpec((C, 1), lambda b, j: (0, 0)),
            ],
            out_specs=pl.BlockSpec((None, C, tn), lambda b, j: (b, 0, j)),
        ),
        compiler_params=pltpu.CompilerParams(
            dimension_semantics=("parallel", "parallel")),
    )(x_bcn, w_oi, bias)


# ---------------------------------------------------------------------------
# Kernel 2: EM attention iterations + reconstruction (mu @ z^T) + ReLU.
# One grid step per batch element; the whole (C, N) slab lives in VMEM.
# ---------------------------------------------------------------------------
def _em_kernel(x_ref, mu_ref, xout_ref, muout_ref, *, stage_num, mxu_dtype):
    # x: (C, N) (channels on sublanes, pixels on lanes), mu: (C, K).
    x_mx = x_ref[...].astype(mxu_dtype)      # MXU operand, cast once (hoisted)
    mu = mu_ref[...]                         # f32
    z = None
    for _ in range(stage_num):
        # z = x^T @ mu : (N, K), contraction over channels.
        z = jax.lax.dot_general(
            x_mx, mu.astype(mxu_dtype), (((0,), (0,)), ((), ())),
            preferred_element_type=jnp.float32)
        # softmax over K (torch: F.softmax(z, dim=2)), f32 on the VPU/EUP.
        z = jnp.exp(z - jnp.max(z, axis=-1, keepdims=True))
        z = z * pl.reciprocal(jnp.sum(z, axis=-1, keepdims=True), approx=True)
        # z_ = z / (1e-6 + z.sum over pixels)  ->  reciprocal-multiply.
        z_ = z * pl.reciprocal(1e-6 + jnp.sum(z, axis=0, keepdims=True),
                               approx=True)
        # mu = x @ z_ : (C, K), then l2-normalize over channels:
        # mu / (1e-6 + sqrt(sum mu^2))  ->  mu * recip(1e-6 + sqrt(.)).
        mu = jnp.dot(x_mx, z_.astype(mxu_dtype),
                     preferred_element_type=jnp.float32)
        mu = mu * pl.reciprocal(
            1e-6 + jnp.sqrt(jnp.sum(mu * mu, axis=0, keepdims=True)),
            approx=True)
    # x_rec = mu @ z^T : (C, N); ReLU is applied here (before conv2).
    x_rec = jax.lax.dot_general(
        mu.astype(mxu_dtype), z.astype(mxu_dtype), (((1,), (1,)), ((), ())),
        preferred_element_type=jnp.float32)
    xout_ref[...] = jnp.maximum(x_rec, 0.0).astype(xout_ref.dtype)
    muout_ref[...] = mu


def em_attention(x_bcn, mu_1ck, *, stage_num, mxu_dtype, rec_dtype):
    B, C, N = x_bcn.shape
    K = mu_1ck.shape[-1]
    kernel = functools.partial(_em_kernel, stage_num=stage_num,
                               mxu_dtype=mxu_dtype)

    # Explicit VMEM budget: the whole (C, N) slab (input + reconstruction) is
    # resident (double-buffered) per grid step, plus z/softmax temporaries.
    itemsize_in = jnp.dtype(x_bcn.dtype).itemsize
    itemsize_out = jnp.dtype(rec_dtype).itemsize
    est = (2 * C * N * (itemsize_in + itemsize_out)
           + 8 * N * K * 4 + 8 * C * K * 4
           + (2 << 20))
    vmem_limit = int(min(max(est, 32 * 1024 * 1024), 64 * 1024 * 1024))
    # TODO(synk): for very large feature maps (C*N slabs of tens of MiB, e.g.
    # on v7x's 64 MiB VMEM) the EM stage should tile N instead: accumulate
    # x @ z_ and the per-basis column-sums of z across N tiles, normalize once
    # per stage, and recompute z per tile for the reconstruction pass.

    return pl.pallas_call(
        kernel,
        out_shape=(
            jax.ShapeDtypeStruct((B, C, N), rec_dtype),
            jax.ShapeDtypeStruct((B, C, K), jnp.float32),
        ),
        grid_spec=pltpu.PrefetchScalarGridSpec(
            num_scalar_prefetch=0,
            grid=(B,),
            in_specs=[
                pl.BlockSpec((None, C, N), lambda b: (b, 0, 0)),
                # mu is (1, C, K): broadcast the same block to every batch
                # element instead of materializing mu.repeat(b, 1, 1) in HBM.
                pl.BlockSpec((None, C, K), lambda b: (0, 0, 0)),
            ],
            out_specs=(
                pl.BlockSpec((None, C, N), lambda b: (b, 0, 0)),
                pl.BlockSpec((None, C, K), lambda b: (b, 0, 0)),
            ),
        ),
        compiler_params=pltpu.CompilerParams(
            dimension_semantics=("parallel",),
            vmem_limit_bytes=vmem_limit),
    )(x_bcn, mu_1ck)


# ---------------------------------------------------------------------------
# Kernel 3: conv2 (1x1, no bias) fused with BatchNorm batch-statistics
# accumulation (per-channel sum and sum-of-squares across the whole grid).
# ---------------------------------------------------------------------------
def _conv2_bn_stats_kernel(x_ref, w_ref, y_ref, sum_ref, sq_ref,
                           sum_acc, sq_acc, *, n_total, tn):
    b = pl.program_id(0)
    j = pl.program_id(1)

    @pl.when((b == 0) & (j == 0))
    def _():
        sum_acc[...] = jnp.zeros_like(sum_acc)
        sq_acc[...] = jnp.zeros_like(sq_acc)

    y = jnp.dot(w_ref[...], x_ref[...].astype(w_ref.dtype),
                preferred_element_type=jnp.float32)          # (C, tn) f32
    y_ref[...] = y

    # Mask the tail columns of a partial final tile out of the statistics.
    if n_total % tn:
        col = jax.lax.broadcasted_iota(jnp.int32, y.shape, 1) + j * tn
        y = jnp.where(col < n_total, y, 0.0)
    sum_acc[...] += jnp.sum(y, axis=1, keepdims=True)
    sq_acc[...] += jnp.sum(y * y, axis=1, keepdims=True)

    @pl.when((b == pl.num_programs(0) - 1) & (j == pl.num_programs(1) - 1))
    def _():
        sum_ref[...] = sum_acc[...]
        sq_ref[...] = sq_acc[...]


def conv1x1_bn_stats(x_bcn, w_oi, *, tn):
    B, C, N = x_bcn.shape
    nt = pl.cdiv(N, tn)
    kernel = functools.partial(_conv2_bn_stats_kernel, n_total=N, tn=tn)
    return pl.pallas_call(
        kernel,
        out_shape=(
            jax.ShapeDtypeStruct((B, C, N), jnp.float32),
            jax.ShapeDtypeStruct((C, 1), jnp.float32),
            jax.ShapeDtypeStruct((C, 1), jnp.float32),
        ),
        grid_spec=pltpu.PrefetchScalarGridSpec(
            num_scalar_prefetch=0,
            grid=(B, nt),
            in_specs=[
                pl.BlockSpec((None, C, tn), lambda b, j: (b, 0, j)),
                pl.BlockSpec((C, C), lambda b, j: (0, 0)),
            ],
            out_specs=(
                pl.BlockSpec((None, C, tn), lambda b, j: (b, 0, j)),
                pl.BlockSpec((C, 1), lambda b, j: (0, 0)),
                pl.BlockSpec((C, 1), lambda b, j: (0, 0)),
            ),
            scratch_shapes=[
                pltpu.VMEM((C, 1), jnp.float32),
                pltpu.VMEM((C, 1), jnp.float32),
            ],
        ),
        compiler_params=pltpu.CompilerParams(
            dimension_semantics=("arbitrary", "arbitrary")),
    )(x_bcn, w_oi)


# ---------------------------------------------------------------------------
# Kernel 4: fused BatchNorm affine + residual add + ReLU (elementwise).
# ---------------------------------------------------------------------------
def _bn_add_relu_kernel(y_ref, idn_ref, scale_ref, shift_ref, o_ref):
    o_ref[...] = jnp.maximum(
        y_ref[...] * scale_ref[...] + shift_ref[...] + idn_ref[...], 0.0)


def bn_add_relu(y_bcn, idn_bcn, scale, shift, *, tn):
    B, C, N = y_bcn.shape
    nt = pl.cdiv(N, tn)
    return pl.pallas_call(
        _bn_add_relu_kernel,
        out_shape=jax.ShapeDtypeStruct((B, C, N), jnp.float32),
        grid_spec=pltpu.PrefetchScalarGridSpec(
            num_scalar_prefetch=0,
            grid=(B, nt),
            in_specs=[
                pl.BlockSpec((None, C, tn), lambda b, j: (b, 0, j)),
                pl.BlockSpec((None, C, tn), lambda b, j: (b, 0, j)),
                pl.BlockSpec((C, 1), lambda b, j: (0, 0)),
                pl.BlockSpec((C, 1), lambda b, j: (0, 0)),
            ],
            out_specs=pl.BlockSpec((None, C, tn), lambda b, j: (b, 0, j)),
        ),
        compiler_params=pltpu.CompilerParams(
            dimension_semantics=("parallel", "parallel")),
    )(y_bcn, idn_bcn, scale, shift)


# ---------------------------------------------------------------------------
# Full EMAU forward.
# ---------------------------------------------------------------------------
def emau_forward(x, params, *, stage_num=3, mxu_dtype=MXU_DTYPE):
    """x: (B, C, H, W) float32 NCHW (same as the PyTorch module)."""
    assert stage_num >= 1
    B, C, H, W = x.shape
    N = H * W
    tn = _col_tile(N)

    x_bcn = x.reshape(B, C, N)                 # free view of contiguous NCHW
    w1 = params["w1"].astype(mxu_dtype)        # (C_out, C_in), 1x1 conv weight
    w2 = params["w2"].astype(mxu_dtype)

    # conv1 (1x1, with bias).  Stored in bf16: it is only ever consumed as an
    # MXU operand inside the EM kernel.
    y1 = conv1x1_bias(x_bcn, w1, params["b1"], out_dtype=mxu_dtype, tn=tn)

    # EM attention iterations + reconstruction + ReLU (per batch element).
    x_rec, mu = em_attention(y1, params["mu"], stage_num=stage_num,
                             mxu_dtype=mxu_dtype, rec_dtype=mxu_dtype)

    # conv2 (1x1, no bias) fused with the BatchNorm statistics pass.
    y2, bn_sum, bn_sq = conv1x1_bn_stats(x_rec, w2, tn=tn)

    # BatchNorm2d in training mode (the module's default state): per-channel
    # batch statistics over (B, H, W), gamma=1, beta=0, eps=1e-5.  The (C, 1)
    # finalization is a trivial XLA op on tiny arrays.
    cnt = float(B * N)
    mean = bn_sum / cnt
    var = jnp.maximum(bn_sq / cnt - mean * mean, 0.0)
    scale = params["gamma"] / jnp.sqrt(var + 1e-5)
    shift = params["beta"] - mean * scale

    out_bcn = bn_add_relu(y2, x_bcn, scale, shift, tn=tn)
    out = out_bcn.reshape(B, C, H, W)          # free reshape back to NCHW
    return out, mu


# ---------------------------------------------------------------------------
# Deterministic parameter initialization (mirrors EMAU.__init__).
# ---------------------------------------------------------------------------
def init_params(key, c, k):
    k_mu, k_w1, k_b1, k_w2 = jax.random.split(key, 4)

    # mu: (1, c, k) ~ N(0, sqrt(2/k)), then l2-normalized over the channel dim.
    mu = jax.random.normal(k_mu, (1, c, k), jnp.float32) * math.sqrt(2.0 / k)
    mu = mu / (1e-6 + jnp.sqrt(jnp.sum(mu * mu, axis=1, keepdims=True)))

    # Conv weights (out, in): N(0, sqrt(2/n)) with n = 1*1*out_channels = c.
    w1 = jax.random.normal(k_w1, (c, c), jnp.float32) * math.sqrt(2.0 / c)
    w2 = jax.random.normal(k_w2, (c, c), jnp.float32) * math.sqrt(2.0 / c)

    # conv1 bias keeps PyTorch's default Conv2d bias init: U(-1/sqrt(c), 1/sqrt(c)).
    bound = 1.0 / math.sqrt(c)
    b1 = jax.random.uniform(k_b1, (c, 1), jnp.float32, -bound, bound)

    return {
        "mu": mu,
        "w1": w1,
        "b1": b1,
        "w2": w2,
        "gamma": jnp.ones((c, 1), jnp.float32),
        "beta": jnp.zeros((c, 1), jnp.float32),
    }


if __name__ == "__main__":
    B, C, H, W, K = 2, 4, 16, 16, 8
    key = jax.random.PRNGKey(0)
    k_x, k_p = jax.random.split(key)

    x = jax.random.normal(k_x, (B, C, H, W), jnp.float32)
    params = init_params(k_p, C, K)

    fwd = jax.jit(functools.partial(emau_forward, stage_num=3))
    out, mu = fwd(x, params)
    jax.block_until_ready((out, mu))

    assert out.shape == (B, C, H, W)
    assert mu.shape == (B, C, K)
    assert bool(jnp.all(jnp.isfinite(out))) and bool(jnp.all(jnp.isfinite(mu)))
    print("KERNEL_OK")
</pallas_src>

<mosaic_0001>
module attributes {stable_mosaic.version = 11 : i64} {
  func.func @_conv2_bn_stats_kernel(%arg0: i32, %arg1: i32, %arg2: memref<1x4x256xbf16, #tpu.memory_space<vmem>>, %arg3: memref<4x4xbf16, #tpu.memory_space<vmem>>, %arg4: memref<1x4x256xf32, #tpu.memory_space<vmem>>, %arg5: memref<4x1xf32, #tpu.memory_space<vmem>>, %arg6: memref<4x1xf32, #tpu.memory_space<vmem>>, %arg7: memref<4x1xf32, #tpu.memory_space<vmem>>, %arg8: memref<4x1xf32, #tpu.memory_space<vmem>>) attributes {dimension_semantics = [#tpu.dimension_semantics<arbitrary>, #tpu.dimension_semantics<arbitrary>], iteration_bounds = array<i64: 2, 1>, scalar_prefetch = 0 : i64, scratch_operands = 2 : i64, tpu.core_type = #tpu.core_type<tc>, window_params = [{transform_indices = @transform_0, window_bounds = array<i64: 1, 4, 256>}, {pipeline_mode = #tpu.pipeline_mode<synchronous>, transform_indices = @transform_1, window_bounds = array<i64: 4, 4>}, {transform_indices = @transform_2, window_bounds = array<i64: 1, 4, 256>}, {pipeline_mode = #tpu.pipeline_mode<synchronous>, transform_indices = @transform_3, window_bounds = array<i64: 4, 1>}, {pipeline_mode = #tpu.pipeline_mode<synchronous>, transform_indices = @transform_4, window_bounds = array<i64: 4, 1>}]} {
    %c0_i32 = arith.constant 0 : i32
    %0 = arith.cmpi eq, %arg0, %c0_i32 : i32
    %c0_i32_0 = arith.constant 0 : i32
    %1 = arith.cmpi eq, %arg1, %c0_i32_0 : i32
    %2 = arith.andi %0, %1 : i1
    %3 = arith.extui %2 : i1 to i32
    %c0_i32_1 = arith.constant 0 : i32
    %4 = arith.cmpi ne, %3, %c0_i32_1 : i32
    scf.if %4 {
      %cst_21 = arith.constant 0.000000e+00 : f32
      %28 = vector.broadcast %cst_21 : f32 to vector<4x1xf32>
      %c0_22 = arith.constant 0 : index
      %c0_23 = arith.constant 0 : index
      %29 = vector.load %arg7[%c0_22, %c0_23] : memref<4x1xf32, #tpu.memory_space<vmem>>, vector<4x1xf32>
      tpu.vector_store %arg7[%c0_22, %c0_23], %28 {strides = array<i32>} : memref<4x1xf32, #tpu.memory_space<vmem>>, vector<4x1xf32>,
      %cst_24 = arith.constant 0.000000e+00 : f32
      %30 = vector.broadcast %cst_24 : f32 to vector<4x1xf32>
      %c0_25 = arith.constant 0 : index
      %c0_26 = arith.constant 0 : index
      %31 = vector.load %arg8[%c0_25, %c0_26] : memref<4x1xf32, #tpu.memory_space<vmem>>, vector<4x1xf32>
      tpu.vector_store %arg8[%c0_25, %c0_26], %30 {strides = array<i32>} : memref<4x1xf32, #tpu.memory_space<vmem>>, vector<4x1xf32>,
    } else {
    }
    %c0 = arith.constant 0 : index
    %c0_2 = arith.constant 0 : index
    %5 = vector.load %arg3[%c0, %c0_2] : memref<4x4xbf16, #tpu.memory_space<vmem>>, vector<4x4xbf16>
    %c0_3 = arith.constant 0 : index
    %c0_4 = arith.constant 0 : index
    %c0_5 = arith.constant 0 : index
    %6 = vector.load %arg2[%c0_3, %c0_4, %c0_5] : memref<1x4x256xbf16, #tpu.memory_space<vmem>>, vector<1x4x256xbf16>
    %7 = vector.shape_cast %6 : vector<1x4x256xbf16> to vector<4x256xbf16>
    %cst = arith.constant dense<0.000000e+00> : vector<4x256xf32>
    %8 = tpu.matmul %5, %7, %cst {dimension_numbers = #tpu.dot_dimension_numbers<[1], [0], [0], [1], [0, 0, 1, 1], [], []>} : vector<4x4xbf16>, vector<4x256xbf16>, vector<4x256xf32> -> vector<4x256xf32>
    %c0_6 = arith.constant 0 : index
    %c0_7 = arith.constant 0 : index
    %c0_8 = arith.constant 0 : index
    %9 = vector.load %arg4[%c0_6, %c0_7, %c0_8] : memref<1x4x256xf32, #tpu.memory_space<vmem>>, vector<1x4x256xf32>
    %10 = vector.shape_cast %9 : vector<1x4x256xf32> to vector<4x256xf32>
    %11 = vector.shape_cast %8 : vector<4x256xf32> to vector<1x4x256xf32>
    tpu.vector_store %arg4[%c0_6, %c0_7, %c0_8], %11 {strides = array<i32>} : memref<1x4x256xf32, #tpu.memory_space<vmem>>, vector<1x4x256xf32>,
    %c0_9 = arith.constant 0 : index
    %c0_10 = arith.constant 0 : index
    %12 = vector.load %arg7[%c0_9, %c0_10] : memref<4x1xf32, #tpu.memory_space<vmem>>, vector<4x1xf32>
    %cst_11 = arith.constant dense<0.000000e+00> : vector<4xf32>
    %13 = vector.multi_reduction <add>, %8, %cst_11 [1] : vector<4x256xf32> to vector<4xf32>
    %14 = vector.shape_cast %13 : vector<4xf32> to vector<4x1xf32>
    %15 = arith.addf %12, %14 : vector<4x1xf32>
    %c0_12 = arith.constant 0 : index
    %c0_13 = arith.constant 0 : index
    %16 = vector.load %arg7[%c0_12, %c0_13] : memref<4x1xf32, #tpu.memory_space<vmem>>, vector<4x1xf32>
    tpu.vector_store %arg7[%c0_12, %c0_13], %15 {strides = array<i32>} : memref<4x1xf32, #tpu.memory_space<vmem>>, vector<4x1xf32>,
    %c0_14 = arith.constant 0 : index
    %c0_15 = arith.constant 0 : index
    %17 = vector.load %arg8[%c0_14, %c0_15] : memref<4x1xf32, #tpu.memory_space<vmem>>, vector<4x1xf32>
    %18 = arith.mulf %8, %8 : vector<4x256xf32>
    %cst_16 = arith.constant dense<0.000000e+00> : vector<4xf32>
    %19 = vector.multi_reduction <add>, %18, %cst_16 [1] : vector<4x256xf32> to vector<4xf32>
    %20 = vector.shape_cast %19 : vector<4xf32> to vector<4x1xf32>
    %21 = arith.addf %17, %20 : vector<4x1xf32>
    %c0_17 = arith.constant 0 : index
    %c0_18 = arith.constant 0 : index
    %22 = vector.load %arg8[%c0_17, %c0_18] : memref<4x1xf32, #tpu.memory_space<vmem>>, vector<4x1xf32>
    tpu.vector_store %arg8[%c0_17, %c0_18], %21 {strides = array<i32>} : memref<4x1xf32, #tpu.memory_space<vmem>>, vector<4x1xf32>,
    %c1_i32 = arith.constant 1 : i32
    %23 = arith.cmpi eq, %arg0, %c1_i32 : i32
    %c0_i32_19 = arith.constant 0 : i32
    %24 = arith.cmpi eq, %arg1, %c0_i32_19 : i32
    %25 = arith.andi %23, %24 : i1
    %26 = arith.extui %25 : i1 to i32
    %c0_i32_20 = arith.constant 0 : i32
    %27 = arith.cmpi ne, %26, %c0_i32_20 : i32
    scf.if %27 {
      %c0_21 = arith.constant 0 : index
      %c0_22 = arith.constant 0 : index
      %28 = vector.load %arg7[%c0_21, %c0_22] : memref<4x1xf32, #tpu.memory_space<vmem>>, vector<4x1xf32>
      %c0_23 = arith.constant 0 : index
      %c0_24 = arith.constant 0 : index
      %29 = vector.load %arg5[%c0_23, %c0_24] : memref<4x1xf32, #tpu.memory_space<vmem>>, vector<4x1xf32>
      tpu.vector_store %arg5[%c0_23, %c0_24], %28 {strides = array<i32>} : memref<4x1xf32, #tpu.memory_space<vmem>>, vector<4x1xf32>,
      %c0_25 = arith.constant 0 : index
      %c0_26 = arith.constant 0 : index
      %30 = vector.load %arg8[%c0_25, %c0_26] : memref<4x1xf32, #tpu.memory_space<vmem>>, vector<4x1xf32>
      %c0_27 = arith.constant 0 : index
      %c0_28 = arith.constant 0 : index
      %31 = vector.load %arg6[%c0_27, %c0_28] : memref<4x1xf32, #tpu.memory_space<vmem>>, vector<4x1xf32>
      tpu.vector_store %arg6[%c0_27, %c0_28], %30 {strides = array<i32>} : memref<4x1xf32, #tpu.memory_space<vmem>>, vector<4x1xf32>,
    } else {
    }
    return
  }
  func.func @transform_0(%arg0: i32, %arg1: i32) -> (i32, i32, i32) {
    %c0_i32 = arith.constant 0 : i32
    %c0_i32_0 = arith.constant 0 : i32
    return %arg0, %c0_i32, %arg1 : i32, i32, i32
  }
  func.func @transform_1(%arg0: i32, %arg1: i32) -> (i32, i32) {
    %c0_i32 = arith.constant 0 : i32
    %c0_i32_0 = arith.constant 0 : i32
    %c0_i32_1 = arith.constant 0 : i32
    return %c0_i32, %c0_i32_0 : i32, i32
  }
  func.func @transform_2(%arg0: i32, %arg1: i32) -> (i32, i32, i32) {
    %c0_i32 = arith.constant 0 : i32
    %c0_i32_0 = arith.constant 0 : i32
    return %arg0, %c0_i32, %arg1 : i32, i32, i32
  }
  func.func @transform_3(%arg0: i32, %arg1: i32) -> (i32, i32) {
    %c0_i32 = arith.constant 0 : i32
    %c0_i32_0 = arith.constant 0 : i32
    %c0_i32_1 = arith.constant 0 : i32
    return %c0_i32, %c0_i32_0 : i32, i32
  }
  func.func @transform_4(%arg0: i32, %arg1: i32) -> (i32, i32) {
    %c0_i32 = arith.constant 0 : i32
    %c0_i32_0 = arith.constant 0 : i32
    %c0_i32_1 = arith.constant 0 : i32
    return %c0_i32, %c0_i32_0 : i32, i32
  }
}

module attributes {stable_mosaic.version = 11 : i64} {
  func.func @_conv1_kernel(%arg0: i32, %arg1: i32, %arg2: memref<1x4x256xf32, #tpu.memory_space<vmem>>, %arg3: memref<4x4xbf16, #tpu.memory_space<vmem>>, %arg4: memref<4x1xf32, #tpu.memory_space<vmem>>, %arg5: memref<1x4x256xbf16, #tpu.memory_space<vmem>>) attributes {dimension_semantics = [#tpu.dimension_semantics<parallel>, #tpu.dimension_semantics<parallel>], iteration_bounds = array<i64: 2, 1>, scalar_prefetch = 0 : i64, scratch_operands = 0 : i64, tpu.core_type = #tpu.core_type<tc>, window_params = [{transform_indices = @transform_0, window_bounds = array<i64: 1, 4, 256>}, {pipeline_mode = #tpu.pipeline_mode<synchronous>, transform_indices = @transform_1, window_bounds = array<i64: 4, 4>}, {pipeline_mode = #tpu.pipeline_mode<synchronous>, transform_indices = @transform_2, window_bounds = array<i64: 4, 1>}, {transform_indices = @transform_3, window_bounds = array<i64: 1, 4, 256>}]} {
    %c0 = arith.constant 0 : index
    %c0_0 = arith.constant 0 : index
    %0 = vector.load %arg3[%c0, %c0_0] : memref<4x4xbf16, #tpu.memory_space<vmem>>, vector<4x4xbf16>
    %c0_1 = arith.constant 0 : index
    %c0_2 = arith.constant 0 : index
    %c0_3 = arith.constant 0 : index
    %1 = vector.load %arg2[%c0_1, %c0_2, %c0_3] : memref<1x4x256xf32, #tpu.memory_space<vmem>>, vector<1x4x256xf32>
    %2 = vector.shape_cast %1 : vector<1x4x256xf32> to vector<4x256xf32>
    %3 = arith.truncf %2 : vector<4x256xf32> to vector<4x256xbf16>
    %cst = arith.constant dense<0.000000e+00> : vector<4x256xf32>
    %4 = tpu.matmul %0, %3, %cst {dimension_numbers = #tpu.dot_dimension_numbers<[1], [0], [0], [1], [0, 0, 1, 1], [], []>} : vector<4x4xbf16>, vector<4x256xbf16>, vector<4x256xf32> -> vector<4x256xf32>
    %c0_4 = arith.constant 0 : index
    %c0_5 = arith.constant 0 : index
    %5 = vector.load %arg4[%c0_4, %c0_5] : memref<4x1xf32, #tpu.memory_space<vmem>>, vector<4x1xf32>
    %6 = vector.broadcast %5 : vector<4x1xf32> to vector<4x256xf32>
    %7 = arith.addf %4, %6 : vector<4x256xf32>
    %8 = arith.truncf %7 : vector<4x256xf32> to vector<4x256xbf16>
    %c0_6 = arith.constant 0 : index
    %c0_7 = arith.constant 0 : index
    %c0_8 = arith.constant 0 : index
    %9 = vector.load %arg5[%c0_6, %c0_7, %c0_8] : memref<1x4x256xbf16, #tpu.memory_space<vmem>>, vector<1x4x256xbf16>
    %10 = vector.shape_cast %9 : vector<1x4x256xbf16> to vector<4x256xbf16>
    %11 = vector.shape_cast %8 : vector<4x256xbf16> to vector<1x4x256xbf16>
    tpu.vector_store %arg5[%c0_6, %c0_7, %c0_8], %11 {strides = array<i32>} : memref<1x4x256xbf16, #tpu.memory_space<vmem>>, vector<1x4x256xbf16>,
    return
  }
  func.func @transform_0(%arg0: i32, %arg1: i32) -> (i32, i32, i32) {
    %c0_i32 = arith.constant 0 : i32
    %c0_i32_0 = arith.constant 0 : i32
    return %arg0, %c0_i32, %arg1 : i32, i32, i32
  }
  func.func @transform_1(%arg0: i32, %arg1: i32) -> (i32, i32) {
    %c0_i32 = arith.constant 0 : i32
    %c0_i32_0 = arith.constant 0 : i32
    %c0_i32_1 = arith.constant 0 : i32
    return %c0_i32, %c0_i32_0 : i32, i32
  }
  func.func @transform_2(%arg0: i32, %arg1: i32) -> (i32, i32) {
    %c0_i32 = arith.constant 0 : i32
    %c0_i32_0 = arith.constant 0 : i32
    %c0_i32_1 = arith.constant 0 : i32
    return %c0_i32, %c0_i32_0 : i32, i32
  }
  func.func @transform_3(%arg0: i32, %arg1: i32) -> (i32, i32, i32) {
    %c0_i32 = arith.constant 0 : i32
    %c0_i32_0 = arith.constant 0 : i32
    return %arg0, %c0_i32, %arg1 : i32, i32, i32
  }
}

module attributes {stable_mosaic.version = 11 : i64} {
  func.func @_em_kernel(%arg0: i32, %arg1: memref<1x4x256xbf16, #tpu.memory_space<vmem>>, %arg2: memref<1x4x8xf32, #tpu.memory_space<vmem>>, %arg3: memref<1x4x256xbf16, #tpu.memory_space<vmem>>, %arg4: memref<1x4x8xf32, #tpu.memory_space<vmem>>) attributes {dimension_semantics = [#tpu.dimension_semantics<parallel>], iteration_bounds = array<i64: 2>, scalar_prefetch = 0 : i64, scratch_operands = 0 : i64, tpu.core_type = #tpu.core_type<tc>, window_params = [{transform_indices = @transform_0, window_bounds = array<i64: 1, 4, 256>}, {pipeline_mode = #tpu.pipeline_mode<synchronous>, transform_indices = @transform_1, window_bounds = array<i64: 1, 4, 8>}, {transform_indices = @transform_2, window_bounds = array<i64: 1, 4, 256>}, {transform_indices = @transform_3, window_bounds = array<i64: 1, 4, 8>}]} {
    %c0 = arith.constant 0 : index
    %c0_0 = arith.constant 0 : index
    %c0_1 = arith.constant 0 : index
    %0 = vector.load %arg1[%c0, %c0_0, %c0_1] : memref<1x4x256xbf16, #tpu.memory_space<vmem>>, vector<1x4x256xbf16>
    %1 = vector.shape_cast %0 : vector<1x4x256xbf16> to vector<4x256xbf16>
    %c0_2 = arith.constant 0 : index
    %c0_3 = arith.constant 0 : index
    %c0_4 = arith.constant 0 : index
    %2 = vector.load %arg2[%c0_2, %c0_3, %c0_4] : memref<1x4x8xf32, #tpu.memory_space<vmem>>, vector<1x4x8xf32>
    %3 = vector.shape_cast %2 : vector<1x4x8xf32> to vector<4x8xf32>
    %4 = arith.truncf %3 : vector<4x8xf32> to vector<4x8xbf16>
    %cst = arith.constant dense<0.000000e+00> : vector<256x8xf32>
    %5 = tpu.matmul %1, %4, %cst {dimension_numbers = #tpu.dot_dimension_numbers<[0], [0], [1], [1], [0, 1, 1, 1], [], []>} : vector<4x256xbf16>, vector<4x8xbf16>, vector<256x8xf32> -> vector<256x8xf32>
    %cst_5 = arith.constant dense<0xFF800000> : vector<256xf32>
    %6 = vector.multi_reduction <maximumf>, %5, %cst_5 [1] : vector<256x8xf32> to vector<256xf32>
    %7 = vector.shape_cast %6 : vector<256xf32> to vector<256x1xf32>
    %8 = vector.broadcast %7 : vector<256x1xf32> to vector<256x8xf32>
    %9 = arith.subf %5, %8 : vector<256x8xf32>
    %10 = math.exp %9 : vector<256x8xf32>
    %cst_6 = arith.constant dense<0.000000e+00> : vector<256xf32>
    %11 = vector.multi_reduction <add>, %10, %cst_6 [1] : vector<256x8xf32> to vector<256xf32>
    %12 = vector.shape_cast %11 : vector<256xf32> to vector<256x1xf32>
    %13 = tpu.reciprocal %12 {approx = true} : vector<256x1xf32> -> vector<256x1xf32>
    %14 = vector.broadcast %13 : vector<256x1xf32> to vector<256x8xf32>
    %15 = arith.mulf %10, %14 : vector<256x8xf32>
    %cst_7 = arith.constant dense<0.000000e+00> : vector<8xf32>
    %16 = vector.multi_reduction <add>, %15, %cst_7 [0] : vector<256x8xf32> to vector<8xf32>
    %17 = vector.shape_cast %16 : vector<8xf32> to vector<1x8xf32>
    %cst_8 = arith.constant 9.99999997E-7 : f32
    %18 = vector.broadcast %cst_8 : f32 to vector<1x8xf32>
    %19 = arith.addf %18, %17 : vector<1x8xf32>
    %20 = tpu.reciprocal %19 {approx = true} : vector<1x8xf32> -> vector<1x8xf32>
    %21 = vector.broadcast %20 : vector<1x8xf32> to vector<256x8xf32>
    %22 = arith.mulf %15, %21 : vector<256x8xf32>
    %23 = arith.truncf %22 : vector<256x8xf32> to vector<256x8xbf16>
    %cst_9 = arith.constant dense<0.000000e+00> : vector<4x8xf32>
    %24 = tpu.matmul %1, %23, %cst_9 {dimension_numbers = #tpu.dot_dimension_numbers<[1], [0], [0], [1], [0, 0, 1, 1], [], []>} : vector<4x256xbf16>, vector<256x8xbf16>, vector<4x8xf32> -> vector<4x8xf32>
    %25 = arith.mulf %24, %24 : vector<4x8xf32>
    %cst_10 = arith.constant dense<0.000000e+00> : vector<8xf32>
    %26 = vector.multi_reduction <add>, %25, %cst_10 [0] : vector<4x8xf32> to vector<8xf32>
    %27 = vector.shape_cast %26 : vector<8xf32> to vector<1x8xf32>
    %28 = math.sqrt %27 : vector<1x8xf32>
    %cst_11 = arith.constant 9.99999997E-7 : f32
    %29 = vector.broadcast %cst_11 : f32 to vector<1x8xf32>
    %30 = arith.addf %29, %28 : vector<1x8xf32>
    %31 = tpu.reciprocal %30 {approx = true} : vector<1x8xf32> -> vector<1x8xf32>
    %32 = vector.broadcast %31 : vector<1x8xf32> to vector<4x8xf32>
    %33 = arith.mulf %24, %32 : vector<4x8xf32>
    %34 = arith.truncf %33 : vector<4x8xf32> to vector<4x8xbf16>
    %cst_12 = arith.constant dense<0.000000e+00> : vector<256x8xf32>
    %35 = tpu.matmul %1, %34, %cst_12 {dimension_numbers = #tpu.dot_dimension_numbers<[0], [0], [1], [1], [0, 1, 1, 1], [], []>} : vector<4x256xbf16>, vector<4x8xbf16>, vector<256x8xf32> -> vector<256x8xf32>
    %cst_13 = arith.constant dense<0xFF800000> : vector<256xf32>
    %36 = vector.multi_reduction <maximumf>, %35, %cst_13 [1] : vector<256x8xf32> to vector<256xf32>
    %37 = vector.shape_cast %36 : vector<256xf32> to vector<256x1xf32>
    %38 = vector.broadcast %37 : vector<256x1xf32> to vector<256x8xf32>
    %39 = arith.subf %35, %38 : vector<256x8xf32>
    %40 = math.exp %39 : vector<256x8xf32>
    %cst_14 = arith.constant dense<0.000000e+00> : vector<256xf32>
    %41 = vector.multi_reduction <add>, %40, %cst_14 [1] : vector<256x8xf32> to vector<256xf32>
    %42 = vector.shape_cast %41 : vector<256xf32> to vector<256x1xf32>
    %43 = tpu.reciprocal %42 {approx = true} : vector<256x1xf32> -> vector<256x1xf32>
    %44 = vector.broadcast %43 : vector<256x1xf32> to vector<256x8xf32>
    %45 = arith.mulf %40, %44 : vector<256x8xf32>
    %cst_15 = arith.constant dense<0.000000e+00> : vector<8xf32>
    %46 = vector.multi_reduction <add>, %45, %cst_15 [0] : vector<256x8xf32> to vector<8xf32>
    %47 = vector.shape_cast %46 : vector<8xf32> to vector<1x8xf32>
    %cst_16 = arith.constant 9.99999997E-7 : f32
    %48 = vector.broadcast %cst_16 : f32 to vector<1x8xf32>
    %49 = arith.addf %48, %47 : vector<1x8xf32>
    %50 = tpu.reciprocal %49 {approx = true} : vector<1x8xf32> -> vector<1x8xf32>
    %51 = vector.broadcast %50 : vector<1x8xf32> to vector<256x8xf32>
    %52 = arith.mulf %45, %51 : vector<256x8xf32>
    %53 = arith.truncf %52 : vector<256x8xf32> to vector<256x8xbf16>
    %cst_17 = arith.constant dense<0.000000e+00> : vector<4x8xf32>
    %54 = tpu.matmul %1, %53, %cst_17 {dimension_numbers = #tpu.dot_dimension_numbers<[1], [0], [0], [1], [0, 0, 1, 1], [], []>} : vector<4x256xbf16>, vector<256x8xbf16>, vector<4x8xf32> -> vector<4x8xf32>
    %55 = arith.mulf %54, %54 : vector<4x8xf32>
    %cst_18 = arith.constant dense<0.000000e+00> : vector<8xf32>
    %56 = vector.multi_reduction <add>, %55, %cst_18 [0] : vector<4x8xf32> to vector<8xf32>
    %57 = vector.shape_cast %56 : vector<8xf32> to vector<1x8xf32>
    %58 = math.sqrt %57 : vector<1x8xf32>
    %cst_19 = arith.constant 9.99999997E-7 : f32
    %59 = vector.broadcast %cst_19 : f32 to vector<1x8xf32>
    %60 = arith.addf %59, %58 : vector<1x8xf32>
    %61 = tpu.reciprocal %60 {approx = true} : vector<1x8xf32> -> vector<1x8xf32>
    %62 = vector.broadcast %61 : vector<1x8xf32> to vector<4x8xf32>
    %63 = arith.mulf %54, %62 : vector<4x8xf32>
    %64 = arith.truncf %63 : vector<4x8xf32> to vector<4x8xbf16>
    %cst_20 = arith.constant dense<0.000000e+00> : vector<256x8xf32>
    %65 = tpu.matmul %1, %64, %cst_20 {dimension_numbers = #tpu.dot_dimension_numbers<[0], [0], [1], [1], [0, 1, 1, 1], [], []>} : vector<4x256xbf16>, vector<4x8xbf16>, vector<256x8xf32> -> vector<256x8xf32>
    %cst_21 = arith.constant dense<0xFF800000> : vector<256xf32>
    %66 = vector.multi_reduction <maximumf>, %65, %cst_21 [1] : vector<256x8xf32> to vector<256xf32>
    %67 = vector.shape_cast %66 : vector<256xf32> to vector<256x1xf32>
    %68 = vector.broadcast %67 : vector<256x1xf32> to vector<256x8xf32>
    %69 = arith.subf %65, %68 : vector<256x8xf32>
    %70 = math.exp %69 : vector<256x8xf32>
    %cst_22 = arith.constant dense<0.000000e+00> : vector<256xf32>
    %71 = vector.multi_reduction <add>, %70, %cst_22 [1] : vector<256x8xf32> to vector<256xf32>
    %72 = vector.shape_cast %71 : vector<256xf32> to vector<256x1xf32>
    %73 = tpu.reciprocal %72 {approx = true} : vector<256x1xf32> -> vector<256x1xf32>
    %74 = vector.broadcast %73 : vector<256x1xf32> to vector<256x8xf32>
    %75 = arith.mulf %70, %74 : vector<256x8xf32>
    %cst_23 = arith.constant dense<0.000000e+00> : vector<8xf32>
    %76 = vector.multi_reduction <add>, %75, %cst_23 [0] : vector<256x8xf32> to vector<8xf32>
    %77 = vector.shape_cast %76 : vector<8xf32> to vector<1x8xf32>
    %cst_24 = arith.constant 9.99999997E-7 : f32
    %78 = vector.broadcast %cst_24 : f32 to vector<1x8xf32>
    %79 = arith.addf %78, %77 : vector<1x8xf32>
    %80 = tpu.reciprocal %79 {approx = true} : vector<1x8xf32> -> vector<1x8xf32>
    %81 = vector.broadcast %80 : vector<1x8xf32> to vector<256x8xf32>
    %82 = arith.mulf %75, %81 : vector<256x8xf32>
    %83 = arith.truncf %82 : vector<256x8xf32> to vector<256x8xbf16>
    %cst_25 = arith.constant dense<0.000000e+00> : vector<4x8xf32>
    %84 = tpu.matmul %1, %83, %cst_25 {dimension_numbers = #tpu.dot_dimension_numbers<[1], [0], [0], [1], [0, 0, 1, 1], [], []>} : vector<4x256xbf16>, vector<256x8xbf16>, vector<4x8xf32> -> vector<4x8xf32>
    %85 = arith.mulf %84, %84 : vector<4x8xf32>
    %cst_26 = arith.constant dense<0.000000e+00> : vector<8xf32>
    %86 = vector.multi_reduction <add>, %85, %cst_26 [0] : vector<4x8xf32> to vector<8xf32>
    %87 = vector.shape_cast %86 : vector<8xf32> to vector<1x8xf32>
    %88 = math.sqrt %87 : vector<1x8xf32>
    %cst_27 = arith.constant 9.99999997E-7 : f32
    %89 = vector.broadcast %cst_27 : f32 to vector<1x8xf32>
    %90 = arith.addf %89, %88 : vector<1x8xf32>
    %91 = tpu.reciprocal %90 {approx = true} : vector<1x8xf32> -> vector<1x8xf32>
    %92 = vector.broadcast %91 : vector<1x8xf32> to vector<4x8xf32>
    %93 = arith.mulf %84, %92 : vector<4x8xf32>
    %94 = arith.truncf %93 : vector<4x8xf32> to vector<4x8xbf16>
    %95 = arith.truncf %75 : vector<256x8xf32> to vector<256x8xbf16>
    %cst_28 = arith.constant dense<0.000000e+00> : vector<4x256xf32>
    %96 = tpu.matmul %94, %95, %cst_28 {dimension_numbers = #tpu.dot_dimension_numbers<[1], [1], [0], [0], [0, 0, 1, 0], [], []>} : vector<4x8xbf16>, vector<256x8xbf16>, vector<4x256xf32> -> vector<4x256xf32>
    %cst_29 = arith.constant 0.000000e+00 : f32
    %97 = vector.broadcast %cst_29 : f32 to vector<4x256xf32>
    %98 = arith.maximumf %96, %97 : vector<4x256xf32>
    %99 = arith.truncf %98 : vector<4x256xf32> to vector<4x256xbf16>
    %c0_30 = arith.constant 0 : index
    %c0_31 = arith.constant 0 : index
    %c0_32 = arith.constant 0 : index
    %100 = vector.load %arg3[%c0_30, %c0_31, %c0_32] : memref<1x4x256xbf16, #tpu.memory_space<vmem>>, vector<1x4x256xbf16>
    %101 = vector.shape_cast %100 : vector<1x4x256xbf16> to vector<4x256xbf16>
    %102 = vector.shape_cast %99 : vector<4x256xbf16> to vector<1x4x256xbf16>
    tpu.vector_store %arg3[%c0_30, %c0_31, %c0_32], %102 {strides = array<i32>} : memref<1x4x256xbf16, #tpu.memory_space<vmem>>, vector<1x4x256xbf16>,
    %c0_33 = arith.constant 0 : index
    %c0_34 = arith.constant 0 : index
    %c0_35 = arith.constant 0 : index
    %103 = vector.load %arg4[%c0_33, %c0_34, %c0_35] : memref<1x4x8xf32, #tpu.memory_space<vmem>>, vector<1x4x8xf32>
    %104 = vector.shape_cast %103 : vector<1x4x8xf32> to vector<4x8xf32>
    %105 = vector.shape_cast %93 : vector<4x8xf32> to vector<1x4x8xf32>
    tpu.vector_store %arg4[%c0_33, %c0_34, %c0_35], %105 {strides = array<i32>} : memref<1x4x8xf32, #tpu.memory_space<vmem>>, vector<1x4x8xf32>,
    return
  }
  func.func @transform_0(%arg0: i32) -> (i32, i32, i32) {
    %c0_i32 = arith.constant 0 : i32
    %c0_i32_0 = arith.constant 0 : i32
    %c0_i32_1 = arith.constant 0 : i32
    return %arg0, %c0_i32, %c0_i32_0 : i32, i32, i32
  }
  func.func @transform_1(%arg0: i32) -> (i32, i32, i32) {
    %c0_i32 = arith.constant 0 : i32
    %c0_i32_0 = arith.constant 0 : i32
    %c0_i32_1 = arith.constant 0 : i32
    %c0_i32_2 = arith.constant 0 : i32
    return %c0_i32, %c0_i32_0, %c0_i32_1 : i32, i32, i32
  }
  func.func @transform_2(%arg0: i32) -> (i32, i32, i32) {
    %c0_i32 = arith.constant 0 : i32
    %c0_i32_0 = arith.constant 0 : i32
    %c0_i32_1 = arith.constant 0 : i32
    return %arg0, %c0_i32, %c0_i32_0 : i32, i32, i32
  }
  func.func @transform_3(%arg0: i32) -> (i32, i32, i32) {
    %c0_i32 = arith.constant 0 : i32
    %c0_i32_0 = arith.constant 0 : i32
    %c0_i32_1 = arith.constant 0 : i32
    return %arg0, %c0_i32, %c0_i32_0 : i32, i32, i32
  }
}

module attributes {stable_mosaic.version = 11 : i64} {
  func.func @_bn_add_relu_kernel(%arg0: i32, %arg1: i32, %arg2: memref<1x4x256xf32, #tpu.memory_space<vmem>>, %arg3: memref<1x4x256xf32, #tpu.memory_space<vmem>>, %arg4: memref<4x1xf32, #tpu.memory_space<vmem>>, %arg5: memref<4x1xf32, #tpu.memory_space<vmem>>, %arg6: memref<1x4x256xf32, #tpu.memory_space<vmem>>) attributes {dimension_semantics = [#tpu.dimension_semantics<parallel>, #tpu.dimension_semantics<parallel>], iteration_bounds = array<i64: 2, 1>, scalar_prefetch = 0 : i64, scratch_operands = 0 : i64, tpu.core_type = #tpu.core_type<tc>, window_params = [{transform_indices = @transform_0, window_bounds = array<i64: 1, 4, 256>}, {transform_indices = @transform_1, window_bounds = array<i64: 1, 4, 256>}, {pipeline_mode = #tpu.pipeline_mode<synchronous>, transform_indices = @transform_2, window_bounds = array<i64: 4, 1>}, {pipeline_mode = #tpu.pipeline_mode<synchronous>, transform_indices = @transform_3, window_bounds = array<i64: 4, 1>}, {transform_indices = @transform_4, window_bounds = array<i64: 1, 4, 256>}]} {
    %c0 = arith.constant 0 : index
    %c0_0 = arith.constant 0 : index
    %c0_1 = arith.constant 0 : index
    %0 = vector.load %arg2[%c0, %c0_0, %c0_1] : memref<1x4x256xf32, #tpu.memory_space<vmem>>, vector<1x4x256xf32>
    %1 = vector.shape_cast %0 : vector<1x4x256xf32> to vector<4x256xf32>
    %c0_2 = arith.constant 0 : index
    %c0_3 = arith.constant 0 : index
    %2 = vector.load %arg4[%c0_2, %c0_3] : memref<4x1xf32, #tpu.memory_space<vmem>>, vector<4x1xf32>
    %3 = vector.broadcast %2 : vector<4x1xf32> to vector<4x256xf32>
    %4 = arith.mulf %1, %3 : vector<4x256xf32>
    %c0_4 = arith.constant 0 : index
    %c0_5 = arith.constant 0 : index
    %5 = vector.load %arg5[%c0_4, %c0_5] : memref<4x1xf32, #tpu.memory_space<vmem>>, vector<4x1xf32>
    %6 = vector.broadcast %5 : vector<4x1xf32> to vector<4x256xf32>
    %7 = arith.addf %4, %6 : vector<4x256xf32>
    %c0_6 = arith.constant 0 : index
    %c0_7 = arith.constant 0 : index
    %c0_8 = arith.constant 0 : index
    %8 = vector.load %arg3[%c0_6, %c0_7, %c0_8] : memref<1x4x256xf32, #tpu.memory_space<vmem>>, vector<1x4x256xf32>
    %9 = vector.shape_cast %8 : vector<1x4x256xf32> to vector<4x256xf32>
    %10 = arith.addf %7, %9 : vector<4x256xf32>
    %cst = arith.constant 0.000000e+00 : f32
    %11 = vector.broadcast %cst : f32 to vector<4x256xf32>
    %12 = arith.maximumf %10, %11 : vector<4x256xf32>
    %c0_9 = arith.constant 0 : index
    %c0_10 = arith.constant 0 : index
    %c0_11 = arith.constant 0 : index
    %13 = vector.load %arg6[%c0_9, %c0_10, %c0_11] : memref<1x4x256xf32, #tpu.memory_space<vmem>>, vector<1x4x256xf32>
    %14 = vector.shape_cast %13 : vector<1x4x256xf32> to vector<4x256xf32>
    %15 = vector.shape_cast %12 : vector<4x256xf32> to vector<1x4x256xf32>
    tpu.vector_store %arg6[%c0_9, %c0_10, %c0_11], %15 {strides = array<i32>} : memref<1x4x256xf32, #tpu.memory_space<vmem>>, vector<1x4x256xf32>,
    return
  }
  func.func @transform_0(%arg0: i32, %arg1: i32) -> (i32, i32, i32) {
    %c0_i32 = arith.constant 0 : i32
    %c0_i32_0 = arith.constant 0 : i32
    return %arg0, %c0_i32, %arg1 : i32, i32, i32
  }
  func.func @transform_1(%arg0: i32, %arg1: i32) -> (i32, i32, i32) {
    %c0_i32 = arith.constant 0 : i32
    %c0_i32_0 = arith.constant 0 : i32
    return %arg0, %c0_i32, %arg1 : i32, i32, i32
  }
  func.func @transform_2(%arg0: i32, %arg1: i32) -> (i32, i32) {
    %c0_i32 = arith.constant 0 : i32
    %c0_i32_0 = arith.constant 0 : i32
    %c0_i32_1 = arith.constant 0 : i32
    return %c0_i32, %c0_i32_0 : i32, i32
  }
  func.func @transform_3(%arg0: i32, %arg1: i32) -> (i32, i32) {
    %c0_i32 = arith.constant 0 : i32
    %c0_i32_0 = arith.constant 0 : i32
    %c0_i32_1 = arith.constant 0 : i32
    return %c0_i32, %c0_i32_0 : i32, i32
  }
  func.func @transform_4(%arg0: i32, %arg1: i32) -> (i32, i32, i32) {
    %c0_i32 = arith.constant 0 : i32
    %c0_i32_0 = arith.constant 0 : i32
    return %arg0, %c0_i32, %arg1 : i32, i32, i32
  }
}

</mosaic_0001>

<bundles_post_ra>
// kernel: emau_forward.6
= control target key start
LH: loop header
LB: loop body
LE: loop exit
PB: predicated region body
PF: predicated region fallthrough
CT: control target
= control target key end

     0   :  { %s511_s15 = smov 0   ;;  %s513_s16 = smov 0   ;;  %s569_s0 = inlined_call_operand.vmem [shape: bf16[2,4,256], index: 0, kind: input, shape index: {}]   ;;  %s570_s1 = inlined_call_operand.vmem [shape: bf16[4,4], index: 1, kind: input, shape index: {}]   ;;  %s571_s2 = inlined_call_operand.vmem [shape: f32[2,4,256], index: 2, kind: output, shape index: {0}]   ;;  %s572_s3 = inlined_call_operand.vmem [shape: f32[4,1], index: 3, kind: output, shape index: {1}]   ;;  %s573_s4 = inlined_call_operand.vmem [shape: f32[4,1], index: 4, kind: output, shape index: {2}]  }
   0x1   :  { %s515_s17 = smov 0  }
   0x2 LB: > { %s27_s18 = sadd.s32 1, %s479_s16  ;;  %p421_p0 = scmp.ge.s32.totalorder %s483_s17, 1  ;;  %s483_s17 = sphi %s515_s17, %s15_s17   ;;  %s479_s16 = sphi %s513_s16, %s575_s16   ;;  %s475_s15 = sphi %s511_s15, %s574_s15  }
   0x3   : > { %p29_p1 = scmp.ge.s32.totalorder %s27_s18, 2  ;;  %p178_p2 = scmp.lt.s32.totalorder %s483_s17, 3 }
   0x5   : > { %s577_s18 = smov (%p29_p1, %s27_s18), 0  ;;  %p179_p3 = pnand %p421_p0, %p178_p2 }
   0x6   : > { %p213_p4 = scmp.lt.s32.totalorder (!%p179_p3), %s475_s15, 1  ;;  %p233_p5 = scmp.eq.s32.totalorder (!%p179_p3), %s475_s15, 0 }
   0x7   : > { %182 = sbr.rel (%p179_p3) target bundleno = 295 (0x127), region = 28 }
   0xc   : > { %s214_s19 = scalar_select %p213_p4, %s475_s15, 1  ;;  %vm239_vm0 = vcmask (%p233_p5), 3072   ;;  %v485_v0 = vmov (%p233_p5), 0.0  }
   0xd   : > { %238 = sbr.rel (!%p233_p5) target bundleno = 18 (0x12), region = 32  ;;  %240 = vst.msk [vmem:[#allocation2] sm:$0xf] (%p233_p5), %vm239_vm0, %v485_v0 }
   0xe   : > { %s432_s20 = sshll.u32 %s214_s19, 2  ;;  %s433_s21 = sshll.u32 %s214_s19, 3  ;;  %241 = vst.msk [vmem:[#allocation3] sm:$0xf] (%p233_p5), %vm239_vm0, %v485_v0 }
   0xf   : > { %s220_s24 = scalar_lea.vmem %s569_s0, %s432_s20  ;;  %s540_s27 = scalar_lea.vmem %s571_s2, %s433_s21 }
  0x12 PF: > { %v243_v1 = vld [vmem:[%s220_s24] sm:$0xf]  ;;  %vm252_vm1 = vcmask 1041408   ;;  %vm248_vm2 = vcmask 31744   ;;  %vm286_vm3 = vcmask 1043456   ;;  %p309_p6 = scmp.eq.s32.totalorder %s475_s15, 1 }
  0x13   : > { %245 = vst [vmem:[#allocation1] ss:$4 sm:$0xff] %v243_v1  ;;  %v242_v6 = vld [vmem:[%s570_s1] sm:$0x3]  ;;  %vm297_vm4 = vcmask 3072  }
  0x14   : > { %v290_v21 = vld [vmem:[#allocation2] sm:$0xf] }
  0x15   : > { %v299_v24 = vld [vmem:[#allocation3] sm:$0xf] }
  0x1a   : > { %v246_v2 = vld.sshfl [vmem:[#allocation1] sm:$0xff pattern:$0x73625140]  ;;  %v247_v3 = vld.sshfl [vmem:[#allocation1 + $0x8] sm:$0xff pattern:$0x73625140] }
  0x1b   : > { %v253_v4 = vsel %vm252_vm1, %v246_v2, 0  ;;  %v255_v5 = vsel %vm252_vm1, %v247_v3, 0 }
  0x1c   : > { %264 = vmatpush.bf16.msra.mxu0 %v253_v4  ;;  %277 = vmatpush.bf16.msra.mxu1 %v255_v5 }
  0x1f   : > { %427 = vmatmul.msk.bf16.vlgmr.msra.gmra.mxu0 %vm248_vm2, %v242_v6  ;;  %428 = vmatmul.msk.bf16.vlgmr.msra.gmra.mxu1 %vm248_vm2, %v242_v6 }
  0x9c   : > { %v266_v7 = vpop.f32.mrf.mxu0  ;;  %v279_v8 = vpop.f32.mrf.mxu1 }
  0x9d   : > { %v285_v9 = vrot.slane %v279_v8, 4  ;;  %v291_v10 = vsel %vm286_vm3, %v266_v7, 0.0  ;;  %v292_v11 = vsel %vm286_vm3, %v279_v8, 0.0  ;;  %v300_v14 = vmul.f32 %v266_v7, %v266_v7 }
  0x9e   : > { %v293_v12 = vadd.f32 %v292_v11, %v291_v10  ;;  %v301_v15 = vmul.f32 %v279_v8, %v279_v8 }
  0x9f   : > { %v287_v13 = vsel %vm286_vm3, %v266_v7, %v285_v9  ;;  %v302_v18 = vsel %vm286_vm3, %v300_v14, 0.0 }
  0xa0   : > { %289 = vst [vmem:[%s540_s27] sm:$0xff] %v287_v13  ;;  %294 = vadd.xlane.f32.xlu0 %v293_v12  ;;  %v303_v19 = vsel %vm286_vm3, %v301_v15, 0.0 }
  0xa1   : > { %v304_v20 = vadd.f32 %v303_v19, %v302_v18 }
  0xa4   : > { %v268_v16 = vpop.f32.mrf.mxu0  ;;  %v281_v17 = vpop.f32.mrf.mxu1 }
  0xa8   : > { %305 = vadd.xlane.f32.xlu0 %v304_v20 }
 0x113   : > { %v295_v22 = vpop.xlane.xlu0 %294 }
 0x114   : > { %v296_v23 = vadd.f32 %v295_v22, %v290_v21 }
 0x116   : > { %298 = vst.msk [vmem:[#allocation2] sm:$0xf] %vm297_vm4, %v296_v23 }
 0x11a   : > { %313 = sbr.rel (!%p309_p6) target bundleno = 295 (0x127), region = 36 }
 0x11b   : > { %v306_v25 = vpop.xlane.xlu0 %305 }
 0x11c   : > { %v307_v26 = vadd.f32 %v306_v25, %v299_v24 }
 0x11d   : > { %v314_v27 = vld [vmem:[#allocation2] sm:$0xf] (%p309_p6) }
 0x11e   : > { %308 = vst.msk [vmem:[#allocation3] sm:$0xf] %vm297_vm4, %v307_v26 }
 0x11f   : > { %315 = vst.msk [vmem:[%s572_s3] sm:$0xf] %vm297_vm4, %v314_v27 }
 0x125   : > { %v316_v28 = vld [vmem:[#allocation3] sm:$0xf] }
 0x126   : > { %317 = vst.msk [vmem:[%s573_s4] sm:$0xf] %vm297_vm4, %v316_v28 }
 0x127 PF: > { %s15_s17 = sadd.s32 1, %s483_s17   ;;  %s574_s15 = smov %s479_s16 }
 0x128   : > { %p12_p7 = scmp.ge.s32.totalorder %s15_s17, 4   ;;  %s575_s16 = smov %s577_s18 }
 0x12a   :  { %14 = sbr.rel (!%p12_p7) target bundleno = 2 (0x2), region = 82 }

// kernel: emau_forward.4
= control target key start
LH: loop header
LB: loop body
LE: loop exit
PB: predicated region body
PF: predicated region fallthrough
CT: control target
= control target key end

     0   :  { %s445_s12 = smov 0   ;;  %s447_s13 = smov 0   ;;  %s487_s0 = inlined_call_operand.vmem [shape: f32[2,4,256], index: 0, kind: input, shape index: {}]   ;;  %s488_s1 = inlined_call_operand.vmem [shape: bf16[4,4], index: 1, kind: input, shape index: {}]   ;;  %s489_s2 = inlined_call_operand.vmem [shape: f32[4,1], index: 2, kind: input, shape index: {}]   ;;  %s490_s3 = inlined_call_operand.vmem [shape: bf16[2,4,256], index: 3, kind: output, shape index: {}]  }
   0x1   :  { %s449_s14 = smov 0  }
   0x2 LB: > { %s25_s15 = sadd.s32 1, %s418_s13  ;;  %p363_p0 = scmp.ge.s32.totalorder %s422_s14, 1  ;;  %s422_s14 = sphi %s449_s14, %s13_s14   ;;  %s418_s13 = sphi %s447_s13, %s492_s13   ;;  %s414_s12 = sphi %s445_s12, %s491_s12  }
   0x3   : > { %p27_p1 = scmp.ge.s32.totalorder %s25_s15, 2  ;;  %p158_p2 = scmp.lt.s32.totalorder %s422_s14, 3 }
   0x5   : > { %s494_s15 = smov (%p27_p1, %s25_s15), 0  ;;  %p159_p3 = pnand %p363_p0, %p158_p2 }
   0x6   : > { %p191_p4 = scmp.lt.s32.totalorder (!%p159_p3), %s414_s12, 1 }
   0x7   : > { %162 = sbr.rel (%p159_p3) target bundleno = 164 (0xa4), region = 32 }
   0xc   : > { %v424_v0 = vmov 0   ;;  %v221_v1 = vld [vmem:[%s489_s2] sm:$0xf]  ;;  %s496_s12 = smov (!%p191_p4, %s414_s12), 1  ;;  %vm231_vm0 = vcmask 1041408   ;;  %vm227_vm1 = vcmask 31744  }
   0xd   : > { %399 = vset.pattern.permute.xlu0 %v424_v0  ;;  %s372_s18 = sshll.u32 %s496_s12, 3  ;;  %v211_v9 = vld [vmem:[%s488_s1] sm:$0x3]  ;;  %s373_s24 = sshll.u32 %s496_s12, 2 }
   0xe   : > { %224 = vperm.xlu0 %399, %v221_v1   ;;  %s198_s21 = scalar_lea.vmem %s487_s0, %s372_s18  ;;  %s208_s27 = scalar_lea.vmem %s490_s3, %s373_s24 }
   0xf   : > { %v212_v2 = vld [vmem:[%s198_s21] sm:$0xff] }
  0x10   : > { %214 = vst [vmem:[#allocation1] ss:$2 sm:$0xff] %v212_v2 }
  0x17   : > { %v215_v3 = vld.sshfl [vmem:[#allocation1] sm:$0xff pattern:$0x75316420]  ;;  %v216_v4 = vld.sshfl [vmem:[#allocation1 + $0x8] sm:$0xff pattern:$0x75316420] }
  0x18   : > { %v219_v5 = vpack.c.bf16 %v215_v3, %v215_v3  ;;  %v220_v6 = vpack.c.bf16 %v216_v4, %v216_v4 }
  0x1a   : > { %v233_v7 = vsel %vm231_vm0, %v219_v5, 0  ;;  %v236_v8 = vsel %vm231_vm0, %v220_v6, 0 }
  0x1b   : > { %245 = vmatpush.bf16.msra.mxu0 %v233_v7  ;;  %258 = vmatpush.bf16.msra.mxu1 %v236_v8 }
  0x1e   : > { %368 = vmatmul.msk.bf16.vlgmr.msra.gmra.mxu0 %vm227_vm1, %v211_v9  ;;  %369 = vmatmul.msk.bf16.vlgmr.msra.gmra.mxu1 %vm227_vm1, %v211_v9 }
  0x80   : > { %v225_v10 = vpop.permute.xlu0 %224 }
  0x9b   : > { %v247_v11 = vpop.f32.mrf.mxu0  ;;  %v260_v12 = vpop.f32.mrf.mxu1 }
  0x9c   : > { %v248_v13 = vadd.f32 %v247_v11, %v225_v10  ;;  %v261_v14 = vadd.f32 %v260_v12, %v225_v10 }
  0x9e   : > { %v264_v15 = vpack.c.bf16 %v261_v14, %v248_v13 }
  0xa0   : > { %v266_v16 = vrot.slane %v264_v15, 2 }
  0xa2   : > { %v269_v17 = vsel %vm231_vm0, %v264_v15, %v266_v16 }
  0xa3   : > { %271 = vst [vmem:[%s208_s27] sm:$0xf] %v269_v17  ;;  %v249_v18 = vpop.f32.mrf.mxu0  ;;  %v262_v19 = vpop.f32.mrf.mxu1 }
  0xa4 PF: > { %s13_s14 = sadd.s32 1, %s422_s14   ;;  %s491_s12 = smov %s418_s13 }
  0xa5   : > { %p10_p5 = scmp.ge.s32.totalorder %s13_s14, 4   ;;  %s492_s13 = smov %s494_s15 }
  0xa7   :  { %12 = sbr.rel (!%p10_p5) target bundleno = 2 (0x2), region = 62 }

// kernel: emau_forward.7
= control target key start
LH: loop header
LB: loop body
LE: loop exit
PB: predicated region body
PF: predicated region fallthrough
CT: control target
= control target key end

     0   :  { %s499_s15 = smov 0   ;;  %s501_s16 = smov 0   ;;  %s541_s0 = inlined_call_operand.vmem [shape: f32[2,4,256], index: 0, kind: input, shape index: {}]   ;;  %s542_s1 = inlined_call_operand.vmem [shape: f32[2,4,256], index: 1, kind: input, shape index: {}]   ;;  %s543_s2 = inlined_call_operand.vmem [shape: f32[4,1], index: 2, kind: input, shape index: {}]   ;;  %s544_s3 = inlined_call_operand.vmem [shape: f32[4,1], index: 3, kind: input, shape index: {}]   ;;  %s545_s4 = inlined_call_operand.vmem [shape: f32[2,4,256], index: 4, kind: output, shape index: {}]  }
   0x1   :  { %s503_s17 = smov 0  }
   0x2 LB: > { %s26_s18 = sadd.s32 1, %s466_s16  ;;  %p409_p0 = scmp.ge.s32.totalorder %s470_s17, 1  ;;  %s470_s17 = sphi %s503_s17, %s14_s17   ;;  %s466_s16 = sphi %s501_s16, %s547_s16   ;;  %s462_s15 = sphi %s499_s15, %s546_s15  }
   0x3   : > { %p28_p1 = scmp.ge.s32.totalorder %s26_s18, 2  ;;  %p200_p2 = scmp.lt.s32.totalorder %s470_s17, 3 }
   0x5   : > { %s549_s18 = smov (%p28_p1, %s26_s18), 0  ;;  %p201_p3 = pnand %p409_p0, %p200_p2 }
   0x6   : > { %p244_p4 = scmp.lt.s32.totalorder (!%p201_p3), %s462_s15, 1 }
   0x7   : > { %204 = sbr.rel (%p201_p3) target bundleno = 146 (0x92), region = 36 }
   0xc   : > { %v274_v0 = vld [vmem:[%s543_s2] sm:$0xf]  ;;  %v472_v1 = vmov 0   ;;  %s551_s15 = smov (!%p244_p4, %s462_s15), 1  ;;  %v473_v3 = vmov 839922192  }
   0xd   : > { %447 = vset.pattern.permute.xlu0 %v472_v1  ;;  %v285_v2 = vld [vmem:[%s544_s3] sm:$0xf]  ;;  %v280_v4 = vunpack.c.l.s4 %v473_v3  ;;  %s418_s23 = sshll.u32 %s551_s15, 3 }
   0xe   : > { %277 = vperm.xlu0 %447, %v274_v0   ;;  %s251_s26 = scalar_lea.vmem %s541_s0, %s418_s23  ;;  %s261_s29 = scalar_lea.vmem %s542_s1, %s418_s23 }
   0xf   : > { %v281_v6 = vunpack.c.0.s8 %v280_v4  ;;  %v273_v8 = vld [vmem:[%s251_s26] sm:$0xff]  ;;  %s271_s6 = scalar_lea.vmem %s545_s4, %s418_s23 }
  0x10   : > { %v296_v12 = vld [vmem:[%s261_s29] sm:$0xff] }
  0x16   : > { %288 = vperm.xlu0 %447, %v285_v2  }
  0x80   : > { %v278_v5 = vpop.permute.xlu0 %277 }
  0x81   : > { %v282_v7 = vperm.slane %v278_v5, %v281_v6 }
  0x83   : > { %v284_v10 = vmul.f32 %v282_v7, %v273_v8 }
  0x88   : > { %v289_v9 = vpop.permute.xlu0 %288 }
  0x89   : > { %v293_v11 = vperm.slane %v289_v9, %v281_v6 }
  0x8b   : > { %v295_v13 = vadd.f32 %v293_v11, %v284_v10 }
  0x8d   : > { %v297_v14 = vadd.f32 %v296_v12, %v295_v13 }
  0x8f   : > { %v298_v15 = vmax.f32 %v297_v14, 0.0 }
  0x91   : > { %299 = vst [vmem:[%s271_s6] sm:$0xff] %v298_v15 }
  0x92 PF: > { %s14_s17 = sadd.s32 1, %s470_s17   ;;  %s546_s15 = smov %s466_s16 }
  0x93   : > { %p11_p5 = scmp.ge.s32.totalorder %s14_s17, 4   ;;  %s547_s16 = smov %s549_s18 }
  0x95   :  { %13 = sbr.rel (!%p11_p5) target bundleno = 2 (0x2), region = 69 }

// kernel: emau_forward.5
= control target key start
LH: loop header
LB: loop body
LE: loop exit
PB: predicated region body
PF: predicated region fallthrough
CT: control target
= control target key end

     0   :  { %9 = vsyncpa [#allocation3], 0  ;;  %s4724_s0 = inlined_call_operand.vmem [shape: bf16[2,4,256], index: 0, kind: input, shape index: {}]   ;;  %s4725_s1 = inlined_call_operand.vmem [shape: f32[1,4,8], index: 1, kind: input, shape index: {}]   ;;  %s4726_s2 = inlined_call_operand.vmem [shape: bf16[2,4,256], index: 2, kind: output, shape index: {0}]   ;;  %s4727_s3 = inlined_call_operand.hbm [shape: f32[2,4,8], index: 3, kind: output, shape index: {1}]  }
   0x1   :  { %11 = vsyncpa [#allocation3 + $0x1], 0  ;;  %s2925_s12 = smov 0   ;;  %s2927_s13 = smov 0  }
   0x2   :  { %s2929_s14 = smov 0   ;;  %s2931_s15 = smov 0  }
   0x3 LB: > { %s2946_s16 = sadd.s32 4294967295, %s2903_s15   ;;  %s2334_s17 = sadd.s32 4294967294, %s2903_s15   ;;  %s2903_s15 = sphi %s2931_s15, %s4767_s15   ;;  %s2899_s14 = sphi %s2929_s14, %s4766_s14   ;;  %s2895_s13 = sphi %s2927_s13, %s4765_s13   ;;  %s2891_s12 = sphi %s2925_s12, %s4764_s12  }
   0x4   : > { %s2950_s18 = sadd.s32 1, %s2903_s15   ;;  %s97_s19 = sadd.s32 1, %s2899_s14 }
   0x5   : > { %s94_s20 = ssub.s32 %s2903_s15, %s2950_s18  ;;  %p107_p0 = scmp.ne.s32.totalorder %s2899_s14, %s2895_s13 }
   0x6   : > { %p95_p1 = scmp.eq.s32.totalorder %s94_s20, 0  ;;  %p108_p2 = scmp.eq.s32.totalorder %s2946_s16, 1 }
   0x7   : > { %p113_p3 = scmp.ne.s32.totalorder %s2895_s13, %s2891_s12  ;;  %p114_p4 = scmp.eq.s32.totalorder %s2334_s17, 1 }
   0x8   : > { %s2961_s21 = scalar_select %p95_p1, %s2899_s14, %s97_s19  }
   0x9   : > { %p2963_p5 = por %p108_p2, %p107_p0  ;;  %p2967_p6 = por %p114_p4, %p113_p3 }
   0xa   : > { %p2337_p7 = scmp.ge.s32.totalorder %s2903_s15, 1  ;;  %p143_p8 = scmp.lt.s32.totalorder %s2903_s15, 3 }
   0xc   : > { %p144_p9 = pnand %p2337_p7, %p143_p8 }
   0xe   : > { %147 = sbr.rel (%p144_p9) target bundleno = 3037 (0xbdd), region = 28 }
  0x13   : > { %p172_p10 = scmp.lt.s32.totalorder %s2946_s16, 1  ;;  %v184_v0 = vld [vmem:[%s4725_s1] sm:$0xf]  ;;  %vm265_vm0 = vcmask 1041408   ;;  %vm216_vm1 = vcmask 31744   ;;  %vm358_vm2 = vcmask 64512  }
  0x14   : > { %v185_v1 = vpack.c.bf16 %v184_v0, %v184_v0  ;;  %vm862_vm3 = vcmask 60416   ;;  %s169_s4 = sand.u32 1, %s2895_s13   ;;  %s2394_s7 = sshll.u32 %s2946_s16, 2 }
  0x15   : > { %s2978_s26 = scalar_select %p172_p10, %s2946_s16, 1 }
  0x16   : > { %v267_v2 = vsel %vm265_vm0, %v185_v1, 0  ;;  %s2338_s5 = sshll.u32 %s169_s4, 2  ;;  %s2245_s10 = scalar_lea.hbm %s4727_s3, %s2394_s7 }
  0x17   : > { %s2397_s27 = sshll.u32 %s2978_s26, 2  ;;  %276 = vmatpush.bf16.msra.mxu0 %v267_v2  ;;  %s171_s6 = scalar_lea.vmem [#allocation2], %s2338_s5 }
  0x18   : > { %s176_s30 = scalar_lea.vmem %s4724_s0, %s2397_s27  ;;  %s2247_s11 = sshll.u32 %s171_s6, 4  ;;  %s2248_s11 = int_to_ptr.vmem [resolvable:$true] %s2247_s11 }
  0x19   : > { %v2987_v3 = vld [vmem:[%s176_s30] sm:$0xf]  ;;  %s2249_s17 = sshll.u32 %s2245_s10, 4  ;;  %s2232_s19 = scalar_lea.sflag [#allocation3], %s169_s4  ;;  %s2250_s17 = int_to_ptr.hbm [resolvable:$true] %s2249_s17 }
  0x1a   : > { %187 = vst [vmem:[#allocation1] ss:$4 sm:$0xff] %v2987_v3  ;;  %s2855_s20 = sshra.s32 %s2250_s17, 4  ;;  %s2861_s16 = scalar_lea.hbm %s4727_s3, 8  ;;  %s2856_s20 = int_to_ptr.hbm [resolvable:$true] %s2855_s20 }
  0x1b   : > { %s2857_s24 = scalar_lea.hbm %s2856_s20, 4  ;;  %p2862_p0 = scmp.lt.s32.totalorder %s2856_s20, %s4727_s3 }
  0x1c   : > { %p2858_p11 = scmp.ne.s32.totalorder %s2856_s20, %s2857_s24  ;;  %p2863_p1 = scmp.lt.s32.totalorder %s2861_s16, %s2857_s24 }
  0x1e   : > { %p2859_p12 = pnand %p2858_p11, %p2963_p5  ;;  %p2864_p2 = por %p2863_p1, %p2862_p0 }
  0x20   : > { %p2860_p13 = pneg %p2859_p12 }
  0x21   : > { %v188_v4 = vld.sshfl [vmem:[#allocation1] sm:$0xff pattern:$0x73625140]  ;;  %v189_v5 = vld.sshfl [vmem:[#allocation1 + $0x8] sm:$0xff pattern:$0x73625140] }
  0x22   : > { %192 = vxpose.binary.xlu0.c.b16.start.end [1/2] (short) %v189_v5, %v188_v4, 128  ;;  %830 = vst [vmem:[#allocation1] ss:$4 sm:$0xff] %v2987_v3  ;;  %p2865_p3 = pnand %p2864_p2, %p2860_p13 }
  0xce   : > { %v2991_v6 = vpop.trf.xlu0 }
  0xcf   : > { %2343 = vmatmul.msk.bf16.vlgmr.msra.gmra.mxu0 %vm216_vm1, %v2991_v6 }
  0xd6   : > { %v2995_v7 = vpop.trf.xlu0 }
  0xde   : > { %v2997_v8 = vpop.trf.xlu0 }
  0xdf   : > { %2344 = vmatmul.msk.bf16.gmra.mxu0 %vm216_vm1, %v2997_v8 }
  0xe6   : > { %v3001_v9 = vpop.trf.xlu0 }
  0xe7   : > { %4744 = vst [vmem:[#allocation5_spill] sm:$0xff] %v3001_v9 }
  0xee   : > { %v3003_v10 = vpop.trf.xlu0 }
  0xef   : > { %2345 = vmatmul.msk.bf16.gmra.mxu0 %vm216_vm1, %v3003_v10 }
  0xf6   : > { %v3007_v11 = vpop.trf.xlu0 }
  0xf7   : > { %4745 = vst [vmem:[#allocation6_spill] sm:$0xff] %v3007_v11 }
  0xfe   : > { %v3009_v12 = vpop.trf.xlu0 }
  0xff   : > { %2346 = vmatmul.msk.bf16.gmra.mxu0 %vm216_vm1, %v3009_v12 }
 0x106   : > { %v3013_v13 = vpop.trf.xlu0 }
 0x107   : > { %4746 = vst [vmem:[#allocation7_spill] sm:$0xff] %v3013_v13 }
 0x10e   : > { %v3015_v14 = vpop.trf.xlu0 }
 0x10f   : > { %2347 = vmatmul.msk.bf16.gmra.mxu0 %vm216_vm1, %v3015_v14 }
 0x116   : > { %v3019_v15 = vpop.trf.xlu0 }
 0x117   : > { %4747 = vst [vmem:[#allocation8_spill] sm:$0xff] %v3019_v15 }
 0x11e   : > { %v3021_v16 = vpop.trf.xlu0 }
 0x11f   : > { %2348 = vmatmul.msk.bf16.gmra.mxu0 %vm216_vm1, %v3021_v16 }
 0x126   : > { %v3025_v17 = vpop.trf.xlu0 }
 0x127   : > { %4748 = vst [vmem:[#allocation9_spill] sm:$0xff] %v3025_v17 }
 0x12e   : > { %v3027_v18 = vpop.trf.xlu0 }
 0x12f   : > { %2349 = vmatmul.msk.bf16.gmra.mxu0 %vm216_vm1, %v3027_v18 }
 0x136   : > { %v3031_v19 = vpop.trf.xlu0 }
 0x137   : > { %4749 = vst [vmem:[#allocation10_spill] sm:$0xff] %v3031_v19 }
 0x13e   : > { %v3033_v20 = vpop.trf.xlu0 }
 0x13f   : > { %2350 = vmatmul.msk.bf16.gmra.mxu0 %vm216_vm1, %v3033_v20 }
 0x146   : > { %v3101_v49 = vpop.trf.xlu0 }
 0x147   : > { %4750 = vst [vmem:[#allocation11_spill] sm:$0xff] %v3101_v49 }
 0x14c   : > { %v278_v21 = vpop.f32.mrf.mxu0 }
 0x14d   : > { %v359_v22 = vsel %vm358_vm2, %v278_v21, -inf }
 0x14e   : > { %360 = vmax.xlane.f32.xlu0 %v359_v22 }
 0x14f   : > { %2351 = vmatmul.msk.bf16.gmra.mxu0 %vm216_vm1, %v2995_v7 }
 0x154   : > { %v280_v23 = vpop.f32.mrf.mxu0 }
 0x155   : > { %v362_v24 = vsel %vm358_vm2, %v280_v23, -inf }
 0x156   : > { %363 = vmax.xlane.f32.xlu1 %v362_v24 }
 0x15c   : > { %v3041_v25 = vpop.f32.mrf.mxu0 }
 0x15d   : > { %v365_v26 = vsel %vm358_vm2, %v3041_v25, -inf }
 0x15e   : > { %366 = vmax.xlane.f32.xlu1 %v365_v26 }
 0x15f   : > { %2352 = vmatmul.msk.bf16.gmra.mxu0 %vm216_vm1, %v3001_v9 }
 0x164   : > { %v3047_v27 = vpop.f32.mrf.mxu0 }
 0x165   : > { %v368_v28 = vsel %vm358_vm2, %v3047_v27, -inf }
 0x166   : > { %369 = vmax.xlane.f32.xlu2 %v368_v28 }
 0x16c   : > { %v3051_v29 = vpop.f32.mrf.mxu0 }
 0x16d   : > { %v371_v30 = vsel %vm358_vm2, %v3051_v29, -inf }
 0x16e   : > { %372 = vmax.xlane.f32.xlu2 %v371_v30 }
 0x16f   : > { %2353 = vmatmul.msk.bf16.gmra.mxu0 %vm216_vm1, %v3007_v11 }
 0x174   : > { %v3057_v31 = vpop.f32.mrf.mxu0 }
 0x175   : > { %v374_v32 = vsel %vm358_vm2, %v3057_v31, -inf }
 0x176   : > { %375 = vmax.xlane.f32.xlu1 %v374_v32 }
 0x17c   : > { %v3061_v33 = vpop.f32.mrf.mxu0 }
 0x17d   : > { %v377_v34 = vsel %vm358_vm2, %v3061_v33, -inf }
 0x17e   : > { %378 = vmax.xlane.f32.xlu2 %v377_v34 }
 0x17f   : > { %2354 = vmatmul.msk.bf16.gmra.mxu0 %vm216_vm1, %v3013_v13 }
 0x184   : > { %v3067_v35 = vpop.f32.mrf.mxu0 }
 0x185   : > { %v380_v36 = vsel %vm358_vm2, %v3067_v35, -inf }
 0x186   : > { %381 = vmax.xlane.f32.xlu1 %v380_v36 }
 0x18c   : > { %v3071_v37 = vpop.f32.mrf.mxu0 }
 0x18d   : > { %v383_v38 = vsel %vm358_vm2, %v3071_v37, -inf }
 0x18e   : > { %384 = vmax.xlane.f32.xlu2 %v383_v38 }
 0x18f   : > { %2355 = vmatmul.msk.bf16.gmra.mxu0 %vm216_vm1, %v3019_v15 }
 0x194   : > { %v3077_v39 = vpop.f32.mrf.mxu0 }
 0x195   : > { %v386_v40 = vsel %vm358_vm2, %v3077_v39, -inf }
 0x196   : > { %387 = vmax.xlane.f32.xlu1 %v386_v40 }
 0x19c   : > { %v3081_v41 = vpop.f32.mrf.mxu0 }
 0x19d   : > { %v389_v42 = vsel %vm358_vm2, %v3081_v41, -inf }
 0x19e   : > { %390 = vmax.xlane.f32.xlu2 %v389_v42 }
 0x19f   : > { %2356 = vmatmul.msk.bf16.gmra.mxu0 %vm216_vm1, %v3025_v17 }
 0x1a4   : > { %v3087_v43 = vpop.f32.mrf.mxu0 }
 0x1a5   : > { %v392_v44 = vsel %vm358_vm2, %v3087_v43, -inf }
 0x1a6   : > { %393 = vmax.xlane.f32.xlu1 %v392_v44 }
 0x1ac   : > { %v3091_v45 = vpop.f32.mrf.mxu0 }
 0x1ad   : > { %v395_v46 = vsel %vm358_vm2, %v3091_v45, -inf }
 0x1ae   : > { %396 = vmax.xlane.f32.xlu2 %v395_v46 }
 0x1af   : > { %2357 = vmatmul.msk.bf16.gmra.mxu0 %vm216_vm1, %v3031_v19 }
 0x1b4   : > { %v3097_v47 = vpop.f32.mrf.mxu0 }
 0x1b5   : > { %v398_v48 = vsel %vm358_vm2, %v3097_v47, -inf }
 0x1b6   : > { %399 = vmax.xlane.f32.xlu1 %v398_v48 }
 0x1bc   : > { %v3103_v50 = vpop.f32.mrf.mxu0 }
 0x1bd   : > { %v401_v51 = vsel %vm358_vm2, %v3103_v50, -inf }
 0x1be   : > { %402 = vmax.xlane.f32.xlu2 %v401_v51 }
 0x1bf   : > { %2358 = vmatmul.msk.bf16.gmra.mxu0 %vm216_vm1, %v3101_v49 }
 0x1c1   : > { %v361_v52 = vpop.xlane.xlu0 %360 }
 0x1c2   : > { %v455_v53 = vsub.f32 %v278_v21, %v361_v52 }
 0x1c4   : > { %v3109_v54 = vpop.f32.mrf.mxu0  ;;  %v487_v56 = vmul.f32 1.442695, %v455_v53 }
 0x1c5   : > { %v404_v55 = vsel %vm358_vm2, %v3109_v54, -inf }
 0x1c6   : > { %405 = vmax.xlane.f32.xlu1 %v404_v55  ;;  %2439 = vpow2.f32 %v487_v56 }
 0x1c9   : > { %v364_v57 = vpop.xlane.xlu1 %363 }
 0x1ca   : > { %v456_v58 = vsub.f32 %v280_v23, %v364_v57 }
 0x1cc   : > { %v3113_v59 = vpop.f32.mrf.mxu0  ;;  %v489_v61 = vmul.f32 1.442695, %v456_v58  ;;  %v3117_v63 = vpop.eup %2439 }
 0x1cd   : > { %v407_v60 = vsel %vm358_vm2, %v3113_v59, -inf  ;;  %v551_v4 = vsel %vm358_vm2, %v3117_v63, 0.0 }
 0x1ce   : > { %408 = vmax.xlane.f32.xlu2 %v407_v60  ;;  %2441 = vpow2.f32 %v489_v61 }
 0x1d1   : > { %v367_v62 = vpop.xlane.xlu1 %366 }
 0x1d2   : > { %v457_v0 = vsub.f32 %v3041_v25, %v367_v62 }
 0x1d4   : > { %v3120_v1 = vpop.f32.mrf.mxu0  ;;  %v491_v5 = vmul.f32 1.442695, %v457_v0  ;;  %v3126_v21 = vpop.eup %2441 }
 0x1d5   : > { %v410_v2 = vsel %vm358_vm2, %v3120_v1, -inf  ;;  %v554_v23 = vsel %vm358_vm2, %v3126_v21, 0.0 }
 0x1d6   : > { %411 = vmax.xlane.f32.xlu1 %v410_v2  ;;  %552 = vadd.xlane.f32.xlu2 %v551_v4  ;;  %2443 = vpow2.f32 %v491_v5 }
 0x1d9   : > { %v370_v25 = vpop.xlane.xlu2 %369 }
 0x1da   : > { %v458_v28 = vsub.f32 %v3047_v27, %v370_v25 }
 0x1dc   : > { %v3128_v22 = vpop.f32.mrf.mxu0  ;;  %v3134_v26 = vpop.eup %2443  ;;  %v493_v34 = vmul.f32 1.442695, %v458_v28 }
 0x1dd   : > { %v413_v24 = vsel %vm358_vm2, %v3128_v22, -inf  ;;  %v557_v32 = vsel %vm358_vm2, %v3134_v26, 0.0 }
 0x1de   : > { %555 = vadd.xlane.f32.xlu1 %v554_v23  ;;  %414 = vmax.xlane.f32.xlu2 %v413_v24  ;;  %2445 = vpow2.f32 %v493_v34 }
 0x1e1   : > { %v373_v36 = vpop.xlane.xlu2 %372 }
 0x1e2   : > { %v459_v38 = vsub.f32 %v3051_v29, %v373_v36 }
 0x1e4   : > { %v3137_v30 = vpop.f32.mrf.mxu0  ;;  %v495_v27 = vmul.f32 1.442695, %v459_v38  ;;  %v3148_v48 = vpop.eup %2445 }
 0x1e5   : > { %v416_v42 = vsel %vm358_vm2, %v3137_v30, -inf  ;;  %v560_v29 = vsel %vm358_vm2, %v3148_v48, 0.0 }
 0x1e6   : > { %558 = vadd.xlane.f32.xlu1 %v557_v32  ;;  %2447 = vpow2.f32 %v495_v27 }
 0x1e9   : > { %v376_v55 = vpop.xlane.xlu1 %375 }
 0x1ea   : > { %v460_v57 = vsub.f32 %v3057_v31, %v376_v55 }
 0x1ec   : > { %v3142_v40 = vpop.f32.mrf.mxu0  ;;  %v3155_v56 = vpop.eup %2447  ;;  %v497_v61 = vmul.f32 1.442695, %v460_v57 }
 0x1ed   : > { %v419_v44 = vsel %vm358_vm2, %v3142_v40, -inf  ;;  %v563_v60 = vsel %vm358_vm2, %v3155_v56, 0.0 }
 0x1ee   : > { %417 = vmax.xlane.f32.xlu1 %v416_v42  ;;  %420 = vmax.xlane.f32.xlu2 %v419_v44 }
 0x1f1   : > { %v379_v46 = vpop.xlane.xlu2 %378 }
 0x1f2   : > { %v461_v51 = vsub.f32 %v3061_v33, %v379_v46 }
 0x1f4   : > { %v3151_v52 = vpop.f32.mrf.mxu0  ;;  %v499_v53 = vmul.f32 1.442695, %v461_v51 }
 0x1f5   : > { %v422_v31 = vsel %vm358_vm2, %v3151_v52, -inf }
 0x1f6   : > { %561 = vadd.xlane.f32.xlu1 %v560_v29  ;;  %2449 = vpow2.f32 %v499_v53 }
 0x1f7   : > { %2451 = vpow2.f32 %v497_v61 }
 0x1f9   : > { %v382_v24 = vpop.xlane.xlu1 %381 }
 0x1fa   : > { %v462_v28 = vsub.f32 %v3067_v35, %v382_v24 }
 0x1fc   : > { %v3158_v58 = vpop.f32.mrf.mxu0  ;;  %v3164_v0 = vpop.eup %2449  ;;  %v501_v36 = vmul.f32 1.442695, %v462_v28 }
 0x1fd   : > { %v425_v33 = vsel %vm358_vm2, %v3158_v58, -inf  ;;  %v569_v5 = vsel %vm358_vm2, %v3164_v0, 0.0  ;;  %v3173_v25 = vpop.eup %2451 }
 0x1fe   : > { %564 = vadd.xlane.f32.xlu1 %v563_v60  ;;  %426 = vmax.xlane.f32.xlu2 %v425_v33 }
 0x201   : > { %v385_v62 = vpop.xlane.xlu2 %384 }
 0x202   : > { %v463_v2 = vsub.f32 %v3071_v37, %v385_v62  ;;  %v566_v37 = vsel %vm358_vm2, %v3173_v25, 0.0 }
 0x204   : > { %v3167_v4 = vpop.f32.mrf.mxu0  ;;  %v503_v23 = vmul.f32 1.442695, %v463_v2 }
 0x205   : > { %v428_v35 = vsel %vm358_vm2, %v3167_v4, -inf }
 0x206   : > { %423 = vmax.xlane.f32.xlu1 %v422_v31  ;;  %570 = vadd.xlane.f32.xlu2 %v569_v5  ;;  %2453 = vpow2.f32 %v503_v23 }
 0x207   : > { %2455 = vpow2.f32 %v501_v36 }
 0x209   : > { %v388_v29 = vpop.xlane.xlu1 %387 }
 0x20a   : > { %v464_v55 = vsub.f32 %v3077_v39, %v388_v29 }
 0x20c   : > { %v3176_v32 = vpop.f32.mrf.mxu0  ;;  %v3182_v42 = vpop.eup %2453  ;;  %v505_v33 = vmul.f32 1.442695, %v464_v55 }
 0x20d   : > { %v431_v34 = vsel %vm358_vm2, %v3176_v32, -inf  ;;  %v575_v46 = vsel %vm358_vm2, %v3182_v42, 0.0  ;;  %v3191_v53 = vpop.eup %2455 }
 0x20e   : > { %567 = vadd.xlane.f32.xlu1 %v566_v37  ;;  %432 = vmax.xlane.f32.xlu2 %v431_v34 }
 0x211   : > { %v391_v38 = vpop.xlane.xlu2 %390 }
 0x212   : > { %v465_v44 = vsub.f32 %v3081_v41, %v391_v38  ;;  %v572_v41 = vsel %vm358_vm2, %v3191_v53, 0.0 }
 0x214   : > { %v3185_v27 = vpop.f32.mrf.mxu0  ;;  %v507_v51 = vmul.f32 1.442695, %v465_v44 }
 0x215   : > { %v434_v39 = vsel %vm358_vm2, %v3185_v27, -inf }
 0x216   : > { %429 = vmax.xlane.f32.xlu1 %v428_v35  ;;  %576 = vadd.xlane.f32.xlu2 %v575_v46  ;;  %2457 = vpow2.f32 %v507_v51 }
 0x217   : > { %2459 = vpow2.f32 %v505_v33 }
 0x219   : > { %v394_v24 = vpop.xlane.xlu1 %393 }
 0x21a   : > { %v466_v37 = vsub.f32 %v3087_v43, %v394_v24 }
 0x21c   : > { %v3194_v57 = vpop.f32.mrf.mxu0  ;;  %v3200_v62 = vpop.eup %2457  ;;  %v509_v38 = vmul.f32 1.442695, %v466_v37 }
 0x21d   : > { %v437_v60 = vsel %vm358_vm2, %v3194_v57, -inf  ;;  %v581_v5 = vsel %vm358_vm2, %v3200_v62, 0.0  ;;  %v3209_v28 = vpop.eup %2459 }
 0x21e   : > { %573 = vadd.xlane.f32.xlu1 %v572_v41  ;;  %438 = vmax.xlane.f32.xlu2 %v437_v60 }
 0x221   : > { %v397_v61 = vpop.xlane.xlu2 %396 }
 0x222   : > { %v467_v2 = vsub.f32 %v3091_v45, %v397_v61  ;;  %v578_v45 = vsel %vm358_vm2, %v3209_v28, 0.0 }
 0x224   : > { %v3203_v31 = vpop.f32.mrf.mxu0  ;;  %v511_v23 = vmul.f32 1.442695, %v467_v2 }
 0x225   : > { %v440_v43 = vsel %vm358_vm2, %v3203_v31, -inf }
 0x226   : > { %435 = vmax.xlane.f32.xlu1 %v434_v39  ;;  %582 = vadd.xlane.f32.xlu2 %v581_v5  ;;  %2461 = vpow2.f32 %v511_v23 }
 0x227   : > { %2463 = vpow2.f32 %v509_v38 }
 0x229   : > { %v400_v44 = vpop.xlane.xlu1 %399 }
 0x22a   : > { %v468_v46 = vsub.f32 %v3097_v47, %v400_v44 }
 0x22c   : > { %v3212_v34 = vpop.f32.mrf.mxu0  ;;  %v3218_v35 = vpop.eup %2461  ;;  %v513_v29 = vmul.f32 1.442695, %v468_v46 }
 0x22d   : > { %v443_v36 = vsel %vm358_vm2, %v3212_v34, -inf  ;;  %v587_v51 = vsel %vm358_vm2, %v3218_v35, 0.0  ;;  %v3227_v33 = vpop.eup %2463 }
 0x22e   : > { %579 = vadd.xlane.f32.xlu1 %v578_v45  ;;  %444 = vmax.xlane.f32.xlu2 %v443_v36  ;;  %2465 = vpow2.f32 %v513_v29  ;;  %v584_v2 = vsel %vm358_vm2, %v3227_v33, 0.0 }
 0x231   : > { %v403_v55 = vpop.xlane.xlu2 %402 }
 0x232   : > { %v469_v61 = vsub.f32 %v3103_v50, %v403_v55 }
 0x234   : > { %v3225_v41 = vpop.f32.mrf.mxu0  ;;  %v515_v5 = vmul.f32 1.442695, %v469_v61  ;;  %v3235_v37 = vpop.eup %2465 }
 0x235   : > { %v446_v39 = vsel %vm358_vm2, %v3225_v41, -inf }
 0x236   : > { %441 = vmax.xlane.f32.xlu1 %v440_v43  ;;  %588 = vadd.xlane.f32.xlu2 %v587_v51  ;;  %2467 = vpow2.f32 %v515_v5 }
 0x239   : > { %v406_v60 = vpop.xlane.xlu1 %405 }
 0x23a   : > { %v470_v47 = vsub.f32 %v3109_v54, %v406_v60  ;;  %v590_v54 = vsel %vm358_vm2, %v3235_v37, 0.0 }
 0x23c   : > { %v517_v23 = vmul.f32 1.442695, %v470_v47  ;;  %v3237_v45 = vpop.f32.mrf.mxu0  ;;  %v3243_v36 = vpop.eup %2467 }
 0x23d   : > { %v449_v50 = vsel %vm358_vm2, %v3237_v45, -inf  ;;  %v593_v60 = vsel %vm358_vm2, %v3243_v36, 0.0 }
 0x23e   : > { %585 = vadd.xlane.f32.xlu1 %v584_v2  ;;  %447 = vmax.xlane.f32.xlu2 %v446_v39  ;;  %2469 = vpow2.f32 %v517_v23 }
 0x241   : > { %v409_v24 = vpop.xlane.xlu2 %408 }
 0x242   : > { %v471_v51 = vsub.f32 %v3113_v59, %v409_v24 }
 0x244   : > { %v3247_v46 = vpop.eup %2469  ;;  %v519_v61 = vmul.f32 1.442695, %v471_v51  ;;  %v3257_v39 = vpop.f32.mrf.mxu0 }
 0x245   : > { %v596_v55 = vsel %vm358_vm2, %v3247_v46, 0.0  ;;  %v452_v23 = vsel %vm358_vm2, %v3257_v39, -inf }
 0x246   : > { %591 = vadd.xlane.f32.xlu1 %v590_v54  ;;  %450 = vmax.xlane.f32.xlu2 %v449_v50 }
 0x249   : > { %v412_v38 = vpop.xlane.xlu1 %411  ;;  %v3245_v44 = vpop.xlane.xlu2 %552 }
 0x24a   : > { %v472_v43 = vsub.f32 %v3120_v1, %v412_v38 }
 0x24c   : > { %v521_v29 = vmul.f32 1.442695, %v472_v43 }
 0x24e   : > { %2471 = vpow2.f32 %v521_v29  ;;  %597 = vadd.xlane.f32.xlu1 %v596_v55  ;;  %594 = vadd.xlane.f32.xlu2 %v593_v60 }
 0x24f   : > { %2473 = vpow2.f32 %v519_v61 }
 0x251   : > { %v3255_v47 = vpop.xlane.xlu1 %555  ;;  %v415_v2 = vpop.xlane.xlu2 %414 }
 0x252   : > { %v473_v59 = vsub.f32 %v3128_v22, %v415_v2 }
 0x254   : > { %v3259_v5 = vpop.eup %2471  ;;  %v523_v24 = vmul.f32 1.442695, %v473_v59 }
 0x255   : > { %v602_v1 = vsel %vm358_vm2, %v3259_v5, 0.0  ;;  %v3268_v54 = vpop.eup %2473 }
 0x256   : > { %603 = vadd.xlane.f32.xlu1 %v602_v1  ;;  %453 = vmax.xlane.f32.xlu2 %v452_v23  ;;  %2475 = vpow2.f32 %v523_v24  ;;  %v599_v38 = vsel %vm358_vm2, %v3268_v54, 0.0 }
 0x259   : > { %v3266_v50 = vpop.xlane.xlu1 %558 }
 0x25c   : > { %v3272_v51 = vpop.eup %2475 }
 0x25d   : > { %v605_v2 = vsel %vm358_vm2, %v3272_v51, 0.0 }
 0x25e   : > { %600 = vadd.xlane.f32.xlu2 %v599_v38 }
 0x261   : > { %v418_v43 = vpop.xlane.xlu1 %417  ;;  %v421_v22 = vpop.xlane.xlu2 %420 }
 0x262   : > { %v474_v29 = vsub.f32 %v3137_v30, %v418_v43  ;;  %v475_v55 = vsub.f32 %v3142_v40, %v421_v22 }
 0x264   : > { %v525_v60 = vmul.f32 1.442695, %v474_v29  ;;  %v527_v61 = vmul.f32 1.442695, %v475_v55 }
 0x266   : > { %2477 = vpow2.f32 %v525_v60  ;;  %606 = vadd.xlane.f32.xlu2 %v605_v2 }
 0x267   : > { %2479 = vpow2.f32 %v527_v61 }
 0x269   : > { %v3278_v59 = vpop.xlane.xlu1 %561 }
 0x26c   : > { %v3280_v1 = vpop.eup %2477 }
 0x26d   : > { %v3282_v23 = vpop.eup %2479  ;;  %v608_v24 = vsel %vm358_vm2, %v3280_v1, 0.0 }
 0x26e   : > { %609 = vadd.xlane.f32.xlu1 %v608_v24  ;;  %v611_v30 = vsel %vm358_vm2, %v3282_v23, 0.0 }
 0x26f   : > { %612 = vadd.xlane.f32.xlu2 %v611_v30 }
 0x271   : > { %v3288_v40 = vpop.xlane.xlu1 %564  ;;  %v427_v38 = vpop.xlane.xlu2 %426 }
 0x272   : > { %v477_v43 = vsub.f32 %v3158_v58, %v427_v38 }
 0x274   : > { %v531_v22 = vmul.f32 1.442695, %v477_v43 }
 0x276   : > { %2481 = vpow2.f32 %v531_v22 }
 0x279   : > { %v424_v29 = vpop.xlane.xlu1 %423  ;;  %v3291_v55 = vpop.xlane.xlu2 %570 }
 0x27a   : > { %v476_v60 = vsub.f32 %v3151_v52, %v424_v29 }
 0x27c   : > { %v3294_v61 = vpop.eup %2481  ;;  %v529_v2 = vmul.f32 1.442695, %v476_v60 }
 0x27d   : > { %v617_v24 = vsel %vm358_vm2, %v3294_v61, 0.0 }
 0x27e   : > { %2483 = vpow2.f32 %v529_v2  ;;  %618 = vadd.xlane.f32.xlu2 %v617_v24 }
 0x281   : > { %v3298_v30 = vpop.xlane.xlu1 %567  ;;  %v433_v49 = vpop.xlane.xlu2 %432 }
 0x282   : > { %v479_v58 = vsub.f32 %v3176_v32, %v433_v49 }
 0x284   : > { %v3301_v38 = vpop.eup %2483  ;;  %v535_v43 = vmul.f32 1.442695, %v479_v58 }
 0x285   : > { %v614_v22 = vsel %vm358_vm2, %v3301_v38, 0.0 }
 0x286   : > { %2485 = vpow2.f32 %v535_v43  ;;  %615 = vadd.xlane.f32.xlu1 %v614_v22 }
 0x289   : > { %v430_v52 = vpop.xlane.xlu1 %429  ;;  %v3305_v29 = vpop.xlane.xlu2 %576 }
 0x28a   : > { %v478_v60 = vsub.f32 %v3167_v4, %v430_v52 }
 0x28c   : > { %v3308_v2 = vpop.eup %2485  ;;  %v533_v24 = vmul.f32 1.442695, %v478_v60 }
 0x28d   : > { %v623_v19 = vsel %vm358_vm2, %v3308_v2, 0.0 }
 0x28e   : > { %2487 = vpow2.f32 %v533_v24  ;;  %624 = vadd.xlane.f32.xlu2 %v623_v19 }
 0x291   : > { %v3312_v49 = vpop.xlane.xlu1 %573  ;;  %v439_v32 = vpop.xlane.xlu2 %438 }
 0x292   : > { %v481_v58 = vsub.f32 %v3194_v57, %v439_v32 }
 0x294   : > { %v3315_v43 = vpop.eup %2487  ;;  %v539_v22 = vmul.f32 1.442695, %v481_v58 }
 0x295   : > { %v620_v17 = vsel %vm358_vm2, %v3315_v43, 0.0 }
 0x296   : > { %2489 = vpow2.f32 %v539_v22  ;;  %621 = vadd.xlane.f32.xlu1 %v620_v17 }
 0x299   : > { %v436_v4 = vpop.xlane.xlu1 %435  ;;  %v3319_v52 = vpop.xlane.xlu2 %582 }
 0x29a   : > { %v480_v60 = vsub.f32 %v3185_v27, %v436_v4 }
 0x29c   : > { %v3322_v24 = vpop.eup %2489  ;;  %v537_v19 = vmul.f32 1.442695, %v480_v60 }
 0x29d   : > { %v629_v15 = vsel %vm358_vm2, %v3322_v24, 0.0 }
 0x29e   : > { %2491 = vpow2.f32 %v537_v19  ;;  %630 = vadd.xlane.f32.xlu2 %v629_v15 }
 0x2a1   : > { %v3326_v57 = vpop.xlane.xlu1 %579  ;;  %v445_v32 = vpop.xlane.xlu2 %444 }
 0x2a2   : > { %v483_v58 = vsub.f32 %v3212_v34, %v445_v32 }
 0x2a4   : > { %v3329_v22 = vpop.eup %2491  ;;  %v543_v17 = vmul.f32 1.442695, %v483_v58 }
 0x2a5   : > { %v626_v13 = vsel %vm358_vm2, %v3329_v22, 0.0 }
 0x2a6   : > { %2493 = vpow2.f32 %v543_v17  ;;  %627 = vadd.xlane.f32.xlu1 %v626_v13 }
 0x2a9   : > { %v442_v27 = vpop.xlane.xlu1 %441  ;;  %v3333_v4 = vpop.xlane.xlu2 %588 }
 0x2aa   : > { %v482_v60 = vsub.f32 %v3203_v31, %v442_v27 }
 0x2ac   : > { %v3336_v19 = vpop.eup %2493  ;;  %v541_v15 = vmul.f32 1.442695, %v482_v60 }
 0x2ad   : > { %v635_v11 = vsel %vm358_vm2, %v3336_v19, 0.0 }
 0x2ae   : > { %2495 = vpow2.f32 %v541_v15  ;;  %636 = vadd.xlane.f32.xlu2 %v635_v11 }
 0x2b1   : > { %v448_v34 = vpop.xlane.xlu2 %447 }
 0x2b2   : > { %v484_v32 = vsub.f32 %v3225_v41, %v448_v34 }
 0x2b4   : > { %v3341_v58 = vpop.eup %2495  ;;  %v545_v17 = vmul.f32 1.442695, %v484_v32 }
 0x2b5   : > { %v632_v13 = vsel %vm358_vm2, %v3341_v58, 0.0 }
 0x2b6   : > { %2497 = vpow2.f32 %v545_v17  ;;  %633 = vadd.xlane.f32.xlu1 %v632_v13 }
 0x2b9   : > { %v451_v31 = vpop.xlane.xlu2 %450 }
 0x2ba   : > { %v485_v27 = vsub.f32 %v3237_v45, %v451_v31 }
 0x2bc   : > { %v3346_v60 = vpop.eup %2497  ;;  %v547_v9 = vmul.f32 1.442695, %v485_v27 }
 0x2bd   : > { %v638_v11 = vsel %vm358_vm2, %v3346_v60, 0.0 }
 0x2be   : > { %2499 = vpow2.f32 %v547_v9  ;;  %639 = vadd.xlane.f32.xlu0 %v638_v11  ;;  %v586_v9 = vpop.xlane.xlu1 %585 }
 0x2c1   : > { %v3350_v41 = vpop.xlane.xlu2 %594 }
 0x2c4   : > { %v3352_v15 = vpop.eup %2499 }
 0x2c5   : > { %v641_v34 = vsel %vm358_vm2, %v3352_v15, 0.0 }
 0x2c6   : > { %642 = vadd.xlane.f32.xlu1 %v641_v34 }
 0x2c9   : > { %v454_v32 = vpop.xlane.xlu2 %453 }
 0x2ca   : > { %v486_v17 = vsub.f32 %v3257_v39, %v454_v32  ;;  %v592_v32 = vpop.xlane.xlu1 %591 }
 0x2cc   : > { %v549_v45 = vmul.f32 1.442695, %v486_v17 }
 0x2ce   : > { %2501 = vpow2.f32 %v549_v45 }
 0x2cf   : > { %2503 = vrcp.f32 %v3255_v47 }
 0x2d0   : > { %2505 = vrcp.f32 %v3245_v44 }
 0x2d1   : > { %2507 = vrcp.f32 %v3266_v50 }
 0x2d2   : > { %2509 = vrcp.f32 %v3278_v59 }
 0x2d3   : > { %2511 = vrcp.f32 %v3288_v40 }
 0x2d4   : > { %v3357_v13 = vpop.eup %2501  ;;  %2513 = vrcp.f32 %v3298_v30 }
 0x2d5   : > { %v644_v31 = vsel %vm358_vm2, %v3357_v13, 0.0  ;;  %v2504_v27 = vpop.eup %2503  ;;  %2515 = vrcp.f32 %v3291_v55 }
 0x2d6   : > { %645 = vadd.xlane.f32.xlu2 %v644_v31  ;;  %v2506_v39 = vpop.eup %2505  ;;  %v3368_v34 = vmul.f32 %v2504_v27, %v3126_v21  ;;  %2517 = vrcp.f32 %v3312_v49 }
 0x2d7   : > { %v2508_v11 = vpop.eup %2507  ;;  %v3371_v47 = vmul.f32 %v2506_v39, %v3117_v63  ;;  %2519 = vrcp.f32 %v3305_v29  ;;  %v598_v39 = vpop.xlane.xlu1 %597 }
 0x2d8   : > { %v2510_v17 = vpop.eup %2509  ;;  %v3374_v44 = vmul.f32 %v2508_v11, %v3134_v26  ;;  %v712_v59 = vsel %vm358_vm2, %v3368_v34, 0.0  ;;  %2521 = vrcp.f32 %v3326_v57 }
 0x2d9   : > { %v2512_v50 = vpop.eup %2511  ;;  %v3379_v40 = vmul.f32 %v2510_v17, %v3148_v48  ;;  %v711_v21 = vsel %vm358_vm2, %v3371_v47, 0.0  ;;  %2523 = vrcp.f32 %v3319_v52 }
 0x2da   : > { %v2514_v30 = vpop.eup %2513  ;;  %v714_v63 = vsel %vm358_vm2, %v3374_v44, 0.0  ;;  %v3388_v26 = vmul.f32 %v2512_v50, %v3155_v56  ;;  %v713_v45 = vadd.f32 %v712_v59, %v711_v21  ;;  %v601_v59 = vpop.xlane.xlu2 %600  ;;  %2525 = vrcp.f32 %v586_v9 }
 0x2db   : > { %v716_v31 = vsel %vm358_vm2, %v3379_v40, 0.0  ;;  %v3393_v48 = vmul.f32 %v2514_v30, %v3173_v25  ;;  %v2516_v27 = vpop.eup %2515  ;;  %2527 = vrcp.f32 %v3333_v4 }
 0x2dc   : > { %v715_v55 = vadd.f32 %v714_v63, %v713_v45  ;;  %v718_v49 = vsel %vm358_vm2, %v3388_v26, 0.0  ;;  %v2518_v11 = vpop.eup %2517  ;;  %v3402_v25 = vmul.f32 %v2516_v27, %v3164_v0  ;;  %2529 = vrcp.f32 %v592_v32 }
 0x2dd   : > { %v720_v56 = vsel %vm358_vm2, %v3393_v48, 0.0  ;;  %v3405_v30 = vmul.f32 %v2518_v11, %v3191_v53  ;;  %v2520_v63 = vpop.eup %2519  ;;  %2531 = vrcp.f32 %v3350_v41 }
 0x2de   : > { %v717_v17 = vadd.f32 %v716_v31, %v715_v55  ;;  %v2522_v29 = vpop.eup %2521  ;;  %v722_v57 = vsel %vm358_vm2, %v3402_v25, 0.0  ;;  %v3413_v55 = vmul.f32 %v2520_v63, %v3182_v42  ;;  %2533 = vrcp.f32 %v598_v39 }
 0x2df   : > { %v724_v45 = vsel %vm358_vm2, %v3405_v30, 0.0  ;;  %v3416_v0 = vmul.f32 %v2522_v29, %v3209_v28  ;;  %v604_v53 = vpop.xlane.xlu1 %603  ;;  %2535 = vrcp.f32 %v601_v59 }
 0x2e0   : > { %v719_v50 = vadd.f32 %v718_v49, %v717_v17  ;;  %v2524_v49 = vpop.eup %2523  ;;  %v726_v11 = vsel %vm358_vm2, %v3413_v55, 0.0  ;;  %2537 = vrcp.f32 %v604_v53 }
 0x2e1   : > { %v2526_v52 = vpop.eup %2525  ;;  %v728_v17 = vsel %vm358_vm2, %v3416_v0, 0.0  ;;  %v3425_v42 = vmul.f32 %v2524_v49, %v3200_v62 }
 0x2e2   : > { %v721_v21 = vadd.f32 %v720_v56, %v719_v50  ;;  %v607_v9 = vpop.xlane.xlu2 %606  ;;  %v3428_v28 = vmul.f32 %v2526_v52, %v3227_v33  ;;  %v2528_v4 = vpop.eup %2527 }
 0x2e3   : > { %v2530_v32 = vpop.eup %2529  ;;  %v730_v63 = vsel %vm358_vm2, %v3425_v42, 0.0  ;;  %v3435_v62 = vmul.f32 %v2528_v4, %v3218_v35  ;;  %2539 = vrcp.f32 %v607_v9 }
 0x2e4   : > { %v723_v31 = vadd.f32 %v722_v57, %v721_v21  ;;  %v732_v29 = vsel %vm358_vm2, %v3428_v28, 0.0  ;;  %v2532_v57 = vpop.eup %2531  ;;  %v3438_v33 = vmul.f32 %v2530_v32, %v3235_v37 }
 0x2e5   : > { %v2534_v49 = vpop.eup %2533  ;;  %v734_v52 = vsel %vm358_vm2, %v3435_v62, 0.0 }
 0x2e6   : > { %v725_v27 = vadd.f32 %v724_v45, %v723_v31  ;;  %v736_v39 = vsel %vm358_vm2, %v3438_v33, 0.0 }
 0x2e7   : > { %v610_v21 = vpop.xlane.xlu1 %609 }
 0x2e8   : > { %v727_v56 = vadd.f32 %v726_v11, %v725_v27  ;;  %v3441_v27 = vmul.f32 %v2532_v57, %v3243_v36  ;;  %v2536_v11 = vpop.eup %2535  ;;  %2541 = vrcp.f32 %v610_v21 }
 0x2e9   : > { %v3450_v36 = vmul.f32 %v2536_v11, %v3268_v54  ;;  %v2538_v32 = vpop.eup %2537 }
 0x2ea   : > { %v729_v50 = vadd.f32 %v728_v17, %v727_v56  ;;  %v613_v31 = vpop.xlane.xlu2 %612  ;;  %v738_v37 = vsel %vm358_vm2, %v3441_v27, 0.0  ;;  %v3453_v56 = vmul.f32 %v2534_v49, %v3247_v46  ;;  %v3460_v54 = vmul.f32 %v2538_v32, %v3259_v5 }
 0x2eb   : > { %v742_v53 = vsel %vm358_vm2, %v3450_v36, 0.0  ;;  %2543 = vrcp.f32 %v613_v31 }
 0x2ec   : > { %v731_v45 = vadd.f32 %v730_v63, %v729_v50  ;;  %v2540_v63 = vpop.eup %2539  ;;  %v744_v31 = vsel %vm358_vm2, %v3460_v54, 0.0 }
 0x2ed   : > { %v3463_v46 = vmul.f32 %v2540_v63, %v3272_v51 }
 0x2ee   : > { %v733_v41 = vadd.f32 %v732_v29, %v731_v45  ;;  %v740_v29 = vsel %vm358_vm2, %v3453_v56, 0.0  ;;  %v2542_v21 = vpop.eup %2541 }
 0x2f0   : > { %v735_v35 = vadd.f32 %v734_v52, %v733_v41  ;;  %v3466_v41 = vmul.f32 %v2542_v21, %v3280_v1 }
 0x2f1   : > { %v2544_v52 = vpop.eup %2543 }
 0x2f2   : > { %v737_v17 = vadd.f32 %v736_v39, %v735_v35  ;;  %v619_v50 = vpop.xlane.xlu2 %618  ;;  %v746_v39 = vsel %vm358_vm2, %v3463_v46, 0.0  ;;  %v748_v51 = vsel %vm358_vm2, %v3466_v41, 0.0  ;;  %v3475_v1 = vmul.f32 %v2544_v52, %v3282_v23 }
 0x2f4   : > { %v739_v4 = vadd.f32 %v738_v37, %v737_v17 }
 0x2f6   : > { %v741_v57 = vadd.f32 %v740_v29, %v739_v4 }
 0x2f8   : > { %v743_v45 = vadd.f32 %v742_v53, %v741_v57 }
 0x2f9   : > { %v616_v59 = vpop.xlane.xlu1 %615 }
 0x2fa   : > { %2545 = vrcp.f32 %v616_v59  ;;  %v745_v5 = vadd.f32 %v744_v31, %v743_v45 }
 0x2fb   : > { %2547 = vrcp.f32 %v619_v50  ;;  %v750_v50 = vsel %vm358_vm2, %v3475_v1, 0.0 }
 0x2fc   : > { %v747_v35 = vadd.f32 %v746_v39, %v745_v5 }
 0x2fe   : > { %v749_v17 = vadd.f32 %v748_v51, %v747_v35 }
 0x300   : > { %v2546_v59 = vpop.eup %2545 }
 0x301   : > { %v625_v49 = vpop.xlane.xlu2 %624  ;;  %v3478_v37 = vmul.f32 %v2546_v59, %v3301_v38  ;;  %v2548_v4 = vpop.eup %2547 }
 0x302   : > { %v3485_v29 = vmul.f32 %v2548_v4, %v3294_v61 }
 0x303   : > { %v752_v53 = vsel %vm358_vm2, %v3478_v37, 0.0 }
 0x309   : > { %v622_v9 = vpop.xlane.xlu1 %621 }
 0x30a   : > { %2549 = vrcp.f32 %v622_v9  ;;  %v751_v9 = vadd.f32 %v750_v50, %v749_v17 }
 0x30b   : > { %2551 = vrcp.f32 %v625_v49  ;;  %v754_v49 = vsel %vm358_vm2, %v3485_v29, 0.0 }
 0x30c   : > { %v753_v21 = vadd.f32 %v752_v53, %v751_v9 }
 0x30e   : > { %v755_v39 = vadd.f32 %v754_v49, %v753_v21 }
 0x310   : > { %v2550_v32 = vpop.eup %2549 }
 0x311   : > { %v631_v63 = vpop.xlane.xlu2 %630  ;;  %v3488_v23 = vmul.f32 %v2550_v32, %v3315_v43  ;;  %v2552_v57 = vpop.eup %2551 }
 0x312   : > { %v3495_v61 = vmul.f32 %v2552_v57, %v3308_v2 }
 0x313   : > { %v756_v52 = vsel %vm358_vm2, %v3488_v23, 0.0 }
 0x314   : > { %v757_v5 = vadd.f32 %v756_v52, %v755_v39  ;;  %v758_v17 = vsel %vm358_vm2, %v3495_v61, 0.0 }
 0x316   : > { %v759_v32 = vadd.f32 %v758_v17, %v757_v5 }
 0x319   : > { %v628_v11 = vpop.xlane.xlu1 %627 }
 0x31a   : > { %2553 = vrcp.f32 %v628_v11 }
 0x31b   : > { %2555 = vrcp.f32 %v631_v63 }
 0x320   : > { %v2554_v45 = vpop.eup %2553 }
 0x321   : > { %v637_v31 = vpop.xlane.xlu2 %636  ;;  %v3498_v43 = vmul.f32 %v2554_v45, %v3329_v22  ;;  %v2556_v51 = vpop.eup %2555 }
 0x322   : > { %v705_v2 = vmul.f32 %v2556_v51, %v3322_v24 }
 0x323   : > { %v760_v4 = vsel %vm358_vm2, %v3498_v43, 0.0 }
 0x324   : > { %v761_v63 = vadd.f32 %v760_v4, %v759_v32  ;;  %v762_v9 = vsel %vm358_vm2, %v705_v2, 0.0 }
 0x326   : > { %v763_v57 = vadd.f32 %v762_v9, %v761_v63 }
 0x329   : > { %v634_v38 = vpop.xlane.xlu1 %633 }
 0x32a   : > { %2557 = vrcp.f32 %v634_v38 }
 0x32b   : > { %2559 = vrcp.f32 %v637_v31 }
 0x330   : > { %v2558_v35 = vpop.eup %2557 }
 0x331   : > { %v640_v59 = vpop.xlane.xlu0 %639  ;;  %v706_v22 = vmul.f32 %v2558_v35, %v3341_v58  ;;  %v2560_v50 = vpop.eup %2559 }
 0x332   : > { %2561 = vrcp.f32 %v640_v59  ;;  %v707_v45 = vmul.f32 %v2560_v50, %v3336_v19 }
 0x333   : > { %v764_v38 = vsel %vm358_vm2, %v706_v22, 0.0 }
 0x334   : > { %v765_v31 = vadd.f32 %v764_v38, %v763_v57  ;;  %v766_v58 = vsel %vm358_vm2, %v707_v45, 0.0 }
 0x336   : > { %v767_v59 = vadd.f32 %v766_v58, %v765_v31 }
 0x338   : > { %v2562_v53 = vpop.eup %2561 }
 0x339   : > { %v643_v11 = vpop.xlane.xlu1 %642  ;;  %v708_v49 = vmul.f32 %v2562_v53, %v3346_v60 }
 0x33a   : > { %2563 = vrcp.f32 %v643_v11 }
 0x33b   : > { %v768_v39 = vsel %vm358_vm2, %v708_v49, 0.0 }
 0x33c   : > { %v769_v11 = vadd.f32 %v768_v39, %v767_v59 }
 0x340   : > { %v2564_v21 = vpop.eup %2563 }
 0x341   : > { %v709_v24 = vmul.f32 %v2564_v21, %v3352_v15 }
 0x343   : > { %v770_v5 = vsel %vm358_vm2, %v709_v24, 0.0 }
 0x344   : > { %v771_v17 = vadd.f32 %v770_v5, %v769_v11  ;;  %v831_v11 = vld.sshfl [vmem:[#allocation1] sm:$0xff pattern:$0x73625140] }
 0x349   : > { %v646_v52 = vpop.xlane.xlu2 %645 }
 0x34a   : > { %2565 = vrcp.f32 %v646_v52 }
 0x350   : > { %v2566_v51 = vpop.eup %2565 }
 0x351   : > { %v710_v35 = vmul.f32 %v2566_v51, %v3357_v13 }
 0x353   : > { %v772_v19 = vsel %vm358_vm2, %v710_v35, 0.0 }
 0x354   : > { %v773_v60 = vadd.f32 %v772_v19, %v771_v17  ;;  %v832_v17 = vld.sshfl [vmem:[#allocation1 + $0x8] sm:$0xff pattern:$0x73625140] }
 0x355   : > { %1449 = vst [vmem:[#allocation1] ss:$4 sm:$0xff] %v2987_v3 }
 0x356   : > { %v774_v4 = vrot.slane %v773_v60, 4 }
 0x358   : > { %v775_v32 = vadd.f32 %v774_v4, %v773_v60 }
 0x35a   : > { %v776_v63 = vrot.slane %v775_v32, 2 }
 0x35c   : > { %v777_v50 = vadd.f32 %v776_v63, %v775_v32 }
 0x35e   : > { %v778_v15 = vrot.slane %v777_v50, 1 }
 0x360   : > { %v779_v53 = vadd.f32 %v778_v15, %v777_v50 }
 0x362   : > { %v780_v9 = vadd.f32 1e-06, %v779_v53 }
 0x364   : > { %2567 = vrcp.f32 %v780_v9 }
 0x36a   : > { %v2568_v38 = vpop.eup %2567 }
 0x36b   : > { %v796_v21 = vmul.f32 %v2568_v38, %v3441_v27  ;;  %v797_v57 = vmul.f32 %v2568_v38, %v3453_v56  ;;  %v812_v52 = vmul.f32 %v2568_v38, %v709_v24  ;;  %v813_v31 = vmul.f32 %v2568_v38, %v710_v35 }
 0x36c   : > { %v794_v13 = vmul.f32 %v2568_v38, %v3435_v62  ;;  %v795_v58 = vmul.f32 %v2568_v38, %v3438_v33  ;;  %v810_v5 = vmul.f32 %v2568_v38, %v707_v45  ;;  %v811_v51 = vmul.f32 %v2568_v38, %v708_v49 }
 0x36d   : > { %v821_v39 = vpack.c.bf16 %v797_v57, %v796_v21  ;;  %v829_v59 = vpack.c.bf16 %v813_v31, %v812_v52  ;;  %v792_v27 = vmul.f32 %v2568_v38, %v3425_v42  ;;  %v793_v56 = vmul.f32 %v2568_v38, %v3428_v28 }
 0x36e   : > { %v820_v24 = vpack.c.bf16 %v795_v58, %v794_v13  ;;  %v828_v35 = vpack.c.bf16 %v811_v51, %v810_v5  ;;  %v808_v19 = vmul.f32 %v2568_v38, %v705_v2  ;;  %v809_v62 = vmul.f32 %v2568_v38, %v706_v22 }
 0x36f   : > { %835 = vmatpush.bf16.msrb.mxu0 %v821_v39  ;;  %848 = vmatpush.bf16.msra.mxu2 %v829_v59  ;;  %v790_v33 = vmul.f32 %v2568_v38, %v3413_v55  ;;  %v791_v45 = vmul.f32 %v2568_v38, %v3416_v0  ;;  %v819_v49 = vpack.c.bf16 %v793_v56, %v792_v27 }
 0x370   : > { %v827_v60 = vpack.c.bf16 %v809_v62, %v808_v19  ;;  %v806_v4 = vmul.f32 %v2568_v38, %v3495_v61  ;;  %v807_v32 = vmul.f32 %v2568_v38, %v3498_v43  ;;  %v788_v28 = vmul.f32 %v2568_v38, %v3402_v25 }
 0x371   : > { %v818_v42 = vpack.c.bf16 %v791_v45, %v790_v33  ;;  %v789_v2 = vmul.f32 %v2568_v38, %v3405_v30  ;;  %v804_v22 = vmul.f32 %v2568_v38, %v3485_v29  ;;  %v805_v55 = vmul.f32 %v2568_v38, %v3488_v23 }
 0x372   : > { %v826_v63 = vpack.c.bf16 %v807_v32, %v806_v4  ;;  %v786_v0 = vmul.f32 %v2568_v38, %v3388_v26  ;;  %v787_v61 = vmul.f32 %v2568_v38, %v3393_v48  ;;  %v802_v15 = vmul.f32 %v2568_v38, %v3475_v1 }
 0x373   : > { %836 = vmatpush.bf16.msrb.mxu0 %v820_v24  ;;  %849 = vmatpush.bf16.msra.mxu2 %v828_v35  ;;  %v817_v50 = vpack.c.bf16 %v789_v2, %v788_v28  ;;  %v825_v43 = vpack.c.bf16 %v805_v55, %v804_v22  ;;  %v803_v53 = vmul.f32 %v2568_v38, %v3478_v37  ;;  %v4751_v22 = vld [vmem:[#allocation5_spill] sm:$0xff] }
 0x374   : > { %v816_v25 = vpack.c.bf16 %v787_v61, %v786_v0  ;;  %v784_v30 = vmul.f32 %v2568_v38, %v3374_v44  ;;  %v785_v23 = vmul.f32 %v2568_v38, %v3379_v40  ;;  %v800_v9 = vmul.f32 %v2568_v38, %v3463_v46 }
 0x375   : > { %v824_v29 = vpack.c.bf16 %v803_v53, %v802_v15  ;;  %v801_v26 = vmul.f32 %v2568_v38, %v3466_v41  ;;  %v782_v48 = vmul.f32 %v2568_v38, %v3371_v47  ;;  %v783_v1 = vmul.f32 %v2568_v38, %v3368_v34 }
 0x376   : > { %v815_v21 = vpack.c.bf16 %v785_v23, %v784_v30  ;;  %v798_v57 = vmul.f32 %v2568_v38, %v3450_v36  ;;  %v799_v52 = vmul.f32 %v2568_v38, %v3460_v54 }
 0x377   : > { %837 = vmatpush.bf16.msrb.mxu0 %v819_v49  ;;  %850 = vmatpush.bf16.msra.mxu2 %v827_v60  ;;  %v823_v37 = vpack.c.bf16 %v801_v26, %v800_v9  ;;  %v814_v44 = vpack.c.bf16 %v783_v1, %v782_v48  ;;  %v4754_v1 = vld [vmem:[#allocation8_spill] sm:$0xff] }
 0x378   : > { %v822_v40 = vpack.c.bf16 %v799_v52, %v798_v57 }
 0x37b   : > { %838 = vmatpush.bf16.msrb.mxu0 %v818_v42  ;;  %851 = vmatpush.bf16.msra.mxu2 %v826_v63 }
 0x37f   : > { %839 = vmatpush.bf16.msrb.mxu0 %v817_v50  ;;  %852 = vmatpush.bf16.msra.mxu2 %v825_v43  ;;  %v4752_v43 = vld [vmem:[#allocation6_spill] sm:$0xff] }
 0x383   : > { %840 = vmatpush.bf16.msrb.mxu0 %v816_v25  ;;  %853 = vmatpush.bf16.msra.mxu2 %v824_v29  ;;  %v4753_v29 = vld [vmem:[#allocation7_spill] sm:$0xff] }
 0x387   : > { %841 = vmatpush.bf16.msrb.mxu0 %v815_v21  ;;  %854 = vmatpush.bf16.msra.mxu2 %v823_v37 }
 0x38b   : > { %842 = vmatpush.bf16.msrb.mxu0 %v814_v44  ;;  %855 = vmatpush.bf16.msra.mxu2 %v822_v40  ;;  %v4755_v44 = vld [vmem:[#allocation9_spill] sm:$0xff] }
 0x38e   : > { %843 = vmatmul.bf16.vlgmr.msrb.gmra.mxu0 %v831_v11  ;;  %856 = vmatmul.bf16.vlgmr.msra.gmra.mxu2 %v832_v17 }
 0x40b   : > { %v844_v46 = vpop.f32.mrf.mxu0 }
 0x411   : > { %v857_v41 = vpop.f32.mrf.mxu2 }
 0x412   : > { %v858_v31 = vadd.f32 %v857_v41, %v844_v46 }
 0x413   : > { %v846_v47 = vpop.f32.mrf.mxu0 }
 0x414   : > { %v861_v34 = vmul.f32 %v858_v31, %v858_v31  ;;  %v4756_v47 = vld [vmem:[#allocation10_spill] sm:$0xff] }
 0x416   : > { %v863_v13 = vsel %vm862_vm3, %v861_v34, 0.0 }
 0x417   : > { %v864_v58 = vrot.slane %v863_v13, 4 }
 0x419   : > { %v865_v36 = vadd.f32 %v864_v58, %v863_v13  ;;  %v859_v39 = vpop.f32.mrf.mxu2 }
 0x41a   : > { %v4757_v39 = vld [vmem:[#allocation11_spill] sm:$0xff] }
 0x41b   : > { %v866_v54 = vrot.slane %v865_v36, 2 }
 0x41d   : > { %v867_v38 = vadd.f32 %v866_v54, %v865_v36 }
 0x41f   : > { %v868_v59 = vrot.slane %v867_v38, 1 }
 0x421   : > { %v869_v5 = vadd.f32 %v868_v59, %v867_v38 }
 0x423   : > { %2569 = vrsqrt.f32 %v869_v5  ;;  %vm877_vm4 = vcmp.eq.f32.partialorder %v869_v5, inf  ;;  %v880_v19 = vand.u32 2147483648, %v869_v5  ;;  %vm879_vm5 = vcmp.eq.f32.partialorder %v869_v5, 0.0 }
 0x429   : > { %v2570_v51 = vpop.eup %2569 }
 0x42a   : > { %v871_v27 = vmul.f32 %v2570_v51, %v869_v5 }
 0x42c   : > { %v872_v11 = vmul.f32 %v2570_v51, %v871_v27 }
 0x42e   : > { %v873_v17 = vmul.f32 0.5, %v872_v11 }
 0x430   : > { %v874_v56 = vsub.f32 1.5, %v873_v17 }
 0x432   : > { %v875_v24 = vmul.f32 %v2570_v51, %v874_v56 }
 0x434   : > { %v876_v35 = vmul.f32 %v875_v24, %v869_v5 }
 0x436   : > { %v878_v62 = vsel %vm877_vm4, %v869_v5, %v876_v35 }
 0x437   : > { %v881_v33 = vsel %vm879_vm5, %v880_v19, %v878_v62 }
 0x438   : > { %v882_v45 = vadd.f32 1e-06, %v881_v33 }
 0x43a   : > { %2571 = vrcp.f32 %v882_v45 }
 0x440   : > { %v2572_v49 = vpop.eup %2571 }
 0x441   : > { %v884_v60 = vmul.f32 %v2572_v49, %v858_v31 }
 0x443   : > { %v885_v4 = vpack.c.bf16 %v884_v60, %v884_v60 }
 0x445   : > { %v887_v32 = vsel %vm265_vm0, %v885_v4, 0 }
 0x446   : > { %896 = vmatpush.bf16.msra.mxu3 %v887_v32 }
 0x449   : > { %2359 = vmatmul.msk.bf16.vlgmr.msra.gmra.mxu3 %vm216_vm1, %v2991_v6 }
 0x459   : > { %2360 = vmatmul.msk.bf16.gmra.mxu3 %vm216_vm1, %v2997_v8 }
 0x469   : > { %2361 = vmatmul.msk.bf16.gmra.mxu3 %vm216_vm1, %v3003_v10 }
 0x479   : > { %2362 = vmatmul.msk.bf16.gmra.mxu3 %vm216_vm1, %v3009_v12 }
 0x489   : > { %2363 = vmatmul.msk.bf16.gmra.mxu3 %vm216_vm1, %v3015_v14 }
 0x499   : > { %2364 = vmatmul.msk.bf16.gmra.mxu3 %vm216_vm1, %v3021_v16 }
 0x4a9   : > { %2365 = vmatmul.msk.bf16.gmra.mxu3 %vm216_vm1, %v3027_v18 }
 0x4b9   : > { %2366 = vmatmul.msk.bf16.gmra.mxu3 %vm216_vm1, %v3033_v20 }
 0x4c9   : > { %2367 = vmatmul.msk.bf16.gmra.mxu3 %vm216_vm1, %v2995_v7 }
 0x4cc   : > { %v898_v42 = vpop.f32.mrf.mxu3 }
 0x4cd   : > { %v978_v28 = vsel %vm358_vm2, %v898_v42, -inf }
 0x4ce   : > { %979 = vmax.xlane.f32.xlu0 %v978_v28 }
 0x4d4   : > { %v900_v63 = vpop.f32.mrf.mxu3 }
 0x4d5   : > { %v981_v2 = vsel %vm358_vm2, %v900_v63, -inf }
 0x4d6   : > { %982 = vmax.xlane.f32.xlu1 %v981_v2 }
 0x4d9   : > { %2368 = vmatmul.msk.bf16.gmra.mxu3 %vm216_vm1, %v4751_v22 }
 0x4dc   : > { %v903_v55 = vpop.f32.mrf.mxu3 }
 0x4dd   : > { %v984_v0 = vsel %vm358_vm2, %v903_v55, -inf }
 0x4de   : > { %985 = vmax.xlane.f32.xlu2 %v984_v0 }
 0x4e4   : > { %v3568_v61 = vpop.f32.mrf.mxu3 }
 0x4e5   : > { %v987_v50 = vsel %vm358_vm2, %v3568_v61, -inf }
 0x4e6   : > { %988 = vmax.xlane.f32.xlu0 %v987_v50 }
 0x4e9   : > { %2369 = vmatmul.msk.bf16.gmra.mxu3 %vm216_vm1, %v4752_v43 }
 0x4ec   : > { %v3574_v15 = vpop.f32.mrf.mxu3 }
 0x4ed   : > { %v990_v53 = vsel %vm358_vm2, %v3574_v15, -inf }
 0x4ee   : > { %991 = vmax.xlane.f32.xlu1 %v990_v53 }
 0x4f4   : > { %v3578_v25 = vpop.f32.mrf.mxu3 }
 0x4f5   : > { %v993_v30 = vsel %vm358_vm2, %v3578_v25, -inf }
 0x4f6   : > { %994 = vmax.xlane.f32.xlu2 %v993_v30 }
 0x4f9   : > { %2370 = vmatmul.msk.bf16.gmra.mxu3 %vm216_vm1, %v4753_v29 }
 0x4fc   : > { %v3584_v23 = vpop.f32.mrf.mxu3 }
 0x4fd   : > { %v996_v9 = vsel %vm358_vm2, %v3584_v23, -inf }
 0x4fe   : > { %997 = vmax.xlane.f32.xlu0 %v996_v9 }
 0x504   : > { %v3588_v26 = vpop.f32.mrf.mxu3 }
 0x505   : > { %v999_v48 = vsel %vm358_vm2, %v3588_v26, -inf }
 0x506   : > { %1000 = vmax.xlane.f32.xlu1 %v999_v48 }
 0x509   : > { %2371 = vmatmul.msk.bf16.gmra.mxu3 %vm216_vm1, %v4754_v1 }
 0x50c   : > { %v3594_v21 = vpop.f32.mrf.mxu3 }
 0x50d   : > { %v1002_v37 = vsel %vm358_vm2, %v3594_v21, -inf }
 0x50e   : > { %1003 = vmax.xlane.f32.xlu2 %v1002_v37 }
 0x514   : > { %v3598_v57 = vpop.f32.mrf.mxu3 }
 0x515   : > { %v1005_v52 = vsel %vm358_vm2, %v3598_v57, -inf }
 0x516   : > { %1006 = vmax.xlane.f32.xlu0 %v1005_v52 }
 0x519   : > { %2372 = vmatmul.msk.bf16.gmra.mxu3 %vm216_vm1, %v4755_v44 }
 0x51c   : > { %v3604_v40 = vpop.f32.mrf.mxu3 }
 0x51d   : > { %v1008_v46 = vsel %vm358_vm2, %v3604_v40, -inf }
 0x51e   : > { %1009 = vmax.xlane.f32.xlu1 %v1008_v46 }
 0x524   : > { %v3608_v41 = vpop.f32.mrf.mxu3 }
 0x525   : > { %v1011_v31 = vsel %vm358_vm2, %v3608_v41, -inf }
 0x526   : > { %1012 = vmax.xlane.f32.xlu2 %v1011_v31 }
 0x529   : > { %2373 = vmatmul.msk.bf16.gmra.mxu3 %vm216_vm1, %v4756_v47 }
 0x52c   : > { %v3614_v34 = vpop.f32.mrf.mxu3 }
 0x52d   : > { %v1014_v13 = vsel %vm358_vm2, %v3614_v34, -inf }
 0x52e   : > { %1015 = vmax.xlane.f32.xlu0 %v1014_v13 }
 0x534   : > { %v3618_v58 = vpop.f32.mrf.mxu3 }
 0x535   : > { %v1017_v36 = vsel %vm358_vm2, %v3618_v58, -inf }
 0x536   : > { %1018 = vmax.xlane.f32.xlu1 %v1017_v36 }
 0x539   : > { %2374 = vmatmul.msk.bf16.gmra.mxu3 %vm216_vm1, %v4757_v39 }
 0x53c   : > { %v3624_v54 = vpop.f32.mrf.mxu3 }
 0x53d   : > { %v1020_v38 = vsel %vm358_vm2, %v3624_v54, -inf }
 0x53e   : > { %1021 = vmax.xlane.f32.xlu2 %v1020_v38 }
 0x541   : > { %v980_v59 = vpop.xlane.xlu0 %979 }
 0x542   : > { %v1074_v5 = vsub.f32 %v898_v42, %v980_v59 }
 0x544   : > { %v3628_v51 = vpop.f32.mrf.mxu3  ;;  %v1106_v11 = vmul.f32 1.442695, %v1074_v5 }
 0x545   : > { %v1023_v27 = vsel %vm358_vm2, %v3628_v51, -inf }
 0x546   : > { %1024 = vmax.xlane.f32.xlu0 %v1023_v27  ;;  %2573 = vpow2.f32 %v1106_v11 }
 0x549   : > { %v983_v17 = vpop.xlane.xlu1 %982 }
 0x54a   : > { %v1075_v56 = vsub.f32 %v900_v63, %v983_v17 }
 0x54c   : > { %v3632_v24 = vpop.f32.mrf.mxu3  ;;  %v1108_v19 = vmul.f32 1.442695, %v1075_v56  ;;  %v3636_v33 = vpop.eup %2573 }
 0x54d   : > { %v1026_v35 = vsel %vm358_vm2, %v3632_v24, -inf  ;;  %v1170_v4 = vsel %vm358_vm2, %v3636_v33, 0.0 }
 0x54e   : > { %1027 = vmax.xlane.f32.xlu1 %v1026_v35  ;;  %2575 = vpow2.f32 %v1108_v19 }
 0x551   : > { %v986_v62 = vpop.xlane.xlu2 %985 }
 0x552   : > { %v1076_v45 = vsub.f32 %v903_v55, %v986_v62 }
 0x554   : > { %v1110_v49 = vmul.f32 1.442695, %v1076_v45  ;;  %v3638_v60 = vpop.f32.mrf.mxu3  ;;  %v3644_v28 = vpop.eup %2575 }
 0x555   : > { %v1029_v32 = vsel %vm358_vm2, %v3638_v60, -inf  ;;  %v1173_v53 = vsel %vm358_vm2, %v3644_v28, 0.0 }
 0x556   : > { %2577 = vpow2.f32 %v1110_v49  ;;  %1171 = vadd.xlane.f32.xlu1 %v1170_v4  ;;  %1030 = vmax.xlane.f32.xlu2 %v1029_v32 }
 0x559   : > { %v989_v42 = vpop.xlane.xlu0 %988 }
 0x55a   : > { %v1077_v63 = vsub.f32 %v3568_v61, %v989_v42 }
 0x55c   : > { %v3647_v2 = vpop.eup %2577  ;;  %v1112_v55 = vmul.f32 1.442695, %v1077_v63  ;;  %v3649_v0 = vpop.f32.mrf.mxu3 }
 0x55d   : > { %v1176_v50 = vsel %vm358_vm2, %v3647_v2, 0.0  ;;  %v1032_v30 = vsel %vm358_vm2, %v3649_v0, -inf }
 0x55e   : > { %2579 = vpow2.f32 %v1112_v55  ;;  %1177 = vadd.xlane.f32.xlu1 %v1176_v50  ;;  %1174 = vadd.xlane.f32.xlu2 %v1173_v53 }
 0x55f   : > { %1033 = vmax.xlane.f32.xlu0 %v1032_v30 }
 0x561   : > { %v992_v9 = vpop.xlane.xlu1 %991 }
 0x562   : > { %v1078_v48 = vsub.f32 %v3574_v15, %v992_v9 }
 0x564   : > { %v3657_v61 = vpop.eup %2579  ;;  %v3660_v37 = vpop.f32.mrf.mxu3  ;;  %v1114_v31 = vmul.f32 1.442695, %v1078_v48 }
 0x565   : > { %v1179_v52 = vsel %vm358_vm2, %v3657_v61, 0.0  ;;  %v1035_v46 = vsel %vm358_vm2, %v3660_v37, -inf }
 0x566   : > { %1036 = vmax.xlane.f32.xlu1 %v1035_v46  ;;  %2581 = vpow2.f32 %v1114_v31 }
 0x567   : > { %1180 = vadd.xlane.f32.xlu0 %v1179_v52 }
 0x569   : > { %v995_v13 = vpop.xlane.xlu2 %994 }
 0x56a   : > { %v1079_v36 = vsub.f32 %v3578_v25, %v995_v13 }
 0x56c   : > { %v1116_v38 = vmul.f32 1.442695, %v1079_v36  ;;  %v3667_v59 = vpop.f32.mrf.mxu3  ;;  %v3671_v27 = vpop.eup %2581 }
 0x56d   : > { %v1038_v15 = vsel %vm358_vm2, %v3667_v59, -inf  ;;  %v1182_v19 = vsel %vm358_vm2, %v3671_v27, 0.0 }
 0x56e   : > { %2583 = vpow2.f32 %v1116_v38  ;;  %1039 = vmax.xlane.f32.xlu2 %v1038_v15 }
 0x571   : > { %v998_v5 = vpop.xlane.xlu0 %997 }
 0x572   : > { %v1080_v11 = vsub.f32 %v3584_v23, %v998_v5 }
 0x574   : > { %v3674_v17 = vpop.eup %2583  ;;  %v1118_v56 = vmul.f32 1.442695, %v1080_v11  ;;  %v3676_v35 = vpop.f32.mrf.mxu3 }
 0x575   : > { %v1185_v25 = vsel %vm358_vm2, %v3674_v17, 0.0  ;;  %v1041_v62 = vsel %vm358_vm2, %v3676_v35, -inf }
 0x576   : > { %2585 = vpow2.f32 %v1118_v56  ;;  %1186 = vadd.xlane.f32.xlu1 %v1185_v25  ;;  %1183 = vadd.xlane.f32.xlu2 %v1182_v19 }
 0x577   : > { %1042 = vmax.xlane.f32.xlu0 %v1041_v62 }
 0x579   : > { %v1001_v45 = vpop.xlane.xlu1 %1000 }
 0x57a   : > { %v1081_v23 = vsub.f32 %v3588_v26, %v1001_v45 }
 0x57c   : > { %v3685_v49 = vpop.eup %2585  ;;  %v1120_v4 = vmul.f32 1.442695, %v1081_v23  ;;  %v3687_v32 = vpop.f32.mrf.mxu3 }
 0x57d   : > { %v1188_v42 = vsel %vm358_vm2, %v3685_v49, 0.0  ;;  %v1044_v63 = vsel %vm358_vm2, %v3687_v32, -inf }
 0x57e   : > { %2587 = vpow2.f32 %v1120_v4  ;;  %1189 = vadd.xlane.f32.xlu2 %v1188_v42  ;;  %1045 = vmax.xlane.f32.xlu1 %v1044_v63 }
 0x581   : > { %v1004_v55 = vpop.xlane.xlu2 %1003 }
 0x582   : > { %v1082_v50 = vsub.f32 %v3594_v21, %v1004_v55 }
 0x584   : > { %v3694_v53 = vpop.eup %2587  ;;  %v1122_v26 = vmul.f32 1.442695, %v1082_v50  ;;  %v3696_v30 = vpop.f32.mrf.mxu3 }
 0x585   : > { %v1191_v9 = vsel %vm358_vm2, %v3694_v53, 0.0  ;;  %v1047_v48 = vsel %vm358_vm2, %v3696_v30, -inf }
 0x586   : > { %2589 = vpow2.f32 %v1122_v26  ;;  %1192 = vadd.xlane.f32.xlu0 %v1191_v9  ;;  %1048 = vmax.xlane.f32.xlu2 %v1047_v48 }
 0x589   : > { %v1007_v52 = vpop.xlane.xlu0 %1006 }
 0x58a   : > { %v1083_v46 = vsub.f32 %v3598_v57, %v1007_v52 }
 0x58c   : > { %v3703_v31 = vpop.eup %2589  ;;  %v1124_v21 = vmul.f32 1.442695, %v1083_v46  ;;  %v3705_v13 = vpop.f32.mrf.mxu3 }
 0x58d   : > { %v1194_v36 = vsel %vm358_vm2, %v3703_v31, 0.0  ;;  %v1050_v38 = vsel %vm358_vm2, %v3705_v13, -inf }
 0x58e   : > { %2591 = vpow2.f32 %v1124_v21  ;;  %1195 = vadd.xlane.f32.xlu1 %v1194_v36  ;;  %1051 = vmax.xlane.f32.xlu0 %v1050_v38 }
 0x591   : > { %v1010_v15 = vpop.xlane.xlu1 %1009 }
 0x592   : > { %v1084_v5 = vsub.f32 %v3604_v40, %v1010_v15 }
 0x594   : > { %v3712_v11 = vpop.eup %2591  ;;  %v1126_v57 = vmul.f32 1.442695, %v1084_v5  ;;  %v3714_v56 = vpop.f32.mrf.mxu3 }
 0x595   : > { %v1197_v25 = vsel %vm358_vm2, %v3712_v11, 0.0  ;;  %v1053_v19 = vsel %vm358_vm2, %v3714_v56, -inf }
 0x596   : > { %2593 = vpow2.f32 %v1126_v57  ;;  %1198 = vadd.xlane.f32.xlu2 %v1197_v25  ;;  %1054 = vmax.xlane.f32.xlu1 %v1053_v19 }
 0x599   : > { %v1013_v9 = vpop.xlane.xlu2 %1012 }
 0x59a   : > { %v1085_v52 = vsub.f32 %v3608_v41, %v1013_v9 }
 0x59c   : > { %v3720_v62 = vpop.eup %2593  ;;  %v3722_v45 = vpop.f32.mrf.mxu3  ;;  %v1128_v36 = vmul.f32 1.442695, %v1085_v52 }
 0x59d   : > { %v1200_v40 = vsel %vm358_vm2, %v3720_v62, 0.0  ;;  %v1056_v23 = vsel %vm358_vm2, %v3722_v45, -inf }
 0x59e   : > { %1201 = vadd.xlane.f32.xlu0 %v1200_v40  ;;  %1057 = vmax.xlane.f32.xlu2 %v1056_v23 }
 0x5a1   : > { %v1016_v63 = vpop.xlane.xlu0 %1015 }
 0x5a2   : > { %v1086_v55 = vsub.f32 %v3614_v34, %v1016_v63 }
 0x5a4   : > { %v3728_v4 = vpop.f32.mrf.mxu3  ;;  %v1130_v48 = vmul.f32 1.442695, %v1086_v55 }
 0x5a5   : > { %v1059_v42 = vsel %vm358_vm2, %v3728_v4, -inf }
 0x5a6   : > { %1060 = vmax.xlane.f32.xlu0 %v1059_v42  ;;  %2595 = vpow2.f32 %v1130_v48 }
 0x5a7   : > { %2597 = vpow2.f32 %v1128_v36 }
 0x5a9   : > { %v1019_v38 = vpop.xlane.xlu1 %1018 }
 0x5aa   : > { %v1087_v40 = vsub.f32 %v3618_v58, %v1019_v38 }
 0x5ac   : > { %v3733_v50 = vpop.f32.mrf.mxu3  ;;  %v3742_v5 = vpop.eup %2595 }
 0x5ad   : > { %v1062_v26 = vsel %vm358_vm2, %v3733_v50, -inf  ;;  %v1206_v23 = vsel %vm358_vm2, %v3742_v5, 0.0  ;;  %v3753_v55 = vpop.eup %2597 }
 0x5ae   : > { %1063 = vmax.xlane.f32.xlu0 %v1062_v26  ;;  %v1203_v58 = vsel %vm358_vm2, %v3753_v55, 0.0 }
 0x5b1   : > { %v1022_v34 = vpop.xlane.xlu2 %1021 }
 0x5b2   : > { %v1088_v25 = vsub.f32 %v3624_v54, %v1022_v34 }
 0x5b4   : > { %v3738_v46 = vpop.f32.mrf.mxu3  ;;  %v1134_v63 = vmul.f32 1.442695, %v1088_v25 }
 0x5b5   : > { %v1065_v21 = vsel %vm358_vm2, %v3738_v46, -inf }
 0x5b6   : > { %1066 = vmax.xlane.f32.xlu2 %v1065_v21 }
 0x5b9   : > { %v1025_v15 = vpop.xlane.xlu0 %1024 }
 0x5ba   : > { %v1089_v57 = vsub.f32 %v3628_v51, %v1025_v15  ;;  %v1132_v51 = vmul.f32 1.442695, %v1087_v40 }
 0x5bc   : > { %v1136_v19 = vmul.f32 1.442695, %v1089_v57  ;;  %v3746_v41 = vpop.f32.mrf.mxu3 }
 0x5bd   : > { %v1068_v42 = vsel %vm358_vm2, %v3746_v41, -inf }
 0x5be   : > { %2599 = vpow2.f32 %v1136_v19  ;;  %1207 = vadd.xlane.f32.xlu2 %v1206_v23  ;;  %1069 = vmax.xlane.f32.xlu1 %v1068_v42 }
 0x5bf   : > { %2601 = vpow2.f32 %v1134_v63 }
 0x5c0   : > { %2603 = vpow2.f32 %v1132_v51 }
 0x5c1   : > { %v1028_v26 = vpop.xlane.xlu1 %1027 }
 0x5c2   : > { %v1090_v48 = vsub.f32 %v3632_v24, %v1028_v26 }
 0x5c4   : > { %v3755_v54 = vpop.eup %2599  ;;  %v3757_v9 = vpop.f32.mrf.mxu3  ;;  %v1138_v36 = vmul.f32 1.442695, %v1090_v48 }
 0x5c5   : > { %v1215_v52 = vsel %vm358_vm2, %v3755_v54, 0.0  ;;  %v1071_v21 = vsel %vm358_vm2, %v3757_v9, -inf  ;;  %v3768_v15 = vpop.eup %2601 }
 0x5c6   : > { %1216 = vadd.xlane.f32.xlu2 %v1215_v52  ;;  %1204 = vadd.xlane.f32.xlu1 %v1203_v58  ;;  %v3771_v25 = vpop.eup %2603  ;;  %2605 = vpow2.f32 %v1138_v36  ;;  %v1212_v19 = vsel %vm358_vm2, %v3768_v15, 0.0 }
 0x5c7   : > { %1072 = vmax.xlane.f32.xlu0 %v1071_v21  ;;  %v1209_v40 = vsel %vm358_vm2, %v3771_v25, 0.0 }
 0x5c9   : > { %v3766_v38 = vpop.xlane.xlu1 %1171  ;;  %v1031_v34 = vpop.xlane.xlu2 %1030 }
 0x5ca   : > { %v1091_v57 = vsub.f32 %v3638_v60, %v1031_v34 }
 0x5cc   : > { %v1140_v24 = vmul.f32 1.442695, %v1091_v57  ;;  %v3779_v63 = vpop.eup %2605 }
 0x5cd   : > { %v1218_v48 = vsel %vm358_vm2, %v3779_v63, 0.0 }
 0x5ce   : > { %2607 = vpow2.f32 %v1140_v24  ;;  %1213 = vadd.xlane.f32.xlu1 %v1212_v19 }
 0x5cf   : > { %1210 = vadd.xlane.f32.xlu0 %v1209_v40 }
 0x5d1   : > { %v3777_v23 = vpop.xlane.xlu1 %1177  ;;  %v3788_v52 = vpop.xlane.xlu2 %1174 }
 0x5d2   : > { %v1034_v42 = vpop.xlane.xlu0 %1033 }
 0x5d3   : > { %v1092_v60 = vsub.f32 %v3649_v0, %v1034_v42 }
 0x5d4   : > { %v3782_v51 = vpop.eup %2607 }
 0x5d5   : > { %v1142_v26 = vmul.f32 1.442695, %v1092_v60  ;;  %v1221_v58 = vsel %vm358_vm2, %v3782_v51, 0.0 }
 0x5d6   : > { %1222 = vadd.xlane.f32.xlu1 %v1221_v58 }
 0x5d7   : > { %2609 = vpow2.f32 %v1142_v26  ;;  %1219 = vadd.xlane.f32.xlu0 %v1218_v48 }
 0x5d9   : > { %v1037_v21 = vpop.xlane.xlu1 %1036 }
 0x5da   : > { %v1093_v36 = vsub.f32 %v3660_v37, %v1037_v21  ;;  %v3795_v19 = vpop.xlane.xlu0 %1180 }
 0x5dc   : > { %v1144_v34 = vmul.f32 1.442695, %v1093_v36 }
 0x5dd   : > { %v3791_v57 = vpop.eup %2609 }
 0x5de   : > { %2611 = vpow2.f32 %v1144_v34  ;;  %v1224_v0 = vsel %vm358_vm2, %v3791_v57, 0.0 }
 0x5df   : > { %1225 = vadd.xlane.f32.xlu2 %v1224_v0 }
 0x5e1   : > { %v1040_v24 = vpop.xlane.xlu2 %1039 }
 0x5e2   : > { %v1094_v40 = vsub.f32 %v3667_v59, %v1040_v24 }
 0x5e4   : > { %v3798_v42 = vpop.eup %2611  ;;  %v1146_v60 = vmul.f32 1.442695, %v1094_v40 }
 0x5e5   : > { %v1227_v26 = vsel %vm358_vm2, %v3798_v42, 0.0 }
 0x5e6   : > { %2613 = vpow2.f32 %v1146_v60  ;;  %1228 = vadd.xlane.f32.xlu0 %v1227_v26 }
 0x5e9   : > { %v3802_v37 = vpop.xlane.xlu1 %1186  ;;  %v3804_v58 = vpop.xlane.xlu2 %1183 }
 0x5ea   : > { %v1043_v48 = vpop.xlane.xlu0 %1042 }
 0x5eb   : > { %v1095_v21 = vsub.f32 %v3676_v35, %v1043_v48 }
 0x5ec   : > { %v3807_v36 = vpop.eup %2613 }
 0x5ed   : > { %v1148_v34 = vmul.f32 1.442695, %v1095_v21  ;;  %v1230_v59 = vsel %vm358_vm2, %v3807_v36, 0.0 }
 0x5ee   : > { %1231 = vadd.xlane.f32.xlu1 %v1230_v59 }
 0x5ef   : > { %2615 = vpow2.f32 %v1148_v34 }
 0x5f1   : > { %v3811_v0 = vpop.xlane.xlu2 %1189  ;;  %v1046_v24 = vpop.xlane.xlu1 %1045 }
 0x5f2   : > { %v1096_v40 = vsub.f32 %v3687_v32, %v1046_v24 }
 0x5f4   : > { %v1150_v60 = vmul.f32 1.442695, %v1096_v40 }
 0x5f5   : > { %v3814_v26 = vpop.eup %2615 }
 0x5f6   : > { %2617 = vpow2.f32 %v1150_v60  ;;  %v1233_v35 = vsel %vm358_vm2, %v3814_v26, 0.0 }
 0x5f7   : > { %1234 = vadd.xlane.f32.xlu2 %v1233_v35 }
 0x5f9   : > { %v3818_v48 = vpop.xlane.xlu0 %1192  ;;  %v1049_v21 = vpop.xlane.xlu2 %1048 }
 0x5fa   : > { %v1097_v39 = vsub.f32 %v3696_v30, %v1049_v21 }
 0x5fc   : > { %v3821_v59 = vpop.eup %2617  ;;  %v1152_v34 = vmul.f32 1.442695, %v1097_v39 }
 0x5fd   : > { %v1236_v47 = vsel %vm358_vm2, %v3821_v59, 0.0 }
 0x5fe   : > { %2619 = vpow2.f32 %v1152_v34  ;;  %1237 = vadd.xlane.f32.xlu0 %v1236_v47 }
 0x601   : > { %v3825_v32 = vpop.xlane.xlu1 %1195  ;;  %v1052_v24 = vpop.xlane.xlu0 %1051 }
 0x602   : > { %v1098_v40 = vsub.f32 %v3705_v13, %v1052_v24 }
 0x604   : > { %v3828_v60 = vpop.eup %2619  ;;  %v1154_v35 = vmul.f32 1.442695, %v1098_v40 }
 0x605   : > { %v1239_v44 = vsel %vm358_vm2, %v3828_v60, 0.0 }
 0x606   : > { %2621 = vpow2.f32 %v1154_v35  ;;  %1240 = vadd.xlane.f32.xlu1 %v1239_v44 }
 0x609   : > { %v3832_v30 = vpop.xlane.xlu2 %1198  ;;  %v1055_v39 = vpop.xlane.xlu1 %1054 }
 0x60a   : > { %v1099_v21 = vsub.f32 %v3714_v56, %v1055_v39 }
 0x60c   : > { %v3835_v34 = vpop.eup %2621  ;;  %v1156_v47 = vmul.f32 1.442695, %v1099_v21 }
 0x60d   : > { %v1242_v1 = vsel %vm358_vm2, %v3835_v34, 0.0 }
 0x60e   : > { %2623 = vpow2.f32 %v1156_v47  ;;  %1243 = vadd.xlane.f32.xlu2 %v1242_v1 }
 0x611   : > { %v3839_v13 = vpop.xlane.xlu0 %1201  ;;  %v1058_v24 = vpop.xlane.xlu2 %1057 }
 0x612   : > { %v1100_v40 = vsub.f32 %v3722_v45, %v1058_v24 }
 0x614   : > { %v3842_v35 = vpop.eup %2623  ;;  %v1158_v44 = vmul.f32 1.442695, %v1100_v40 }
 0x615   : > { %v1245_v29 = vsel %vm358_vm2, %v3842_v35, 0.0 }
 0x616   : > { %2625 = vpow2.f32 %v1158_v44  ;;  %1246 = vadd.xlane.f32.xlu0 %v1245_v29 }
 0x619   : > { %v1061_v56 = vpop.xlane.xlu0 %1060 }
 0x61a   : > { %v1101_v39 = vsub.f32 %v3728_v4, %v1061_v56 }
 0x61c   : > { %v3847_v21 = vpop.eup %2625  ;;  %v1160_v47 = vmul.f32 1.442695, %v1101_v39 }
 0x61d   : > { %v1248_v1 = vsel %vm358_vm2, %v3847_v21, 0.0 }
 0x61e   : > { %2627 = vpow2.f32 %v1160_v47  ;;  %1249 = vadd.xlane.f32.xlu1 %v1248_v1 }
 0x621   : > { %v1064_v45 = vpop.xlane.xlu0 %1063 }
 0x622   : > { %v1102_v24 = vsub.f32 %v3733_v50, %v1064_v45 }
 0x624   : > { %v3852_v40 = vpop.eup %2627  ;;  %v1162_v43 = vmul.f32 1.442695, %v1102_v24 }
 0x625   : > { %v1251_v29 = vsel %vm358_vm2, %v3852_v40, 0.0 }
 0x626   : > { %2629 = vpow2.f32 %v1162_v43  ;;  %1252 = vadd.xlane.f32.xlu2 %v1251_v29 }
 0x629   : > { %v1067_v4 = vpop.xlane.xlu2 %1066 }
 0x62a   : > { %v1103_v44 = vsub.f32 %v3738_v46, %v1067_v4 }
 0x62c   : > { %v3857_v56 = vpop.eup %2629  ;;  %v1164_v39 = vmul.f32 1.442695, %v1103_v44 }
 0x62d   : > { %v1254_v47 = vsel %vm358_vm2, %v3857_v56, 0.0 }
 0x62e   : > { %2631 = vpow2.f32 %v1164_v39  ;;  %1255 = vadd.xlane.f32.xlu0 %v1254_v47 }
 0x631   : > { %v1070_v50 = vpop.xlane.xlu1 %1069 }
 0x632   : > { %v1104_v1 = vsub.f32 %v3746_v41, %v1070_v50 }
 0x634   : > { %v3862_v45 = vpop.eup %2631  ;;  %v1166_v24 = vmul.f32 1.442695, %v1104_v1 }
 0x635   : > { %v1257_v43 = vsel %vm358_vm2, %v3862_v45, 0.0 }
 0x636   : > { %2633 = vpow2.f32 %v1166_v24  ;;  %1258 = vadd.xlane.f32.xlu1 %v1257_v43 }
 0x63a   : > { %v1073_v46 = vpop.xlane.xlu0 %1072 }
 0x63b   : > { %v1105_v29 = vsub.f32 %v3757_v9, %v1073_v46 }
 0x63c   : > { %v3867_v4 = vpop.eup %2633 }
 0x63d   : > { %v1168_v44 = vmul.f32 1.442695, %v1105_v29  ;;  %v1260_v39 = vsel %vm358_vm2, %v3867_v4, 0.0 }
 0x63e   : > { %1261 = vadd.xlane.f32.xlu2 %v1260_v39 }
 0x63f   : > { %2635 = vpow2.f32 %v1168_v44 }
 0x640   : > { %2637 = vrcp.f32 %v3788_v52 }
 0x641   : > { %2639 = vrcp.f32 %v3766_v38  ;;  %v1205_v38 = vpop.xlane.xlu1 %1204 }
 0x642   : > { %2641 = vrcp.f32 %v3777_v23 }
 0x643   : > { %2643 = vrcp.f32 %v3795_v19 }
 0x644   : > { %2645 = vrcp.f32 %v3804_v58 }
 0x645   : > { %v3871_v41 = vpop.eup %2635  ;;  %2647 = vrcp.f32 %v3802_v37  ;;  %v1208_v37 = vpop.xlane.xlu2 %1207 }
 0x646   : > { %v1263_v47 = vsel %vm358_vm2, %v3871_v41, 0.0  ;;  %v2638_v9 = vpop.eup %2637  ;;  %2649 = vrcp.f32 %v3811_v0 }
 0x647   : > { %1264 = vadd.xlane.f32.xlu0 %v1263_v47  ;;  %v2640_v50 = vpop.eup %2639  ;;  %v3881_v1 = vmul.f32 %v2638_v9, %v3644_v28  ;;  %2651 = vrcp.f32 %v3818_v48  ;;  %v1211_v48 = vpop.xlane.xlu0 %1210 }
 0x648   : > { %v2642_v24 = vpop.eup %2641  ;;  %v3884_v43 = vmul.f32 %v2640_v50, %v3636_v33  ;;  %2653 = vrcp.f32 %v3825_v32 }
 0x649   : > { %v2644_v46 = vpop.eup %2643  ;;  %v1331_v52 = vsel %vm358_vm2, %v3881_v1, 0.0  ;;  %v3893_v28 = vmul.f32 %v2642_v24, %v3647_v2  ;;  %2655 = vrcp.f32 %v3832_v30  ;;  %v1214_v24 = vpop.xlane.xlu1 %1213 }
 0x64a   : > { %v2646_v23 = vpop.eup %2645  ;;  %v1330_v19 = vsel %vm358_vm2, %v3884_v43, 0.0  ;;  %v3896_v58 = vmul.f32 %v2644_v46, %v3657_v61  ;;  %2657 = vrcp.f32 %v3839_v13 }
 0x64b   : > { %v1332_v33 = vadd.f32 %v1331_v52, %v1330_v19  ;;  %v3900_v29 = vmul.f32 %v2646_v23, %v3671_v27  ;;  %v2648_v44 = vpop.eup %2647  ;;  %v1333_v0 = vsel %vm358_vm2, %v3893_v28, 0.0  ;;  %2659 = vrcp.f32 %v1205_v38 }
 0x64c   : > { %v1335_v2 = vsel %vm358_vm2, %v3896_v58, 0.0  ;;  %v2650_v39 = vpop.eup %2649  ;;  %v3912_v32 = vmul.f32 %v2648_v44, %v3674_v17  ;;  %2661 = vrcp.f32 %v1208_v37 }
 0x64d   : > { %v1334_v47 = vadd.f32 %v1333_v0, %v1332_v33  ;;  %v1337_v61 = vsel %vm358_vm2, %v3900_v29, 0.0  ;;  %v2652_v27 = vpop.eup %2651  ;;  %v3915_v50 = vmul.f32 %v2650_v39, %v3685_v49  ;;  %v1217_v44 = vpop.xlane.xlu2 %1216  ;;  %2663 = vrcp.f32 %v1211_v48 }
 0x64e   : > { %v2654_v46 = vpop.eup %2653  ;;  %v3918_v30 = vmul.f32 %v2652_v27, %v3694_v53  ;;  %v1339_v19 = vsel %vm358_vm2, %v3912_v32, 0.0  ;;  %2665 = vrcp.f32 %v1214_v24 }
 0x64f   : > { %v1336_v9 = vadd.f32 %v1335_v2, %v1334_v47  ;;  %v2656_v23 = vpop.eup %2655  ;;  %v1341_v13 = vsel %vm358_vm2, %v3915_v50, 0.0  ;;  %v3925_v17 = vmul.f32 %v2654_v46, %v3703_v31  ;;  %v1220_v31 = vpop.xlane.xlu0 %1219  ;;  %2667 = vrcp.f32 %v1217_v44 }
 0x650   : > { %v2658_v33 = vpop.eup %2657  ;;  %v1343_v0 = vsel %vm358_vm2, %v3918_v30, 0.0  ;;  %v3930_v38 = vmul.f32 %v2656_v23, %v3712_v11  ;;  %2669 = vrcp.f32 %v1220_v31 }
 0x651   : > { %v1338_v52 = vadd.f32 %v1337_v61, %v1336_v9  ;;  %v2660_v53 = vpop.eup %2659  ;;  %v1345_v39 = vsel %vm358_vm2, %v3925_v17, 0.0  ;;  %v3935_v47 = vmul.f32 %v2658_v33, %v3720_v62  ;;  %v1223_v11 = vpop.xlane.xlu1 %1222 }
 0x652   : > { %v1347_v27 = vsel %vm358_vm2, %v3930_v38, 0.0  ;;  %v3940_v9 = vmul.f32 %v2660_v53, %v3753_v55  ;;  %v2662_v37 = vpop.eup %2661  ;;  %2671 = vrcp.f32 %v1223_v11 }
 0x653   : > { %v1340_v49 = vadd.f32 %v1339_v19, %v1338_v52  ;;  %v1349_v48 = vsel %vm358_vm2, %v3935_v47, 0.0  ;;  %v2664_v52 = vpop.eup %2663  ;;  %v3947_v33 = vmul.f32 %v2662_v37, %v3742_v5 }
 0x654   : > { %v1351_v62 = vsel %vm358_vm2, %v3940_v9, 0.0  ;;  %v3950_v55 = vmul.f32 %v2664_v52, %v3771_v25 }
 0x655   : > { %v1342_v2 = vadd.f32 %v1341_v13, %v1340_v49  ;;  %v1226_v19 = vpop.xlane.xlu2 %1225  ;;  %v1353_v24 = vsel %vm358_vm2, %v3947_v33, 0.0 }
 0x656   : > { %2673 = vrcp.f32 %v1226_v19 }
 0x657   : > { %v1344_v61 = vadd.f32 %v1343_v0, %v1342_v2  ;;  %v2666_v2 = vpop.eup %2665 }
 0x658   : > { %v3957_v5 = vmul.f32 %v2666_v2, %v3768_v15 }
 0x659   : > { %v1346_v46 = vadd.f32 %v1345_v39, %v1344_v61  ;;  %v1229_v49 = vpop.xlane.xlu0 %1228  ;;  %v1355_v39 = vsel %vm358_vm2, %v3950_v55, 0.0 }
 0x65a   : > { %2675 = vrcp.f32 %v1229_v49 }
 0x65b   : > { %v1348_v23 = vadd.f32 %v1347_v27, %v1346_v46  ;;  %v2668_v46 = vpop.eup %2667 }
 0x65c   : > { %v2670_v25 = vpop.eup %2669  ;;  %v3963_v52 = vmul.f32 %v2668_v46, %v3755_v54 }
 0x65d   : > { %v1350_v13 = vadd.f32 %v1349_v48, %v1348_v23  ;;  %v3960_v31 = vmul.f32 %v2670_v25, %v3779_v63  ;;  %v1357_v23 = vsel %vm358_vm2, %v3957_v5, 0.0 }
 0x65e   : > { %v1359_v63 = vsel %vm358_vm2, %v3963_v52, 0.0 }
 0x65f   : > { %v1352_v0 = vadd.f32 %v1351_v62, %v1350_v13  ;;  %v2672_v62 = vpop.eup %2671  ;;  %v1361_v19 = vsel %vm358_vm2, %v3960_v31, 0.0 }
 0x660   : > { %v2674_v15 = vpop.eup %2673  ;;  %v3972_v54 = vmul.f32 %v2672_v62, %v3782_v51 }
 0x661   : > { %v1232_v53 = vpop.xlane.xlu1 %1231  ;;  %v1354_v27 = vadd.f32 %v1353_v24, %v1352_v0  ;;  %v2676_v49 = vpop.eup %2675  ;;  %v3975_v2 = vmul.f32 %v2674_v15, %v3791_v57 }
 0x662   : > { %2677 = vrcp.f32 %v1232_v53  ;;  %v1363_v25 = vsel %vm358_vm2, %v3972_v54, 0.0 }
 0x663   : > { %v1356_v44 = vadd.f32 %v1355_v39, %v1354_v27  ;;  %v1365_v51 = vsel %vm358_vm2, %v3975_v2, 0.0 }
 0x665   : > { %v1358_v11 = vadd.f32 %v1357_v23, %v1356_v44 }
 0x667   : > { %v1360_v0 = vadd.f32 %v1359_v63, %v1358_v11 }
 0x668   : > { %v2678_v24 = vpop.eup %2677 }
 0x669   : > { %v1362_v39 = vadd.f32 %v1361_v19, %v1360_v0  ;;  %v3985_v44 = vmul.f32 %v2678_v24, %v3807_v36 }
 0x66a   : > { %v1235_v61 = vpop.xlane.xlu2 %1234 }
 0x66b   : > { %2679 = vrcp.f32 %v1235_v61  ;;  %v3978_v61 = vmul.f32 %v2676_v49, %v3798_v42  ;;  %v1369_v15 = vsel %vm358_vm2, %v3985_v44, 0.0 }
 0x66d   : > { %v1367_v42 = vsel %vm358_vm2, %v3978_v61, 0.0 }
 0x671   : > { %v1238_v37 = vpop.xlane.xlu0 %1237  ;;  %v2680_v46 = vpop.eup %2679 }
 0x672   : > { %2681 = vrcp.f32 %v1238_v37  ;;  %v3990_v23 = vmul.f32 %v2680_v46, %v3814_v26 }
 0x674   : > { %v1371_v49 = vsel %vm358_vm2, %v3990_v23, 0.0 }
 0x678   : > { %v2682_v57 = vpop.eup %2681 }
 0x679   : > { %v1241_v48 = vpop.xlane.xlu1 %1240 }
 0x67a   : > { %2683 = vrcp.f32 %v1241_v48  ;;  %v1364_v48 = vadd.f32 %v1363_v25, %v1362_v39 }
 0x67c   : > { %v1366_v62 = vadd.f32 %v1365_v51, %v1364_v48 }
 0x67e   : > { %v1368_v63 = vadd.f32 %v1367_v42, %v1366_v62 }
 0x680   : > { %v2684_v11 = vpop.eup %2683  ;;  %v1370_v24 = vadd.f32 %v1369_v15, %v1368_v63 }
 0x681   : > { %v1244_v13 = vpop.xlane.xlu2 %1243  ;;  %v4000_v0 = vmul.f32 %v2684_v11, %v3828_v60 }
 0x682   : > { %2685 = vrcp.f32 %v1244_v13  ;;  %v3995_v13 = vmul.f32 %v2682_v57, %v3821_v59  ;;  %v1372_v25 = vadd.f32 %v1371_v49, %v1370_v24 }
 0x683   : > { %v1375_v51 = vsel %vm358_vm2, %v4000_v0, 0.0 }
 0x684   : > { %v1373_v39 = vsel %vm358_vm2, %v3995_v13, 0.0 }
 0x688   : > { %v2686_v19 = vpop.eup %2685 }
 0x689   : > { %v1247_v53 = vpop.xlane.xlu0 %1246  ;;  %v4005_v59 = vmul.f32 %v2686_v19, %v3835_v34 }
 0x68a   : > { %2687 = vrcp.f32 %v1247_v53 }
 0x68b   : > { %v1377_v48 = vsel %vm358_vm2, %v4005_v59, 0.0 }
 0x690   : > { %v2688_v53 = vpop.eup %2687 }
 0x691   : > { %v1250_v27 = vpop.xlane.xlu1 %1249  ;;  %v4010_v60 = vmul.f32 %v2688_v53, %v3842_v35 }
 0x692   : > { %2689 = vrcp.f32 %v1250_v27 }
 0x693   : > { %v1379_v62 = vsel %vm358_vm2, %v4010_v60, 0.0 }
 0x698   : > { %v2690_v27 = vpop.eup %2689 }
 0x699   : > { %v1253_v37 = vpop.xlane.xlu2 %1252  ;;  %v1324_v42 = vmul.f32 %v2690_v27, %v3847_v21 }
 0x69a   : > { %2691 = vrcp.f32 %v1253_v37  ;;  %v1374_v37 = vadd.f32 %v1373_v39, %v1372_v25 }
 0x69b   : > { %v1381_v35 = vsel %vm358_vm2, %v1324_v42, 0.0 }
 0x69c   : > { %v1376_v11 = vadd.f32 %v1375_v51, %v1374_v37 }
 0x69e   : > { %v1378_v19 = vadd.f32 %v1377_v48, %v1376_v11 }
 0x6a0   : > { %v2692_v57 = vpop.eup %2691 }
 0x6a1   : > { %v1256_v36 = vpop.xlane.xlu0 %1255  ;;  %v1325_v15 = vmul.f32 %v2692_v57, %v3852_v40 }
 0x6a2   : > { %2693 = vrcp.f32 %v1256_v36 }
 0x6a3   : > { %v1383_v53 = vsel %vm358_vm2, %v1325_v15, 0.0 }
 0x6a8   : > { %v2694_v34 = vpop.eup %2693 }
 0x6a9   : > { %v1259_v26 = vpop.xlane.xlu1 %1258  ;;  %v1326_v63 = vmul.f32 %v2694_v34, %v3857_v56 }
 0x6aa   : > { %2695 = vrcp.f32 %v1259_v26  ;;  %v1380_v26 = vadd.f32 %v1379_v62, %v1378_v19 }
 0x6ab   : > { %v1385_v27 = vsel %vm358_vm2, %v1326_v63, 0.0 }
 0x6ac   : > { %v1382_v39 = vadd.f32 %v1381_v35, %v1380_v26 }
 0x6ae   : > { %v1384_v40 = vadd.f32 %v1383_v53, %v1382_v39 }
 0x6b0   : > { %v2696_v36 = vpop.eup %2695  ;;  %v1386_v51 = vadd.f32 %v1385_v27, %v1384_v40 }
 0x6b1   : > { %v1262_v46 = vpop.xlane.xlu2 %1261  ;;  %v1327_v24 = vmul.f32 %v2696_v36, %v3862_v45 }
 0x6b2   : > { %2697 = vrcp.f32 %v1262_v46 }
 0x6b3   : > { %v1387_v25 = vsel %vm358_vm2, %v1327_v24, 0.0 }
 0x6b4   : > { %v1388_v37 = vadd.f32 %v1387_v25, %v1386_v51 }
 0x6b8   : > { %v2698_v49 = vpop.eup %2697 }
 0x6b9   : > { %v1328_v46 = vmul.f32 %v2698_v49, %v3867_v4 }
 0x6ba   : > { %v1265_v21 = vpop.xlane.xlu0 %1264 }
 0x6bb   : > { %2699 = vrcp.f32 %v1265_v21  ;;  %v1389_v57 = vsel %vm358_vm2, %v1328_v46, 0.0 }
 0x6bc   : > { %v1390_v34 = vadd.f32 %v1389_v57, %v1388_v37 }
 0x6c1   : > { %v2700_v56 = vpop.eup %2699 }
 0x6c2   : > { %v1329_v48 = vmul.f32 %v2700_v56, %v3871_v41 }
 0x6c4   : > { %v1391_v45 = vsel %vm358_vm2, %v1329_v48, 0.0 }
 0x6c5   : > { %v1392_v11 = vadd.f32 %v1391_v45, %v1390_v34  ;;  %v1450_v34 = vld.sshfl [vmem:[#allocation1] sm:$0xff pattern:$0x73625140]  ;;  %v1451_v45 = vld.sshfl [vmem:[#allocation1 + $0x8] sm:$0xff pattern:$0x73625140] }
 0x6c6   : > { %2067 = vst [vmem:[#allocation1] ss:$4 sm:$0xff] %v2987_v3 }
 0x6c7   : > { %v1393_v62 = vrot.slane %v1392_v11, 4 }
 0x6c9   : > { %v1394_v36 = vadd.f32 %v1393_v62, %v1392_v11 }
 0x6cb   : > { %v1395_v19 = vrot.slane %v1394_v36, 2 }
 0x6cd   : > { %v1396_v35 = vadd.f32 %v1395_v19, %v1394_v36 }
 0x6cf   : > { %v1397_v26 = vrot.slane %v1396_v35, 1 }
 0x6d1   : > { %v1398_v4 = vadd.f32 %v1397_v26, %v1396_v35 }
 0x6d3   : > { %v1399_v49 = vadd.f32 1e-06, %v1398_v4 }
 0x6d5   : > { %2701 = vrcp.f32 %v1399_v49 }
 0x6db   : > { %v2702_v53 = vpop.eup %2701 }
 0x6dc   : > { %v1415_v21 = vmul.f32 %v2702_v53, %v3957_v5  ;;  %v1416_v39 = vmul.f32 %v2702_v53, %v3963_v52  ;;  %v1431_v27 = vmul.f32 %v2702_v53, %v1328_v46  ;;  %v1432_v40 = vmul.f32 %v2702_v53, %v1329_v48 }
 0x6dd   : > { %v1413_v41 = vmul.f32 %v2702_v53, %v3947_v33  ;;  %v1414_v25 = vmul.f32 %v2702_v53, %v3950_v55  ;;  %v1429_v56 = vmul.f32 %v2702_v53, %v1326_v63  ;;  %v1430_v37 = vmul.f32 %v2702_v53, %v1327_v24 }
 0x6de   : > { %v1440_v51 = vpack.c.bf16 %v1416_v39, %v1415_v21  ;;  %v1448_v57 = vpack.c.bf16 %v1432_v40, %v1431_v27  ;;  %v1411_v5 = vmul.f32 %v2702_v53, %v3935_v47  ;;  %v1412_v52 = vmul.f32 %v2702_v53, %v3940_v9 }
 0x6df   : > { %v1439_v46 = vpack.c.bf16 %v1414_v25, %v1413_v41  ;;  %v1447_v48 = vpack.c.bf16 %v1430_v37, %v1429_v56  ;;  %v1427_v11 = vmul.f32 %v2702_v53, %v1324_v42  ;;  %v1428_v33 = vmul.f32 %v2702_v53, %v1325_v15 }
 0x6e0   : > { %1454 = vmatpush.bf16.msrb.mxu3 %v1440_v51  ;;  %1467 = vmatpush.bf16.msrb.mxu2 %v1448_v57  ;;  %v1409_v55 = vmul.f32 %v2702_v53, %v3925_v17  ;;  %v1410_v63 = vmul.f32 %v2702_v53, %v3930_v38  ;;  %v1438_v24 = vpack.c.bf16 %v1412_v52, %v1411_v5 }
 0x6e1   : > { %v1446_v62 = vpack.c.bf16 %v1428_v33, %v1427_v11  ;;  %v1425_v36 = vmul.f32 %v2702_v53, %v4005_v59  ;;  %v1426_v3 = vmul.f32 %v2702_v53, %v4010_v60  ;;  %v1407_v9 = vmul.f32 %v2702_v53, %v3915_v50 }
 0x6e2   : > { %v1437_v47 = vpack.c.bf16 %v1410_v63, %v1409_v55  ;;  %v1408_v42 = vmul.f32 %v2702_v53, %v3918_v30  ;;  %v1423_v15 = vmul.f32 %v2702_v53, %v3995_v13  ;;  %v1424_v17 = vmul.f32 %v2702_v53, %v4000_v0 }
 0x6e3   : > { %v1445_v19 = vpack.c.bf16 %v1426_v3, %v1425_v36  ;;  %v1405_v38 = vmul.f32 %v2702_v53, %v3900_v29  ;;  %v1406_v59 = vmul.f32 %v2702_v53, %v3912_v32  ;;  %v1421_v26 = vmul.f32 %v2702_v53, %v3985_v44 }
 0x6e4   : > { %1455 = vmatpush.bf16.msrb.mxu3 %v1439_v46  ;;  %1468 = vmatpush.bf16.msrb.mxu2 %v1447_v48  ;;  %v1436_v35 = vpack.c.bf16 %v1408_v42, %v1407_v9  ;;  %v1444_v60 = vpack.c.bf16 %v1424_v17, %v1423_v15  ;;  %v1422_v4 = vmul.f32 %v2702_v53, %v3990_v23  ;;  %v4758_v9 = vld [vmem:[#allocation6_spill] sm:$0xff]  ;;  %v4759_v17 = vld [vmem:[#allocation7_spill] sm:$0xff] }
 0x6e5   : > { %v1435_v50 = vpack.c.bf16 %v1406_v59, %v1405_v38  ;;  %v1403_v30 = vmul.f32 %v2702_v53, %v3893_v28  ;;  %v1404_v0 = vmul.f32 %v2702_v53, %v3896_v58  ;;  %v1419_v49 = vmul.f32 %v2702_v53, %v3975_v2 }
 0x6e6   : > { %v1443_v13 = vpack.c.bf16 %v1422_v4, %v1421_v26  ;;  %v1420_v29 = vmul.f32 %v2702_v53, %v3978_v61  ;;  %v1401_v32 = vmul.f32 %v2702_v53, %v3884_v43  ;;  %v1402_v44 = vmul.f32 %v2702_v53, %v3881_v1  ;;  %v4760_v26 = vld [vmem:[#allocation8_spill] sm:$0xff] }
 0x6e7   : > { %v1434_v21 = vpack.c.bf16 %v1404_v0, %v1403_v30  ;;  %v1417_v39 = vmul.f32 %v2702_v53, %v3960_v31  ;;  %v1418_v27 = vmul.f32 %v2702_v53, %v3972_v54  ;;  %v4761_v0 = vld [vmem:[#allocation9_spill] sm:$0xff] }
 0x6e8   : > { %1456 = vmatpush.bf16.msrb.mxu3 %v1438_v24  ;;  %1469 = vmatpush.bf16.msrb.mxu2 %v1446_v62  ;;  %v1442_v23 = vpack.c.bf16 %v1420_v29, %v1419_v49  ;;  %v1433_v28 = vpack.c.bf16 %v1402_v44, %v1401_v32 }
 0x6e9   : > { %v1441_v58 = vpack.c.bf16 %v1418_v27, %v1417_v39 }
 0x6ec   : > { %1457 = vmatpush.bf16.msrb.mxu3 %v1437_v47  ;;  %1470 = vmatpush.bf16.msrb.mxu2 %v1445_v19 }
 0x6f0   : > { %1458 = vmatpush.bf16.msrb.mxu3 %v1436_v35  ;;  %1471 = vmatpush.bf16.msrb.mxu2 %v1444_v60 }
 0x6f4   : > { %1459 = vmatpush.bf16.msrb.mxu3 %v1435_v50  ;;  %1472 = vmatpush.bf16.msrb.mxu2 %v1443_v13 }
 0x6f8   : > { %1460 = vmatpush.bf16.msrb.mxu3 %v1434_v21  ;;  %1473 = vmatpush.bf16.msrb.mxu2 %v1442_v23  ;;  %v4762_v21 = vld [vmem:[#allocation10_spill] sm:$0xff] }
 0x6fc   : > { %1461 = vmatpush.bf16.msrb.mxu3 %v1433_v28  ;;  %1474 = vmatpush.bf16.msrb.mxu2 %v1441_v58  ;;  %v4763_v58 = vld [vmem:[#allocation11_spill] sm:$0xff] }
 0x6ff   : > { %1462 = vmatmul.bf16.vlgmr.msrb.gmra.mxu3 %v1450_v34  ;;  %1475 = vmatmul.bf16.vlgmr.msrb.gmra.mxu2 %v1451_v45 }
 0x782   : > { %v1463_v2 = vpop.f32.mrf.mxu3  ;;  %v1476_v61 = vpop.f32.mrf.mxu2 }
 0x783   : > { %v1477_v40 = vadd.f32 %v1476_v61, %v1463_v2 }
 0x785   : > { %v1480_v43 = vmul.f32 %v1477_v40, %v1477_v40 }
 0x787   : > { %v1481_v1 = vsel %vm862_vm3, %v1480_v43, 0.0 }
 0x788   : > { %v1482_v41 = vrot.slane %v1481_v1, 4 }
 0x78a   : > { %v1483_v25 = vadd.f32 %v1482_v41, %v1481_v1  ;;  %v1465_v51 = vpop.f32.mrf.mxu3  ;;  %v1478_v31 = vpop.f32.mrf.mxu2 }
 0x78c   : > { %v1484_v57 = vrot.slane %v1483_v25, 2 }
 0x78e   : > { %v1485_v54 = vadd.f32 %v1484_v57, %v1483_v25 }
 0x790   : > { %v1486_v53 = vrot.slane %v1485_v54, 1 }
 0x792   : > { %v1487_v56 = vadd.f32 %v1486_v53, %v1485_v54 }
 0x794   : > { %2703 = vrsqrt.f32 %v1487_v56  ;;  %vm1495_vm6 = vcmp.eq.f32.partialorder %v1487_v56, inf  ;;  %v1498_v11 = vand.u32 2147483648, %v1487_v56  ;;  %vm1497_vm7 = vcmp.eq.f32.partialorder %v1487_v56, 0.0 }
 0x79a   : > { %v2704_v37 = vpop.eup %2703 }
 0x79b   : > { %v1489_v5 = vmul.f32 %v2704_v37, %v1487_v56 }
 0x79d   : > { %v1490_v52 = vmul.f32 %v2704_v37, %v1489_v5 }
 0x79f   : > { %v1491_v34 = vmul.f32 0.5, %v1490_v52 }
 0x7a1   : > { %v1492_v45 = vsub.f32 1.5, %v1491_v34 }
 0x7a3   : > { %v1493_v46 = vmul.f32 %v2704_v37, %v1492_v45 }
 0x7a5   : > { %v1494_v48 = vmul.f32 %v1493_v46, %v1487_v56 }
 0x7a7   : > { %v1496_v33 = vsel %vm1495_vm6, %v1487_v56, %v1494_v48 }
 0x7a8   : > { %v1499_v55 = vsel %vm1497_vm7, %v1498_v11, %v1496_v33 }
 0x7a9   : > { %v1500_v63 = vadd.f32 1e-06, %v1499_v55 }
 0x7ab   : > { %2705 = vrcp.f32 %v1500_v63 }
 0x7b1   : > { %v2706_v24 = vpop.eup %2705 }
 0x7b2   : > { %v1502_v62 = vmul.f32 %v2706_v24, %v1477_v40 }
 0x7b4   : > { %v1503_v36 = vpack.c.bf16 %v1502_v62, %v1502_v62 }
 0x7b6   : > { %v1505_v3 = vsel %vm265_vm0, %v1503_v36, 0 }
 0x7b7   : > { %1514 = vmatpush.bf16.msra.mxu1 %v1505_v3 }
 0x7ba   : > { %2375 = vmatmul.msk.bf16.vlgmr.msra.gmra.mxu1 %vm216_vm1, %v2991_v6 }
 0x7ca   : > { %2376 = vmatmul.msk.bf16.gmra.mxu1 %vm216_vm1, %v2997_v8 }
 0x7da   : > { %2377 = vmatmul.msk.bf16.gmra.mxu1 %vm216_vm1, %v3003_v10 }
 0x7ea   : > { %2378 = vmatmul.msk.bf16.gmra.mxu1 %vm216_vm1, %v3009_v12 }
 0x7fa   : > { %2379 = vmatmul.msk.bf16.gmra.mxu1 %vm216_vm1, %v3015_v14 }
 0x80a   : > { %2380 = vmatmul.msk.bf16.gmra.mxu1 %vm216_vm1, %v3021_v16 }
 0x81a   : > { %2381 = vmatmul.msk.bf16.gmra.mxu1 %vm216_vm1, %v3027_v18 }
 0x82a   : > { %2382 = vmatmul.msk.bf16.gmra.mxu1 %vm216_vm1, %v3033_v20 }
 0x837   : > { %v1516_v6 = vpop.f32.mrf.mxu1 }
 0x838   : > { %v1596_v8 = vsel %vm358_vm2, %v1516_v6, -inf }
 0x839   : > { %1597 = vmax.xlane.f32.xlu1 %v1596_v8 }
 0x83a   : > { %2383 = vmatmul.msk.bf16.gmra.mxu1 %vm216_vm1, %v2995_v7 }
 0x83f   : > { %v1518_v10 = vpop.f32.mrf.mxu1 }
 0x840   : > { %v1599_v12 = vsel %vm358_vm2, %v1518_v10, -inf }
 0x841   : > { %1600 = vmax.xlane.f32.xlu2 %v1599_v12 }
 0x847   : > { %v4077_v14 = vpop.f32.mrf.mxu1 }
 0x848   : > { %v1602_v16 = vsel %vm358_vm2, %v4077_v14, -inf }
 0x849   : > { %1603 = vmax.xlane.f32.xlu0 %v1602_v16 }
 0x84a   : > { %2384 = vmatmul.msk.bf16.gmra.mxu1 %vm216_vm1, %v4751_v22 }
 0x84f   : > { %v4083_v18 = vpop.f32.mrf.mxu1 }
 0x850   : > { %v1605_v20 = vsel %vm358_vm2, %v4083_v18, -inf }
 0x851   : > { %1606 = vmax.xlane.f32.xlu1 %v1605_v20 }
 0x857   : > { %v4087_v7 = vpop.f32.mrf.mxu1 }
 0x858   : > { %v1608_v47 = vsel %vm358_vm2, %v4087_v7, -inf }
 0x859   : > { %1609 = vmax.xlane.f32.xlu2 %v1608_v47 }
 0x85a   : > { %2385 = vmatmul.msk.bf16.gmra.mxu1 %vm216_vm1, %v4758_v9 }
 0x85f   : > { %v4093_v19 = vpop.f32.mrf.mxu1 }
 0x860   : > { %v1611_v22 = vsel %vm358_vm2, %v4093_v19, -inf }
 0x861   : > { %1612 = vmax.xlane.f32.xlu0 %v1611_v22 }
 0x867   : > { %v4097_v42 = vpop.f32.mrf.mxu1 }
 0x868   : > { %v1614_v15 = vsel %vm358_vm2, %v4097_v42, -inf }
 0x869   : > { %1615 = vmax.xlane.f32.xlu1 %v1614_v15 }
 0x86a   : > { %2386 = vmatmul.msk.bf16.gmra.mxu1 %vm216_vm1, %v4759_v17 }
 0x86f   : > { %v4103_v38 = vpop.f32.mrf.mxu1 }
 0x870   : > { %v1617_v59 = vsel %vm358_vm2, %v4103_v38, -inf }
 0x871   : > { %1618 = vmax.xlane.f32.xlu2 %v1617_v59 }
 0x877   : > { %v4107_v35 = vpop.f32.mrf.mxu1 }
 0x878   : > { %v1620_v60 = vsel %vm358_vm2, %v4107_v35, -inf }
 0x879   : > { %1621 = vmax.xlane.f32.xlu0 %v1620_v60 }
 0x87a   : > { %2387 = vmatmul.msk.bf16.gmra.mxu1 %vm216_vm1, %v4760_v26 }
 0x87f   : > { %v4113_v4 = vpop.f32.mrf.mxu1 }
 0x880   : > { %v1623_v50 = vsel %vm358_vm2, %v4113_v4, -inf }
 0x881   : > { %1624 = vmax.xlane.f32.xlu1 %v1623_v50 }
 0x887   : > { %v4117_v30 = vpop.f32.mrf.mxu1 }
 0x888   : > { %v1626_v13 = vsel %vm358_vm2, %v4117_v30, -inf }
 0x889   : > { %1627 = vmax.xlane.f32.xlu2 %v1626_v13 }
 0x88a   : > { %2388 = vmatmul.msk.bf16.gmra.mxu1 %vm216_vm1, %v4761_v0 }
 0x88f   : > { %v4123_v49 = vpop.f32.mrf.mxu1 }
 0x890   : > { %v1629_v29 = vsel %vm358_vm2, %v4123_v49, -inf }
 0x891   : > { %1630 = vmax.xlane.f32.xlu0 %v1629_v29 }
 0x897   : > { %v4127_v32 = vpop.f32.mrf.mxu1 }
 0x898   : > { %v1632_v44 = vsel %vm358_vm2, %v4127_v32, -inf }
 0x899   : > { %1633 = vmax.xlane.f32.xlu1 %v1632_v44 }
 0x89a   : > { %2389 = vmatmul.msk.bf16.gmra.mxu1 %vm216_vm1, %v4762_v21 }
 0x89f   : > { %v4133_v23 = vpop.f32.mrf.mxu1 }
 0x8a0   : > { %v1635_v39 = vsel %vm358_vm2, %v4133_v23, -inf }
 0x8a1   : > { %1636 = vmax.xlane.f32.xlu2 %v1635_v39 }
 0x8a7   : > { %v4137_v27 = vpop.f32.mrf.mxu1 }
 0x8a8   : > { %v1638_v28 = vsel %vm358_vm2, %v4137_v27, -inf }
 0x8a9   : > { %1639 = vmax.xlane.f32.xlu0 %v1638_v28 }
 0x8aa   : > { %2390 = vmatmul.msk.bf16.gmra.mxu1 %vm216_vm1, %v4763_v58 }
 0x8ac   : > { %v1598_v2 = vpop.xlane.xlu1 %1597 }
 0x8ad   : > { %v1692_v61 = vsub.f32 %v1516_v6, %v1598_v2 }
 0x8af   : > { %v4143_v40 = vpop.f32.mrf.mxu1  ;;  %v1724_v1 = vmul.f32 1.442695, %v1692_v61 }
 0x8b0   : > { %v1641_v43 = vsel %vm358_vm2, %v4143_v40, -inf }
 0x8b1   : > { %1642 = vmax.xlane.f32.xlu1 %v1641_v43  ;;  %2707 = vpow2.f32 %v1724_v1 }
 0x8b4   : > { %v1601_v41 = vpop.xlane.xlu2 %1600 }
 0x8b5   : > { %v1693_v25 = vsub.f32 %v1518_v10, %v1601_v41 }
 0x8b7   : > { %v4147_v51 = vpop.f32.mrf.mxu1  ;;  %v1726_v57 = vmul.f32 1.442695, %v1693_v25  ;;  %v4151_v53 = vpop.eup %2707 }
 0x8b8   : > { %v1644_v31 = vsel %vm358_vm2, %v4147_v51, -inf  ;;  %v1788_v52 = vsel %vm358_vm2, %v4151_v53, 0.0 }
 0x8b9   : > { %1645 = vmax.xlane.f32.xlu2 %v1644_v31  ;;  %2709 = vpow2.f32 %v1726_v57 }
 0x8bc   : > { %v1604_v54 = vpop.xlane.xlu0 %1603 }
 0x8bd   : > { %v1694_v56 = vsub.f32 %v4077_v14, %v1604_v54 }
 0x8bf   : > { %v1728_v37 = vmul.f32 1.442695, %v1694_v56  ;;  %v4154_v5 = vpop.f32.mrf.mxu1  ;;  %v4160_v46 = vpop.eup %2709 }
 0x8c0   : > { %v1647_v34 = vsel %vm358_vm2, %v4154_v5, -inf  ;;  %v1791_v24 = vsel %vm358_vm2, %v4160_v46, 0.0 }
 0x8c1   : > { %2711 = vpow2.f32 %v1728_v37  ;;  %1789 = vadd.xlane.f32.xlu2 %v1788_v52  ;;  %1648 = vmax.xlane.f32.xlu0 %v1647_v34 }
 0x8c4   : > { %v1607_v45 = vpop.xlane.xlu1 %1606 }
 0x8c5   : > { %v1695_v48 = vsub.f32 %v4083_v18, %v1607_v45 }
 0x8c7   : > { %v4163_v11 = vpop.eup %2711  ;;  %v1730_v33 = vmul.f32 1.442695, %v1695_v48  ;;  %v4165_v55 = vpop.f32.mrf.mxu1 }
 0x8c8   : > { %v1794_v63 = vsel %vm358_vm2, %v4163_v11, 0.0  ;;  %v1650_v62 = vsel %vm358_vm2, %v4165_v55, -inf }
 0x8c9   : > { %2713 = vpow2.f32 %v1730_v33  ;;  %1795 = vadd.xlane.f32.xlu2 %v1794_v63  ;;  %1792 = vadd.xlane.f32.xlu0 %v1791_v24 }
 0x8ca   : > { %1651 = vmax.xlane.f32.xlu1 %v1650_v62 }
 0x8cc   : > { %v1610_v36 = vpop.xlane.xlu2 %1609 }
 0x8cd   : > { %v1696_v6 = vsub.f32 %v4087_v7, %v1610_v36 }
 0x8cf   : > { %v4173_v3 = vpop.eup %2713  ;;  %v4176_v8 = vpop.f32.mrf.mxu1  ;;  %v1732_v14 = vmul.f32 1.442695, %v1696_v6 }
 0x8d0   : > { %v1797_v10 = vsel %vm358_vm2, %v4173_v3, 0.0  ;;  %v1653_v12 = vsel %vm358_vm2, %v4176_v8, -inf }
 0x8d1   : > { %1654 = vmax.xlane.f32.xlu2 %v1653_v12  ;;  %2715 = vpow2.f32 %v1732_v14 }
 0x8d2   : > { %1798 = vadd.xlane.f32.xlu1 %v1797_v10 }
 0x8d4   : > { %v1613_v16 = vpop.xlane.xlu0 %1612 }
 0x8d5   : > { %v1697_v18 = vsub.f32 %v4093_v19, %v1613_v16 }
 0x8d7   : > { %v1734_v20 = vmul.f32 1.442695, %v1697_v18  ;;  %v4183_v47 = vpop.f32.mrf.mxu1  ;;  %v4187_v22 = vpop.eup %2715 }
 0x8d8   : > { %v1656_v7 = vsel %vm358_vm2, %v4183_v47, -inf  ;;  %v1800_v26 = vsel %vm358_vm2, %v4187_v22, 0.0 }
 0x8d9   : > { %2717 = vpow2.f32 %v1734_v20  ;;  %1657 = vmax.xlane.f32.xlu0 %v1656_v7 }
 0x8dc   : > { %v1616_v9 = vpop.xlane.xlu1 %1615 }
 0x8dd   : > { %v1698_v15 = vsub.f32 %v4097_v42, %v1616_v9 }
 0x8df   : > { %v4190_v17 = vpop.eup %2717  ;;  %v1736_v59 = vmul.f32 1.442695, %v1698_v15  ;;  %v4192_v60 = vpop.f32.mrf.mxu1 }
 0x8e0   : > { %v1803_v19 = vsel %vm358_vm2, %v4190_v17, 0.0  ;;  %v1659_v50 = vsel %vm358_vm2, %v4192_v60, -inf }
 0x8e1   : > { %2719 = vpow2.f32 %v1736_v59  ;;  %1804 = vadd.xlane.f32.xlu2 %v1803_v19  ;;  %1801 = vadd.xlane.f32.xlu0 %v1800_v26 }
 0x8e2   : > { %1660 = vmax.xlane.f32.xlu1 %v1659_v50 }
 0x8e4   : > { %v1619_v13 = vpop.xlane.xlu2 %1618 }
 0x8e5   : > { %v1699_v42 = vsub.f32 %v4103_v38, %v1619_v13 }
 0x8e7   : > { %v4201_v0 = vpop.eup %2719  ;;  %v1738_v29 = vmul.f32 1.442695, %v1699_v42  ;;  %v4203_v44 = vpop.f32.mrf.mxu1 }
 0x8e8   : > { %v1806_v21 = vsel %vm358_vm2, %v4201_v0, 0.0  ;;  %v1662_v39 = vsel %vm358_vm2, %v4203_v44, -inf }
 0x8e9   : > { %2721 = vpow2.f32 %v1738_v29  ;;  %1807 = vadd.xlane.f32.xlu0 %v1806_v21  ;;  %1663 = vmax.xlane.f32.xlu2 %v1662_v39 }
 0x8ec   : > { %v1622_v28 = vpop.xlane.xlu0 %1621 }
 0x8ed   : > { %v1700_v58 = vsub.f32 %v4107_v35, %v1622_v28 }
 0x8ef   : > { %v4210_v2 = vpop.eup %2721  ;;  %v1740_v38 = vmul.f32 1.442695, %v1700_v58  ;;  %v4212_v61 = vpop.f32.mrf.mxu1 }
 0x8f0   : > { %v1809_v43 = vsel %vm358_vm2, %v4210_v2, 0.0  ;;  %v1665_v1 = vsel %vm358_vm2, %v4212_v61, -inf }
 0x8f1   : > { %2723 = vpow2.f32 %v1740_v38  ;;  %1810 = vadd.xlane.f32.xlu1 %v1809_v43  ;;  %1666 = vmax.xlane.f32.xlu0 %v1665_v1 }
 0x8f4   : > { %v1625_v41 = vpop.xlane.xlu1 %1624 }
 0x8f5   : > { %v1701_v25 = vsub.f32 %v4113_v4, %v1625_v41 }
 0x8f7   : > { %v4219_v31 = vpop.eup %2723  ;;  %v1742_v35 = vmul.f32 1.442695, %v1701_v25  ;;  %v4221_v57 = vpop.f32.mrf.mxu1 }
 0x8f8   : > { %v1812_v54 = vsel %vm358_vm2, %v4219_v31, 0.0  ;;  %v1668_v56 = vsel %vm358_vm2, %v4221_v57, -inf }
 0x8f9   : > { %2725 = vpow2.f32 %v1742_v35  ;;  %1813 = vadd.xlane.f32.xlu2 %v1812_v54  ;;  %1669 = vmax.xlane.f32.xlu1 %v1668_v56 }
 0x8fc   : > { %v1628_v37 = vpop.xlane.xlu2 %1627 }
 0x8fd   : > { %v1702_v52 = vsub.f32 %v4117_v30, %v1628_v37 }
 0x8ff   : > { %v4228_v34 = vpop.eup %2725  ;;  %v1744_v4 = vmul.f32 1.442695, %v1702_v52  ;;  %v4230_v45 = vpop.f32.mrf.mxu1 }
 0x900   : > { %v1815_v48 = vsel %vm358_vm2, %v4228_v34, 0.0  ;;  %v1671_v33 = vsel %vm358_vm2, %v4230_v45, -inf }
 0x901   : > { %2727 = vpow2.f32 %v1744_v4  ;;  %1816 = vadd.xlane.f32.xlu0 %v1815_v48  ;;  %1672 = vmax.xlane.f32.xlu2 %v1671_v33 }
 0x904   : > { %v1631_v18 = vpop.xlane.xlu0 %1630 }
 0x905   : > { %v1703_v7 = vsub.f32 %v4123_v49, %v1631_v18 }
 0x907   : > { %v4236_v63 = vpop.eup %2727  ;;  %v4238_v24 = vpop.f32.mrf.mxu1  ;;  %v1746_v59 = vmul.f32 1.442695, %v1703_v7 }
 0x908   : > { %v1818_v30 = vsel %vm358_vm2, %v4236_v63, 0.0  ;;  %v1674_v62 = vsel %vm358_vm2, %v4238_v24, -inf }
 0x909   : > { %1819 = vadd.xlane.f32.xlu1 %v1818_v30  ;;  %1675 = vmax.xlane.f32.xlu0 %v1674_v62 }
 0x90c   : > { %v1634_v10 = vpop.xlane.xlu1 %1633 }
 0x90d   : > { %v1704_v12 = vsub.f32 %v4127_v32, %v1634_v10 }
 0x90f   : > { %v4244_v36 = vpop.f32.mrf.mxu1  ;;  %v1748_v20 = vmul.f32 1.442695, %v1704_v12 }
 0x910   : > { %v1677_v6 = vsel %vm358_vm2, %v4244_v36, -inf }
 0x911   : > { %1678 = vmax.xlane.f32.xlu1 %v1677_v6  ;;  %2729 = vpow2.f32 %v1748_v20 }
 0x912   : > { %2731 = vpow2.f32 %v1746_v59 }
 0x914   : > { %v1637_v19 = vpop.xlane.xlu2 %1636 }
 0x915   : > { %v1705_v21 = vsub.f32 %v4133_v23, %v1637_v19 }
 0x917   : > { %v4249_v14 = vpop.f32.mrf.mxu1  ;;  %v4258_v50 = vpop.eup %2729 }
 0x918   : > { %v1680_v16 = vsel %vm358_vm2, %v4249_v14, -inf  ;;  %v1824_v39 = vsel %vm358_vm2, %v4258_v50, 0.0  ;;  %v4269_v38 = vpop.eup %2731 }
 0x919   : > { %1681 = vmax.xlane.f32.xlu1 %v1680_v16  ;;  %v1821_v23 = vsel %vm358_vm2, %v4269_v38, 0.0 }
 0x91c   : > { %v1640_v32 = vpop.xlane.xlu0 %1639 }
 0x91d   : > { %v1706_v42 = vsub.f32 %v4137_v27, %v1640_v32 }
 0x91f   : > { %v4254_v9 = vpop.f32.mrf.mxu1  ;;  %v1752_v58 = vmul.f32 1.442695, %v1706_v42 }
 0x920   : > { %v1683_v15 = vsel %vm358_vm2, %v4254_v9, -inf }
 0x921   : > { %1684 = vmax.xlane.f32.xlu0 %v1683_v15 }
 0x924   : > { %v1643_v26 = vpop.xlane.xlu1 %1642 }
 0x925   : > { %v1707_v13 = vsub.f32 %v4143_v40, %v1643_v26  ;;  %v1750_v40 = vmul.f32 1.442695, %v1705_v21 }
 0x927   : > { %v1754_v29 = vmul.f32 1.442695, %v1707_v13  ;;  %v4262_v49 = vpop.f32.mrf.mxu1 }
 0x928   : > { %v1686_v28 = vsel %vm358_vm2, %v4262_v49, -inf }
 0x929   : > { %2733 = vpow2.f32 %v1754_v29  ;;  %1825 = vadd.xlane.f32.xlu0 %v1824_v39  ;;  %1687 = vmax.xlane.f32.xlu2 %v1686_v28 }
 0x92a   : > { %2735 = vpow2.f32 %v1752_v58 }
 0x92b   : > { %2737 = vpow2.f32 %v1750_v40 }
 0x92c   : > { %v1646_v43 = vpop.xlane.xlu2 %1645 }
 0x92d   : > { %v1708_v41 = vsub.f32 %v4147_v51, %v1646_v43 }
 0x92f   : > { %v4271_v27 = vpop.eup %2733  ;;  %v4273_v1 = vpop.f32.mrf.mxu1  ;;  %v1756_v54 = vmul.f32 1.442695, %v1708_v41 }
 0x930   : > { %v1689_v25 = vsel %vm358_vm2, %v4273_v1, -inf  ;;  %v1833_v35 = vsel %vm358_vm2, %v4271_v27, 0.0  ;;  %v4284_v52 = vpop.eup %2735 }
 0x931   : > { %1834 = vadd.xlane.f32.xlu0 %v1833_v35  ;;  %1822 = vadd.xlane.f32.xlu2 %v1821_v23  ;;  %v4287_v48 = vpop.eup %2737  ;;  %2739 = vpow2.f32 %v1756_v54  ;;  %v1830_v33 = vsel %vm358_vm2, %v4284_v52, 0.0 }
 0x932   : > { %1690 = vmax.xlane.f32.xlu1 %v1689_v25  ;;  %v1827_v30 = vsel %vm358_vm2, %v4287_v48, 0.0 }
 0x934   : > { %v4282_v56 = vpop.xlane.xlu2 %1789  ;;  %v1649_v37 = vpop.xlane.xlu0 %1648 }
 0x935   : > { %v1709_v4 = vsub.f32 %v4154_v5, %v1649_v37 }
 0x937   : > { %v1758_v51 = vmul.f32 1.442695, %v1709_v4  ;;  %v4295_v10 = vpop.eup %2739 }
 0x938   : > { %v1836_v20 = vsel %vm358_vm2, %v4295_v10, 0.0 }
 0x939   : > { %2741 = vpow2.f32 %v1758_v51  ;;  %1831 = vadd.xlane.f32.xlu2 %v1830_v33 }
 0x93a   : > { %1828 = vadd.xlane.f32.xlu1 %v1827_v30 }
 0x93c   : > { %v4293_v62 = vpop.xlane.xlu2 %1795  ;;  %v4304_v7 = vpop.xlane.xlu0 %1792 }
 0x93d   : > { %v1652_v6 = vpop.xlane.xlu1 %1651 }
 0x93e   : > { %v1710_v5 = vsub.f32 %v4165_v55, %v1652_v6 }
 0x93f   : > { %v4298_v12 = vpop.eup %2741 }
 0x940   : > { %v1760_v16 = vmul.f32 1.442695, %v1710_v5  ;;  %v1839_v18 = vsel %vm358_vm2, %v4298_v12, 0.0 }
 0x941   : > { %1840 = vadd.xlane.f32.xlu2 %v1839_v18 }
 0x942   : > { %2743 = vpow2.f32 %v1760_v16  ;;  %1837 = vadd.xlane.f32.xlu1 %v1836_v20 }
 0x944   : > { %v1655_v15 = vpop.xlane.xlu2 %1654 }
 0x945   : > { %v1711_v59 = vsub.f32 %v4176_v8, %v1655_v15  ;;  %v4311_v13 = vpop.xlane.xlu1 %1798 }
 0x947   : > { %v1762_v19 = vmul.f32 1.442695, %v1711_v59 }
 0x948   : > { %v4307_v32 = vpop.eup %2743 }
 0x949   : > { %2745 = vpow2.f32 %v1762_v19  ;;  %v1842_v55 = vsel %vm358_vm2, %v4307_v32, 0.0 }
 0x94a   : > { %1843 = vadd.xlane.f32.xlu0 %v1842_v55 }
 0x94c   : > { %v1658_v26 = vpop.xlane.xlu0 %1657 }
 0x94d   : > { %v1712_v42 = vsub.f32 %v4183_v47, %v1658_v26 }
 0x94f   : > { %v4314_v29 = vpop.eup %2745  ;;  %v1764_v21 = vmul.f32 1.442695, %v1712_v42 }
 0x950   : > { %v1845_v39 = vsel %vm358_vm2, %v4314_v29, 0.0 }
 0x951   : > { %2747 = vpow2.f32 %v1764_v21  ;;  %1846 = vadd.xlane.f32.xlu1 %v1845_v39 }
 0x954   : > { %v4318_v8 = vpop.xlane.xlu2 %1804  ;;  %v4320_v28 = vpop.xlane.xlu0 %1801 }
 0x955   : > { %v1661_v58 = vpop.xlane.xlu1 %1660 }
 0x956   : > { %v1713_v40 = vsub.f32 %v4192_v60, %v1661_v58 }
 0x957   : > { %v4323_v43 = vpop.eup %2747 }
 0x958   : > { %v1766_v23 = vmul.f32 1.442695, %v1713_v40  ;;  %v1848_v47 = vsel %vm358_vm2, %v4323_v43, 0.0 }
 0x959   : > { %1849 = vadd.xlane.f32.xlu2 %v1848_v47 }
 0x95a   : > { %2749 = vpow2.f32 %v1766_v23 }
 0x95c   : > { %v4327_v41 = vpop.xlane.xlu0 %1807  ;;  %v1664_v25 = vpop.xlane.xlu2 %1663 }
 0x95d   : > { %v1714_v35 = vsub.f32 %v4203_v44, %v1664_v25 }
 0x95f   : > { %v1768_v54 = vmul.f32 1.442695, %v1714_v35 }
 0x960   : > { %v4330_v37 = vpop.eup %2749 }
 0x961   : > { %2751 = vpow2.f32 %v1768_v54  ;;  %v1851_v60 = vsel %vm358_vm2, %v4330_v37, 0.0 }
 0x962   : > { %1852 = vadd.xlane.f32.xlu0 %v1851_v60 }
 0x964   : > { %v4334_v4 = vpop.xlane.xlu1 %1810  ;;  %v1667_v51 = vpop.xlane.xlu0 %1666 }
 0x965   : > { %v1715_v33 = vsub.f32 %v4212_v61, %v1667_v51 }
 0x967   : > { %v4337_v30 = vpop.eup %2751  ;;  %v1770_v6 = vmul.f32 1.442695, %v1715_v33 }
 0x968   : > { %v1854_v5 = vsel %vm358_vm2, %v4337_v30, 0.0 }
 0x969   : > { %2753 = vpow2.f32 %v1770_v6  ;;  %1855 = vadd.xlane.f32.xlu1 %v1854_v5 }
 0x96c   : > { %v4341_v44 = vpop.xlane.xlu2 %1813  ;;  %v1670_v16 = vpop.xlane.xlu1 %1669 }
 0x96d   : > { %v1716_v18 = vsub.f32 %v4221_v57, %v1670_v16 }
 0x96f   : > { %v4344_v20 = vpop.eup %2753  ;;  %v1772_v15 = vmul.f32 1.442695, %v1716_v18 }
 0x970   : > { %v1857_v59 = vsel %vm358_vm2, %v4344_v20, 0.0 }
 0x971   : > { %2755 = vpow2.f32 %v1772_v15  ;;  %1858 = vadd.xlane.f32.xlu2 %v1857_v59 }
 0x974   : > { %v4348_v61 = vpop.xlane.xlu0 %1816  ;;  %v1673_v19 = vpop.xlane.xlu2 %1672 }
 0x975   : > { %v1717_v55 = vsub.f32 %v4230_v45, %v1673_v19 }
 0x977   : > { %v4351_v26 = vpop.eup %2755  ;;  %v1774_v42 = vmul.f32 1.442695, %v1717_v55 }
 0x978   : > { %v1860_v21 = vsel %vm358_vm2, %v4351_v26, 0.0 }
 0x979   : > { %2757 = vpow2.f32 %v1774_v42  ;;  %1861 = vadd.xlane.f32.xlu0 %v1860_v21 }
 0x97c   : > { %v4355_v57 = vpop.xlane.xlu1 %1819  ;;  %v1676_v39 = vpop.xlane.xlu0 %1675 }
 0x97d   : > { %v1718_v58 = vsub.f32 %v4238_v24, %v1676_v39 }
 0x97f   : > { %v4358_v40 = vpop.eup %2757  ;;  %v1776_v23 = vmul.f32 1.442695, %v1718_v58 }
 0x980   : > { %v1863_v47 = vsel %vm358_vm2, %v4358_v40, 0.0 }
 0x981   : > { %2759 = vpow2.f32 %v1776_v23  ;;  %1864 = vadd.xlane.f32.xlu1 %v1863_v47 }
 0x984   : > { %v1679_v45 = vpop.xlane.xlu1 %1678 }
 0x985   : > { %v1719_v25 = vsub.f32 %v4244_v36, %v1679_v45 }
 0x987   : > { %v4363_v35 = vpop.eup %2759  ;;  %v1778_v54 = vmul.f32 1.442695, %v1719_v25 }
 0x988   : > { %v1866_v60 = vsel %vm358_vm2, %v4363_v35, 0.0 }
 0x989   : > { %2761 = vpow2.f32 %v1778_v54  ;;  %1867 = vadd.xlane.f32.xlu2 %v1866_v60 }
 0x98c   : > { %v1682_v24 = vpop.xlane.xlu1 %1681 }
 0x98d   : > { %v1720_v51 = vsub.f32 %v4249_v14, %v1682_v24 }
 0x98f   : > { %v4368_v33 = vpop.eup %2761  ;;  %v1780_v6 = vmul.f32 1.442695, %v1720_v51 }
 0x990   : > { %v1869_v5 = vsel %vm358_vm2, %v4368_v33, 0.0 }
 0x991   : > { %2763 = vpow2.f32 %v1780_v6  ;;  %1870 = vadd.xlane.f32.xlu0 %v1869_v5 }
 0x994   : > { %v1685_v36 = vpop.xlane.xlu0 %1684 }
 0x995   : > { %v1721_v16 = vsub.f32 %v4254_v9, %v1685_v36 }
 0x997   : > { %v4373_v18 = vpop.eup %2763  ;;  %v1782_v15 = vmul.f32 1.442695, %v1721_v16 }
 0x998   : > { %v1872_v59 = vsel %vm358_vm2, %v4373_v18, 0.0 }
 0x999   : > { %2765 = vpow2.f32 %v1782_v15  ;;  %1873 = vadd.xlane.f32.xlu1 %v1872_v59 }
 0x99c   : > { %v1688_v14 = vpop.xlane.xlu2 %1687 }
 0x99d   : > { %v1722_v19 = vsub.f32 %v4262_v49, %v1688_v14 }
 0x99f   : > { %v4378_v55 = vpop.eup %2765  ;;  %v1784_v42 = vmul.f32 1.442695, %v1722_v19 }
 0x9a0   : > { %v1875_v21 = vsel %vm358_vm2, %v4378_v55, 0.0 }
 0x9a1   : > { %2767 = vpow2.f32 %v1784_v42  ;;  %1876 = vadd.xlane.f32.xlu2 %v1875_v21 }
 0x9a4   : > { %v1823_v54 = vpop.xlane.xlu2 %1822 }
 0x9a5   : > { %v1691_v9 = vpop.xlane.xlu1 %1690 }
 0x9a6   : > { %v1723_v39 = vsub.f32 %v4273_v1, %v1691_v9 }
 0x9a7   : > { %v4383_v58 = vpop.eup %2767 }
 0x9a8   : > { %v1786_v23 = vmul.f32 1.442695, %v1723_v39  ;;  %v1878_v47 = vsel %vm358_vm2, %v4383_v58, 0.0 }
 0x9a9   : > { %1879 = vadd.xlane.f32.xlu0 %v1878_v47 }
 0x9aa   : > { %2769 = vpow2.f32 %v1786_v23 }
 0x9ab   : > { %2771 = vrcp.f32 %v4304_v7 }
 0x9ac   : > { %2773 = vrcp.f32 %v4282_v56 }
 0x9ad   : > { %2775 = vrcp.f32 %v4293_v62  ;;  %v1829_v7 = vpop.xlane.xlu1 %1828 }
 0x9ae   : > { %2777 = vrcp.f32 %v4311_v13 }
 0x9af   : > { %2779 = vrcp.f32 %v4320_v28 }
 0x9b0   : > { %v4387_v49 = vpop.eup %2769  ;;  %2781 = vrcp.f32 %v4318_v8  ;;  %v1826_v8 = vpop.xlane.xlu0 %1825 }
 0x9b1   : > { %v1881_v45 = vsel %vm358_vm2, %v4387_v49, 0.0  ;;  %v2772_v1 = vpop.eup %2771  ;;  %2783 = vrcp.f32 %v4327_v41  ;;  %v1832_v41 = vpop.xlane.xlu2 %1831 }
 0x9b2   : > { %1882 = vadd.xlane.f32.xlu1 %v1881_v45  ;;  %v2774_v25 = vpop.eup %2773  ;;  %v4397_v60 = vmul.f32 %v2772_v1, %v4160_v46  ;;  %2785 = vrcp.f32 %v4334_v4 }
 0x9b3   : > { %v2776_v24 = vpop.eup %2775  ;;  %v4400_v51 = vmul.f32 %v2774_v25, %v4151_v53  ;;  %2787 = vrcp.f32 %v4341_v44 }
 0x9b4   : > { %v2778_v6 = vpop.eup %2777  ;;  %v1949_v56 = vsel %vm358_vm2, %v4397_v60, 0.0  ;;  %v4409_v46 = vmul.f32 %v2776_v24, %v4163_v11  ;;  %2789 = vrcp.f32 %v4348_v61 }
 0x9b5   : > { %v2780_v62 = vpop.eup %2779  ;;  %v1948_v13 = vsel %vm358_vm2, %v4400_v51, 0.0  ;;  %v4412_v28 = vmul.f32 %v2778_v6, %v4173_v3  ;;  %2791 = vrcp.f32 %v4355_v57  ;;  %v1838_v21 = vpop.xlane.xlu1 %1837 }
 0x9b6   : > { %v1950_v53 = vadd.f32 %v1949_v56, %v1948_v13  ;;  %v4416_v5 = vmul.f32 %v2780_v62, %v4187_v22  ;;  %v2782_v36 = vpop.eup %2781  ;;  %v1951_v16 = vsel %vm358_vm2, %v4409_v46, 0.0  ;;  %2793 = vrcp.f32 %v1823_v54 }
 0x9b7   : > { %v1953_v11 = vsel %vm358_vm2, %v4412_v28, 0.0  ;;  %v2784_v15 = vpop.eup %2783  ;;  %v4428_v44 = vmul.f32 %v2782_v36, %v4190_v17  ;;  %2795 = vrcp.f32 %v1826_v8 }
 0x9b8   : > { %v1952_v3 = vadd.f32 %v1951_v16, %v1950_v53  ;;  %v1955_v4 = vsel %vm358_vm2, %v4416_v5, 0.0  ;;  %v2786_v22 = vpop.eup %2785  ;;  %v4431_v14 = vmul.f32 %v2784_v15, %v4201_v0  ;;  %v1835_v47 = vpop.xlane.xlu0 %1834  ;;  %2797 = vrcp.f32 %v1829_v7 }
 0x9b9   : > { %v2788_v19 = vpop.eup %2787  ;;  %v4434_v9 = vmul.f32 %v2786_v22, %v4210_v2  ;;  %v1957_v39 = vsel %vm358_vm2, %v4428_v44, 0.0  ;;  %v1841_v45 = vpop.xlane.xlu2 %1840  ;;  %2799 = vrcp.f32 %v1832_v41 }
 0x9ba   : > { %v1954_v59 = vadd.f32 %v1953_v11, %v1952_v3  ;;  %v2790_v61 = vpop.eup %2789  ;;  %v1959_v57 = vsel %vm358_vm2, %v4431_v14, 0.0  ;;  %v4441_v17 = vmul.f32 %v2788_v19, %v4219_v31  ;;  %2801 = vrcp.f32 %v1835_v47 }
 0x9bb   : > { %v2792_v23 = vpop.eup %2791  ;;  %v1961_v1 = vsel %vm358_vm2, %v4434_v9, 0.0  ;;  %v4446_v2 = vmul.f32 %v2790_v61, %v4228_v34  ;;  %2803 = vrcp.f32 %v1838_v21 }
 0x9bc   : > { %v1956_v42 = vadd.f32 %v1955_v4, %v1954_v59  ;;  %v2794_v25 = vpop.eup %2793  ;;  %v1963_v24 = vsel %vm358_vm2, %v4441_v17, 0.0  ;;  %v4451_v31 = vmul.f32 %v2792_v23, %v4236_v63  ;;  %2805 = vrcp.f32 %v1841_v45 }
 0x9bd   : > { %v1965_v62 = vsel %vm358_vm2, %v4446_v2, 0.0  ;;  %v4456_v13 = vmul.f32 %v2794_v25, %v4269_v38  ;;  %v2796_v53 = vpop.eup %2795 }
 0x9be   : > { %v1958_v0 = vadd.f32 %v1957_v39, %v1956_v42  ;;  %v1967_v8 = vsel %vm358_vm2, %v4451_v31, 0.0  ;;  %v2798_v7 = vpop.eup %2797  ;;  %v4463_v3 = vmul.f32 %v2796_v53, %v4258_v50 }
 0x9bf   : > { %v1969_v63 = vsel %vm358_vm2, %v4456_v13, 0.0  ;;  %v4466_v38 = vmul.f32 %v2798_v7, %v4287_v48  ;;  %v2800_v59 = vpop.eup %2799 }
 0x9c0   : > { %v1960_v54 = vadd.f32 %v1959_v57, %v1958_v0  ;;  %v1844_v16 = vpop.xlane.xlu0 %1843  ;;  %v1971_v41 = vsel %vm358_vm2, %v4463_v3, 0.0  ;;  %v2802_v57 = vpop.eup %2801  ;;  %v4473_v50 = vmul.f32 %v2800_v59, %v4284_v52 }
 0x9c1   : > { %v1973_v19 = vsel %vm358_vm2, %v4466_v38, 0.0  ;;  %v2804_v48 = vpop.eup %2803  ;;  %2807 = vrcp.f32 %v1844_v16  ;;  %v4476_v0 = vmul.f32 %v2802_v57, %v4271_v27 }
 0x9c2   : > { %v1962_v6 = vadd.f32 %v1961_v1, %v1960_v54  ;;  %v1975_v47 = vsel %vm358_vm2, %v4473_v50, 0.0  ;;  %v4481_v1 = vmul.f32 %v2804_v48, %v4295_v10  ;;  %v2806_v54 = vpop.eup %2805 }
 0x9c4   : > { %v1847_v56 = vpop.xlane.xlu1 %1846  ;;  %v1964_v34 = vadd.f32 %v1963_v24, %v1962_v6  ;;  %v1977_v6 = vsel %vm358_vm2, %v4476_v0, 0.0  ;;  %v1979_v27 = vsel %vm358_vm2, %v4481_v1, 0.0 }
 0x9c5   : > { %2809 = vrcp.f32 %v1847_v56 }
 0x9c6   : > { %v1966_v36 = vadd.f32 %v1965_v62, %v1964_v34  ;;  %v4488_v34 = vmul.f32 %v2806_v54, %v4298_v12 }
 0x9c7   : > { %v2808_v52 = vpop.eup %2807 }
 0x9c8   : > { %v1968_v15 = vadd.f32 %v1967_v8, %v1966_v36  ;;  %v4491_v10 = vmul.f32 %v2808_v52, %v4307_v32 }
 0x9ca   : > { %v1970_v4 = vadd.f32 %v1969_v63, %v1968_v15  ;;  %v1983_v63 = vsel %vm358_vm2, %v4491_v10, 0.0 }
 0x9cb   : > { %v2810_v56 = vpop.eup %2809 }
 0x9cc   : > { %v1850_v11 = vpop.xlane.xlu2 %1849  ;;  %v1972_v42 = vadd.f32 %v1971_v41, %v1970_v4  ;;  %v4494_v36 = vmul.f32 %v2810_v56, %v4314_v29 }
 0x9cd   : > { %2811 = vrcp.f32 %v1850_v11  ;;  %v1981_v11 = vsel %vm358_vm2, %v4488_v34, 0.0 }
 0x9ce   : > { %v1974_v23 = vadd.f32 %v1973_v19, %v1972_v42  ;;  %v1985_v29 = vsel %vm358_vm2, %v4494_v36, 0.0 }
 0x9d0   : > { %v1976_v25 = vadd.f32 %v1975_v47, %v1974_v23 }
 0x9d2   : > { %v1978_v62 = vadd.f32 %v1977_v6, %v1976_v25 }
 0x9d3   : > { %v2812_v53 = vpop.eup %2811 }
 0x9d4   : > { %v1980_v8 = vadd.f32 %v1979_v27, %v1978_v62  ;;  %v4501_v12 = vmul.f32 %v2812_v53, %v4323_v43 }
 0x9d5   : > { %v1853_v61 = vpop.xlane.xlu0 %1852 }
 0x9d6   : > { %2813 = vrcp.f32 %v1853_v61  ;;  %v1982_v15 = vadd.f32 %v1981_v11, %v1980_v8  ;;  %v1987_v43 = vsel %vm358_vm2, %v4501_v12, 0.0 }
 0x9d8   : > { %v1984_v19 = vadd.f32 %v1983_v63, %v1982_v15 }
 0x9dc   : > { %v1856_v22 = vpop.xlane.xlu1 %1855  ;;  %v2814_v16 = vpop.eup %2813 }
 0x9dd   : > { %2815 = vrcp.f32 %v1856_v22  ;;  %v4506_v59 = vmul.f32 %v2814_v16, %v4330_v37 }
 0x9df   : > { %v1989_v48 = vsel %vm358_vm2, %v4506_v59, 0.0 }
 0x9e3   : > { %v2816_v32 = vpop.eup %2815 }
 0x9e4   : > { %v1859_v39 = vpop.xlane.xlu2 %1858  ;;  %v4511_v42 = vmul.f32 %v2816_v32, %v4337_v30 }
 0x9e5   : > { %2817 = vrcp.f32 %v1859_v39  ;;  %v1986_v39 = vadd.f32 %v1985_v29, %v1984_v19 }
 0x9e6   : > { %v1991_v25 = vsel %vm358_vm2, %v4511_v42, 0.0 }
 0x9eb   : > { %v2818_v41 = vpop.eup %2817 }
 0x9ec   : > { %v1862_v45 = vpop.xlane.xlu0 %1861  ;;  %v4516_v37 = vmul.f32 %v2818_v41, %v4344_v20 }
 0x9ed   : > { %2819 = vrcp.f32 %v1862_v45 }
 0x9ee   : > { %v1993_v20 = vsel %vm358_vm2, %v4516_v37, 0.0 }
 0x9f3   : > { %v2820_v61 = vpop.eup %2819 }
 0x9f4   : > { %v1865_v21 = vpop.xlane.xlu1 %1864  ;;  %v4521_v54 = vmul.f32 %v2820_v61, %v4351_v26 }
 0x9fc   : > { %v1868_v24 = vpop.xlane.xlu2 %1867 }
 0xa04   : > { %v1871_v4 = vpop.xlane.xlu0 %1870 }
 0xa0c   : > { %v1874_v7 = vpop.xlane.xlu1 %1873 }
 0xa0d   : > { %2821 = vrcp.f32 %v1874_v7 }
 0xa0e   : > { %2823 = vrcp.f32 %v1865_v21  ;;  %v1988_v21 = vadd.f32 %v1987_v43, %v1986_v39 }
 0xa10   : > { %v1990_v52 = vadd.f32 %v1989_v48, %v1988_v21 }
 0xa12   : > { %v1992_v62 = vadd.f32 %v1991_v25, %v1990_v52 }
 0xa13   : > { %v2822_v57 = vpop.eup %2821 }
 0xa14   : > { %v1877_v22 = vpop.xlane.xlu2 %1876  ;;  %v2824_v23 = vpop.eup %2823  ;;  %v4524_v45 = vmul.f32 %v2822_v57, %v4373_v18  ;;  %v1995_v18 = vsel %vm358_vm2, %v4521_v54, 0.0 }
 0xa15   : > { %2825 = vrcp.f32 %v1877_v22  ;;  %v4532_v27 = vmul.f32 %v2824_v23, %v4358_v40 }
 0xa16   : > { %2827 = vrcp.f32 %v1868_v24 }
 0xa17   : > { %2829 = vrcp.f32 %v1871_v4  ;;  %v1997_v8 = vsel %vm358_vm2, %v4532_v27, 0.0 }
 0xa1b   : > { %v2826_v47 = vpop.eup %2825 }
 0xa1c   : > { %v2828_v30 = vpop.eup %2827  ;;  %v4527_v24 = vmul.f32 %v2826_v47, %v4378_v55  ;;  %v1880_v6 = vpop.xlane.xlu0 %1879  ;;  %v1994_v55 = vadd.f32 %v1993_v20, %v1992_v62 }
 0xa1d   : > { %v2830_v56 = vpop.eup %2829  ;;  %2831 = vrcp.f32 %v1880_v6  ;;  %v4539_v53 = vmul.f32 %v2828_v30, %v4363_v35  ;;  %v2003_v35 = vsel %vm358_vm2, %v4524_v45, 0.0 }
 0xa1e   : > { %v2136_v26 = vpack.c.bf16 %v4527_v24, %v4524_v45  ;;  %v4544_v7 = vmul.f32 %v2830_v56, %v4368_v33  ;;  %v1996_v40 = vadd.f32 %v1995_v18, %v1994_v55  ;;  %v2005_v29 = vsel %vm358_vm2, %v4527_v24, 0.0 }
 0xa1f   : > { %v1999_v16 = vsel %vm358_vm2, %v4539_v53, 0.0 }
 0xa20   : > { %v1998_v63 = vadd.f32 %v1997_v8, %v1996_v40  ;;  %v2001_v32 = vsel %vm358_vm2, %v4544_v7, 0.0 }
 0xa22   : > { %v2000_v4 = vadd.f32 %v1999_v16, %v1998_v63 }
 0xa23   : > { %v2832_v11 = vpop.eup %2831 }
 0xa24   : > { %v4553_v22 = vmul.f32 %v2832_v11, %v4383_v58  ;;  %v2002_v33 = vadd.f32 %v2001_v32, %v2000_v4 }
 0xa25   : > { %v1883_v15 = vpop.xlane.xlu1 %1882 }
 0xa26   : > { %2833 = vrcp.f32 %v1883_v15  ;;  %v2004_v41 = vadd.f32 %v2003_v35, %v2002_v33  ;;  %v2007_v19 = vsel %vm358_vm2, %v4553_v22, 0.0 }
 0xa28   : > { %v2006_v61 = vadd.f32 %v2005_v29, %v2004_v41 }
 0xa2a   : > { %v2008_v57 = vadd.f32 %v2007_v19, %v2006_v61 }
 0xa2c   : > { %v2834_v43 = vpop.eup %2833 }
 0xa2d   : > { %v4560_v39 = vmul.f32 %v2834_v43, %v4387_v49 }
 0xa2f   : > { %v2009_v48 = vsel %vm358_vm2, %v4560_v39, 0.0  ;;  %v2137_v58 = vpack.c.bf16 %v4560_v39, %v4553_v22 }
 0xa30   : > { %v2010_v23 = vadd.f32 %v2009_v48, %v2008_v57 }
 0xa32   : > { %v2011_v21 = vrot.slane %v2010_v23, 4 }
 0xa34   : > { %v2012_v47 = vadd.f32 %v2011_v21, %v2010_v23 }
 0xa36   : > { %v2013_v25 = vrot.slane %v2012_v47, 2 }
 0xa38   : > { %v2014_v30 = vadd.f32 %v2013_v25, %v2012_v47 }
 0xa3a   : > { %v2015_v52 = vrot.slane %v2014_v30, 1 }
 0xa3c   : > { %v2016_v6 = vadd.f32 %v2015_v52, %v2014_v30 }
 0xa3e   : > { %v2017_v20 = vadd.f32 1e-06, %v2016_v6 }
 0xa40   : > { %2835 = vrcp.f32 %v2017_v20 }
 0xa46   : > { %v4566_v56 = vpop.eup %2835 }
 0xa47   : > { %v2033_v49 = vmul.f32 %v4566_v56, %v4473_v50  ;;  %v2034_v62 = vmul.f32 %v4566_v56, %v4476_v0  ;;  %v2031_v55 = vmul.f32 %v4566_v56, %v4463_v3  ;;  %v2032_v8 = vmul.f32 %v4566_v56, %v4466_v38 }
 0xa48   : > { %v2029_v16 = vmul.f32 %v4566_v56, %v4451_v31  ;;  %v2030_v11 = vmul.f32 %v4566_v56, %v4456_v13  ;;  %v2027_v32 = vmul.f32 %v4566_v56, %v4441_v17  ;;  %v2028_v15 = vmul.f32 %v4566_v56, %v4446_v2 }
 0xa49   : > { %v2058_v18 = vpack.c.bf16 %v2034_v62, %v2033_v49  ;;  %v2057_v40 = vpack.c.bf16 %v2032_v8, %v2031_v55  ;;  %v2025_v35 = vmul.f32 %v4566_v56, %v4431_v14  ;;  %v2026_v33 = vmul.f32 %v4566_v56, %v4434_v9  ;;  %v2068_v49 = vld.sshfl [vmem:[#allocation1] sm:$0xff pattern:$0x73625140] }
 0xa4a   : > { %v2056_v63 = vpack.c.bf16 %v2030_v11, %v2029_v16  ;;  %v2055_v4 = vpack.c.bf16 %v2028_v15, %v2027_v32  ;;  %v2023_v41 = vmul.f32 %v4566_v56, %v4416_v5  ;;  %v2024_v19 = vmul.f32 %v4566_v56, %v4428_v44 }
 0xa4b   : > { %2072 = vmatpush.bf16.msra.mxu2 %v2058_v18  ;;  %v2054_v29 = vpack.c.bf16 %v2026_v33, %v2025_v35  ;;  %v2021_v61 = vmul.f32 %v4566_v56, %v4409_v46  ;;  %v2022_v57 = vmul.f32 %v4566_v56, %v4412_v28  ;;  %v2019_v23 = vmul.f32 %v4566_v56, %v4400_v51 }
 0xa4c   : > { %v2053_v43 = vpack.c.bf16 %v2024_v19, %v2023_v41  ;;  %v2020_v21 = vmul.f32 %v4566_v56, %v4397_v60  ;;  %v2049_v47 = vmul.f32 %v4566_v56, %v4553_v22  ;;  %v2050_v25 = vmul.f32 %v4566_v56, %v4560_v39 }
 0xa4d   : > { %v2052_v48 = vpack.c.bf16 %v2022_v57, %v2021_v61  ;;  %v2047_v6 = vmul.f32 %v4566_v56, %v4524_v45  ;;  %v2048_v20 = vmul.f32 %v4566_v56, %v4527_v24  ;;  %v2045_v18 = vmul.f32 %v4566_v56, %v4539_v53 }
 0xa4e   : > { %v2051_v30 = vpack.c.bf16 %v2020_v21, %v2019_v23  ;;  %v2066_v52 = vpack.c.bf16 %v2050_v25, %v2049_v47  ;;  %v2046_v55 = vmul.f32 %v4566_v56, %v4544_v7  ;;  %v2044_v16 = vmul.f32 %v4566_v56, %v4532_v27  ;;  %v2069_v21 = vld.sshfl [vmem:[#allocation1 + $0x8] sm:$0xff pattern:$0x73625140] }
 0xa4f   : > { %2073 = vmatpush.bf16.msra.mxu2 %v2057_v40  ;;  %v2065_v62 = vpack.c.bf16 %v2048_v20, %v2047_v6  ;;  %v2043_v40 = vmul.f32 %v4566_v56, %v4521_v54  ;;  %v2042_v32 = vmul.f32 %v4566_v56, %v4516_v37  ;;  %v2040_v35 = vmul.f32 %v4566_v56, %v4506_v59 }
 0xa50   : > { %v2064_v8 = vpack.c.bf16 %v2046_v55, %v2045_v18  ;;  %v2038_v41 = vmul.f32 %v4566_v56, %v4494_v36  ;;  %v2036_v61 = vmul.f32 %v4566_v56, %v4488_v34  ;;  %v2129_v57 = vpack.c.bf16 %v4476_v0, %v4473_v50 }
 0xa51   : > { %v2063_v11 = vpack.c.bf16 %v2044_v16, %v2043_v40  ;;  %v2128_v47 = vpack.c.bf16 %v4466_v38, %v4463_v3  ;;  %v2126_v50 = vpack.c.bf16 %v4446_v2, %v4441_v17  ;;  %v2124_v38 = vpack.c.bf16 %v4428_v44, %v4416_v5 }
 0xa52   : > { %v2163_v23 = vsel %vm358_vm2, %v2129_v57, 0  ;;  %v2122_v2 = vpack.c.bf16 %v4397_v60, %v4400_v51  ;;  %v2187_v5 = vsel %vm358_vm2, %v2137_v58, 0  ;;  %v2134_v51 = vpack.c.bf16 %v4532_v27, %v4521_v54 }
 0xa53   : > { %2074 = vmatpush.bf16.msra.mxu2 %v2056_v63  ;;  %v2041_v63 = vmul.f32 %v4566_v56, %v4511_v42  ;;  %v2160_v25 = vsel %vm358_vm2, %v2128_v47, 0  ;;  %v2154_v0 = vsel %vm358_vm2, %v2126_v50, 0  ;;  %v2132_v24 = vpack.c.bf16 %v4506_v59, %v4501_v12 }
 0xa54   : > { %v2178_v44 = vsel %vm358_vm2, %v2134_v51, 0 }
 0xa55   : > { %v2062_v15 = vpack.c.bf16 %v2042_v32, %v2041_v63 }
 0xa57   : > { %2075 = vmatpush.bf16.msra.mxu2 %v2055_v4  ;;  %v2039_v4 = vmul.f32 %v4566_v56, %v4501_v12 }
 0xa59   : > { %v2061_v33 = vpack.c.bf16 %v2040_v35, %v2039_v4 }
 0xa5b   : > { %2076 = vmatpush.bf16.msra.mxu2 %v2054_v29  ;;  %v2037_v29 = vmul.f32 %v4566_v56, %v4491_v10 }
 0xa5d   : > { %v2060_v19 = vpack.c.bf16 %v2038_v41, %v2037_v29 }
 0xa5f   : > { %2077 = vmatpush.bf16.msra.mxu2 %v2053_v43  ;;  %v2035_v43 = vmul.f32 %v4566_v56, %v4481_v1  ;;  %v2127_v56 = vpack.c.bf16 %v4456_v13, %v4451_v31  ;;  %v2148_v31 = vsel %vm358_vm2, %v2124_v38, 0  ;;  %v2123_v13 = vpack.c.bf16 %v4412_v28, %v4409_v46 }
 0xa60   : > { %v2184_v46 = vsel %vm358_vm2, %v2136_v26, 0  ;;  %v2135_v28 = vpack.c.bf16 %v4544_v7, %v4539_v53  ;;  %v2172_v26 = vsel %vm358_vm2, %v2132_v24, 0  ;;  %v2131_v53 = vpack.c.bf16 %v4494_v36, %v4491_v10 }
 0xa61   : > { %v2145_v17 = vsel %vm358_vm2, %v2123_v13, 0  ;;  %v2130_v7 = vpack.c.bf16 %v4488_v34, %v4481_v1 }
 0xa62   : > { %v2181_v60 = vsel %vm358_vm2, %v2135_v28, 0  ;;  %v2169_v54 = vsel %vm358_vm2, %v2131_v53, 0 }
 0xa63   : > { %2078 = vmatpush.bf16.msra.mxu2 %v2052_v48  ;;  %v2059_v48 = vpack.c.bf16 %v2036_v61, %v2035_v43 }
 0xa67   : > { %2079 = vmatpush.bf16.msra.mxu2 %v2051_v30  ;;  %v2157_v30 = vsel %vm358_vm2, %v2127_v56, 0 }
 0xa6a   : > { %2080 = vmatmul.bf16.vlgmr.msra.gmra.mxu2 %v2068_v49 }
 0xa6b   : > { %2085 = vmatpush.bf16.msrb.mxu2 %v2066_v52  ;;  %v2125_v52 = vpack.c.bf16 %v4434_v9, %v4431_v14  ;;  %v2142_v14 = vsel %vm358_vm2, %v2122_v2, 0  ;;  %v2133_v9 = vpack.c.bf16 %v4516_v37, %v4511_v42  ;;  %v2166_v42 = vsel %vm358_vm2, %v2130_v7, 0 }
 0xa6d   : > { %v2151_v3 = vsel %vm358_vm2, %v2125_v52, 0  ;;  %v2175_v45 = vsel %vm358_vm2, %v2133_v9, 0 }
 0xa6f   : > { %2086 = vmatpush.bf16.msrb.mxu2 %v2065_v62 }
 0xa73   : > { %2087 = vmatpush.bf16.msrb.mxu2 %v2064_v8 }
 0xa77   : > { %2088 = vmatpush.bf16.msrb.mxu2 %v2063_v11 }
 0xa7b   : > { %2089 = vmatpush.bf16.msrb.mxu2 %v2062_v15 }
 0xa7f   : > { %2090 = vmatpush.bf16.msrb.mxu2 %v2061_v33 }
 0xa83   : > { %2091 = vmatpush.bf16.msrb.mxu2 %v2060_v19 }
 0xa87   : > { %2092 = vmatpush.bf16.msrb.mxu2 %v2059_v48 }
 0xa8a   : > { %2093 = vmatmul.bf16.vlgmr.msrb.gmra.mxu2 %v2069_v21 }
 0xa8b   : > { %2189 = vmatpush.bf16.xpose.msra.mxu2 %v2163_v23 }
 0xa93   : > { %2190 = vmatpush.bf16.xpose.msra.mxu2 %v2160_v25 }
 0xa9b   : > { %2191 = vmatpush.bf16.xpose.msra.mxu2 %v2157_v30 }
 0xaa3   : > { %2192 = vmatpush.bf16.xpose.msra.mxu2 %v2154_v0 }
 0xaab   : > { %2193 = vmatpush.bf16.xpose.msra.mxu2 %v2151_v3 }
 0xab3   : > { %2194 = vmatpush.bf16.xpose.msra.mxu2 %v2148_v31 }
 0xabb   : > { %2195 = vmatpush.bf16.xpose.msra.mxu2 %v2145_v17 }
 0xac3   : > { %2196 = vmatpush.bf16.xpose.msra.mxu2 %v2142_v14 }
 0xacb   : > { %2202 = vmatpush.bf16.xpose.msrb.mxu2 %v2187_v5 }
 0xad3   : > { %2203 = vmatpush.bf16.xpose.msrb.mxu2 %v2184_v46 }
 0xadb   : > { %2204 = vmatpush.bf16.xpose.msrb.mxu2 %v2181_v60 }
 0xae3   : > { %2205 = vmatpush.bf16.xpose.msrb.mxu2 %v2178_v44 }
 0xaeb   : > { %2206 = vmatpush.bf16.xpose.msrb.mxu2 %v2175_v45 }
 0xaed   : > { %v2081_v27 = vpop.f32.mrf.mxu2 }
 0xaf3   : > { %2207 = vmatpush.bf16.xpose.msrb.mxu2 %v2172_v26 }
 0xaf5   : > { %v2083_v37 = vpop.f32.mrf.mxu2 }
 0xafb   : > { %2208 = vmatpush.bf16.xpose.msrb.mxu2 %v2169_v54 }
 0xb03   : > { %2209 = vmatpush.bf16.xpose.msrb.mxu2 %v2166_v42 }
 0xb0d   : > { %v2094_v22 = vpop.f32.mrf.mxu2 }
 0xb0e   : > { %v2095_v39 = vadd.f32 %v2094_v22, %v2081_v27 }
 0xb10   : > { %v2098_v12 = vmul.f32 %v2095_v39, %v2095_v39 }
 0xb12   : > { %v2099_v59 = vsel %vm862_vm3, %v2098_v12, 0.0 }
 0xb13   : > { %v2100_v58 = vrot.slane %v2099_v59, 4 }
 0xb15   : > { %v2101_v6 = vadd.f32 %v2100_v58, %v2099_v59  ;;  %v2096_v20 = vpop.f32.mrf.mxu2 }
 0xb17   : > { %v2102_v10 = vrot.slane %v2101_v6, 2 }
 0xb19   : > { %v2103_v36 = vadd.f32 %v2102_v10, %v2101_v6 }
 0xb1b   : > { %v2104_v49 = vrot.slane %v2103_v36, 1 }
 0xb1d   : > { %v2105_v62 = vadd.f32 %v2104_v49, %v2103_v36 }
 0xb1f   : > { %2837 = vrsqrt.f32 %v2105_v62  ;;  %vm2113_vm8 = vcmp.eq.f32.partialorder %v2105_v62, inf  ;;  %v2116_v11 = vand.u32 2147483648, %v2105_v62  ;;  %vm2115_vm9 = vcmp.eq.f32.partialorder %v2105_v62, 0.0 }
 0xb25   : > { %v2838_v18 = vpop.eup %2837 }
 0xb26   : > { %v2107_v1 = vmul.f32 %v2838_v18, %v2105_v62 }
 0xb28   : > { %v2108_v34 = vmul.f32 %v2838_v18, %v2107_v1 }
 0xb2a   : > { %v2109_v55 = vmul.f32 0.5, %v2108_v34 }
 0xb2c   : > { %v2110_v8 = vsub.f32 1.5, %v2109_v55 }
 0xb2e   : > { %v2111_v40 = vmul.f32 %v2838_v18, %v2110_v8 }
 0xb30   : > { %v2112_v16 = vmul.f32 %v2111_v40, %v2105_v62 }
 0xb32   : > { %v2114_v63 = vsel %vm2113_vm8, %v2105_v62, %v2112_v16 }
 0xb33   : > { %v2117_v32 = vsel %vm2115_vm9, %v2116_v11, %v2114_v63 }
 0xb34   : > { %v2118_v15 = vadd.f32 1e-06, %v2117_v32 }
 0xb36   : > { %2839 = vrcp.f32 %v2118_v15 }
 0xb3c   : > { %v2840_v4 = vpop.eup %2839 }
 0xb3d   : > { %v2120_v35 = vmul.f32 %v2840_v4, %v2095_v39 }
 0xb3f   : > { %v2121_v33 = vpack.c.bf16 %v2120_v35, %v2120_v35  ;;  %2225 = vst.msk [vmem:[%s171_s6] sm:$0xf] %vm862_vm3, %v2120_v35 }
 0xb41   : > { %2391 = vmatmul.msk.bf16.vlgmr.msra.gmra.mxu2 %vm358_vm2, %v2121_v33 }
 0xb51   : > { %2392 = vmatmul.msk.bf16.vlgmr.msrb.gmra.mxu2 %vm358_vm2, %v2121_v33 }
 0xb52   : > { %2868 = shalt.err (!%p2865_p3)
}
 0xb53   : > { %2399 = dma.vmem_to_hbm [thread:$0]  (%p2963_p5), %s2248_s11, 64, %s2250_s17, %s2232_s19  }
 0xb54   : > { %s181_s6 = scalar_lea.vmem %s4726_s2, %s2397_s27 }
 0xbc4   : > { %v2198_v29 = vpop.f32.mrf.mxu2 }
 0xbc5   : > { %v2215_v43 = vmax.f32 %v2198_v29, 0.0 }
 0xbcc   : > { %v2200_v41 = vpop.f32.mrf.mxu2 }
 0xbd4   : > { %v2211_v19 = vpop.f32.mrf.mxu2 }
 0xbd5   : > { %v2216_v61 = vmax.f32 %v2211_v19, 0.0 }
 0xbd7   : > { %v2217_v57 = vpack.c.bf16 %v2216_v61, %v2215_v43 }
 0xbd9   : > { %v2219_v48 = vrot.slane %v2217_v57, 2 }
 0xbdb   : > { %v2222_v23 = vsel %vm265_vm0, %v2217_v57, %v2219_v48 }
 0xbdc   : > { %2224 = vst [vmem:[%s181_s6] sm:$0xf] %v2222_v23  ;;  %v2213_v21 = vpop.f32.mrf.mxu2 }
 0xbdd PF: > { %p2405_p4 = scmp.ge.s32.totalorder %s2903_s15, 2  ;;  %s2269_s22 = sand.u32 1, %s2891_s12  }
 0xbde   : > { %s2270_s7 = scalar_lea.sflag [#allocation3], %s2269_s22 }
 0xbdf   : > { %p2402_p5 = pnand %p2405_p4, %p2967_p6 }
 0xbe1   : > { %p2403_p7 = pneg %p2402_p5 }
 0xbe3   : > { %2886 = dma.done.wait (%p2403_p7), %s2270_s7, 64  }
 0xbe4   : > { %2888 = vsyncadd (%p2403_p7), %s2270_s7, 4294967232  ;;  %p14_p8 = scmp.ge.s32.totalorder %s2950_s18, 4   ;;  %s4764_s12 = smov %s2895_s13 }
 0xbe5   : > { %s4765_s13 = smov %s2899_s14  ;;  %s4766_s14 = smov %s2961_s21 }
 0xbe6   : > { %s4767_s15 = smov %s2950_s18  ;;  %16 = sbr.rel (!%p14_p8) target bundleno = 3 (0x3), region = 75 }
 0xbeb   :  { %2276 = vsyncpa [#allocation3], 1 }
 0xbec   :  { %2278 = vsyncpa [#allocation3 + $0x1], 1 }

</bundles_post_ra>
